<compile_context>
chip_gen: v7x
topology: tpu7x:2x2x1
jax: 0.10.0
libtpu: 0.0.40
codegen_flags: <defaults>
</compile_context>

<pallas_src>
import jax
import jax.numpy as jnp
from jax.experimental import pallas as pl
from jax.experimental.pallas import tpu as pltpu

INPUT_SIZE = 16 * 64          # 1024, as in the PyTorch __init__ default
NUM_OF_CHESS = 6              # true output width
OUT_PAD = 128                 # lane-dense padded output width (cols 6..127 are zero)
HIDDEN = 256
H4 = 64
TB_DEFAULT = 256              # batch tile: multiple of 256 -> full MXU passes on v6e/v7x,
                              # and 2x128 passes on v5e


def chess_model_kernel(x_ref,
                       w1_ref, b1_ref,
                       w2_ref, b2_ref,
                       w3_ref, b3_ref,
                       w4_ref, b4_ref,
                       w5_ref, b5_ref,
                       pw_ref,
                       o_ref):
    """One (TB, 1024) batch tile -> unnormalized abs(logits * priority_weight), (TB, 128)."""
    x = x_ref[...]                                                 # (TB, 1024) bf16

    # Linear(1024, 256) + ReLU    (bf16 operands, f32 accumulation on the MXU)
    h = jnp.dot(x, w1_ref[...], preferred_element_type=jnp.float32) + b1_ref[...]
    h = jnp.maximum(h, 0.0)

    # Linear(256, 256) + ReLU
    h = jnp.dot(h.astype(jnp.bfloat16), w2_ref[...],
                preferred_element_type=jnp.float32) + b2_ref[...]
    h = jnp.maximum(h, 0.0)

    # Linear(256, 256) + Sigmoid  (exact f32 sigmoid; exp rides the EUP slot)
    h = jnp.dot(h.astype(jnp.bfloat16), w3_ref[...],
                preferred_element_type=jnp.float32) + b3_ref[...]
    h = 1.0 / (1.0 + jnp.exp(-h))

    # Linear(256, 64) + ReLU
    h = jnp.dot(h.astype(jnp.bfloat16), w4_ref[...],
                preferred_element_type=jnp.float32) + b4_ref[...]
    h = jnp.maximum(h, 0.0)

    # Linear(64, 6) zero-padded to 128 output lanes -> unmasked lane-dense store
    logits = jnp.dot(h.astype(jnp.bfloat16), w5_ref[...],
                     preferred_element_type=jnp.float32) + b5_ref[...]

    # transform_output_to_probability numerator: abs(logits * priority_weight).
    # Padded columns of W5 / b5 / pw are zero, so they stay zero here and never
    # contaminate the global normalization sum done in the wrapper.
    o_ref[...] = jnp.abs(logits * pw_ref[...])


def chess_model_forward(x, params, priority_weight, *, tb=TB_DEFAULT):
    """x: (B, INPUT_SIZE) f32. params: list of 5 (W_(in,out) f32, b_(1,out) f32)."""
    B = x.shape[0]
    grid = max(1, -(-B // tb))
    b_pad = grid * tb

    # Cast activations / weights to bf16 at matmul inputs; biases stay f32.
    x_p = x.astype(jnp.bfloat16)
    if b_pad != B:
        x_p = jnp.pad(x_p, ((0, b_pad - B), (0, 0)))

    (w1, b1), (w2, b2), (w3, b3), (w4, b4), (w5, b5) = params

    # Lane-dense final layer: pad 6 -> 128 output columns with zeros.
    w5p = jnp.zeros((H4, OUT_PAD), jnp.float32).at[:, :NUM_OF_CHESS].set(w5)
    b5p = jnp.zeros((1, OUT_PAD), jnp.float32).at[:, :NUM_OF_CHESS].set(b5)
    pwp = jnp.zeros((1, OUT_PAD), jnp.float32).at[:, :NUM_OF_CHESS].set(priority_weight)

    weights = [w1, w2, w3, w4, w5p]
    biases = [b1, b2, b3, b4, b5p]

    flat_args = [x_p]
    const_specs = []
    for w, b in zip(weights, biases):
        flat_args.append(w.astype(jnp.bfloat16))
        const_specs.append(pl.BlockSpec(w.shape, lambda i: (0, 0)))   # VMEM-resident
        flat_args.append(b)
        const_specs.append(pl.BlockSpec(b.shape, lambda i: (0, 0)))
    flat_args.append(pwp)
    const_specs.append(pl.BlockSpec(pwp.shape, lambda i: (0, 0)))

    out = pl.pallas_call(
        chess_model_kernel,
        out_shape=jax.ShapeDtypeStruct((b_pad, OUT_PAD), jnp.float32),
        grid_spec=pltpu.PrefetchScalarGridSpec(
            num_scalar_prefetch=0,
            grid=(grid,),
            in_specs=[pl.BlockSpec((tb, INPUT_SIZE), lambda i: (i, 0))] + const_specs,
            out_specs=pl.BlockSpec((tb, OUT_PAD), lambda i: (i, 0)),
        ),
        compiler_params=pltpu.CompilerParams(
            dimension_semantics=("parallel",),
            vmem_limit_bytes=32 << 20,   # ~3 MiB actual footprint; safe on v7x (64 MiB VMEM)
        ),
    )(*flat_args)

    # Drop batch padding + lane padding, then apply the global normalization
    # (PyTorch divides by the sum over ALL elements of the (B, 6) output).
    p = out[:B, :NUM_OF_CHESS]
    return p / jnp.sum(p)


def init_params(key):
    """Deterministic synthetic weights matching nn.Linear shapes (stored as (in,out))."""
    layer_dims = [(INPUT_SIZE, HIDDEN), (HIDDEN, HIDDEN), (HIDDEN, HIDDEN),
                  (HIDDEN, H4), (H4, NUM_OF_CHESS)]
    params = []
    for (din, dout) in layer_dims:
        key, kw, kb = jax.random.split(key, 3)
        scale = 1.0 / jnp.sqrt(jnp.float32(din))
        w = jax.random.uniform(kw, (din, dout), jnp.float32, -scale, scale)
        b = jax.random.uniform(kb, (1, dout), jnp.float32, -scale, scale)
        params.append((w, b))
    return params


def reference_forward(x, params, priority_weight):
    """Plain-JAX reference with matching bf16-matmul / f32-accumulate numerics."""
    acts = ["relu", "relu", "sigmoid", "relu", "none"]
    h = x
    for (w, b), a in zip(params, acts):
        h = jnp.dot(h.astype(jnp.bfloat16), w.astype(jnp.bfloat16),
                    preferred_element_type=jnp.float32) + b
        if a == "relu":
            h = jnp.maximum(h, 0.0)
        elif a == "sigmoid":
            h = 1.0 / (1.0 + jnp.exp(-h))
    p = jnp.abs(h * priority_weight)
    return p / jnp.sum(p)


if __name__ == "__main__":
    key = jax.random.PRNGKey(0)
    k_params, k_x = jax.random.split(key)

    params = init_params(k_params)
    priority_weight = jnp.ones((1, NUM_OF_CHESS), jnp.float32)   # configs default: ones(6)
    # TODO(synk): rules / person_style / grid_priority are None in the default
    # config (arbitrary user callables/tensors); not representable generically.

    B = 512   # real batch: 2 grid steps of TB=256 -> exercises the pipelined parallel grid
    x = jax.random.normal(k_x, (B, INPUT_SIZE), jnp.float32)

    out = chess_model_forward(x, params, priority_weight)
    out = jax.block_until_ready(out)

    ref = reference_forward(x, params, priority_weight)
    assert out.shape == (B, NUM_OF_CHESS)
    # Kernel and reference share the same bf16-matmul / f32-accumulate / exact-sigmoid
    # numerics; the tolerance is scaled for the tiny normalized values (~3e-4 each).
    max_err = float(jnp.max(jnp.abs(out - ref)))
    assert jnp.allclose(out, ref, rtol=2e-2, atol=1e-5), max_err

    print("KERNEL_OK")
</pallas_src>

<mosaic_0001>
module attributes {stable_mosaic.version = 11 : i64} {
  func.func @chess_model_kernel(%arg0: i32, %arg1: memref<256x1024xbf16, #tpu.memory_space<vmem>>, %arg2: memref<1024x256xbf16, #tpu.memory_space<vmem>>, %arg3: memref<1x256xf32, #tpu.memory_space<vmem>>, %arg4: memref<256x256xbf16, #tpu.memory_space<vmem>>, %arg5: memref<1x256xf32, #tpu.memory_space<vmem>>, %arg6: memref<256x256xbf16, #tpu.memory_space<vmem>>, %arg7: memref<1x256xf32, #tpu.memory_space<vmem>>, %arg8: memref<256x64xbf16, #tpu.memory_space<vmem>>, %arg9: memref<1x64xf32, #tpu.memory_space<vmem>>, %arg10: memref<64x128xbf16, #tpu.memory_space<vmem>>, %arg11: memref<1x128xf32, #tpu.memory_space<vmem>>, %arg12: memref<1x128xf32, #tpu.memory_space<vmem>>, %arg13: memref<256x128xf32, #tpu.memory_space<vmem>>) attributes {dimension_semantics = [#tpu.dimension_semantics<parallel>], iteration_bounds = array<i64: 2>, scalar_prefetch = 0 : i64, scratch_operands = 0 : i64, tpu.core_type = #tpu.core_type<tc>, window_params = [{transform_indices = @transform_0, window_bounds = array<i64: 256, 1024>}, {pipeline_mode = #tpu.pipeline_mode<synchronous>, transform_indices = @transform_1, window_bounds = array<i64: 1024, 256>}, {pipeline_mode = #tpu.pipeline_mode<synchronous>, transform_indices = @transform_2, window_bounds = array<i64: 1, 256>}, {pipeline_mode = #tpu.pipeline_mode<synchronous>, transform_indices = @transform_3, window_bounds = array<i64: 256, 256>}, {pipeline_mode = #tpu.pipeline_mode<synchronous>, transform_indices = @transform_4, window_bounds = array<i64: 1, 256>}, {pipeline_mode = #tpu.pipeline_mode<synchronous>, transform_indices = @transform_5, window_bounds = array<i64: 256, 256>}, {pipeline_mode = #tpu.pipeline_mode<synchronous>, transform_indices = @transform_6, window_bounds = array<i64: 1, 256>}, {pipeline_mode = #tpu.pipeline_mode<synchronous>, transform_indices = @transform_7, window_bounds = array<i64: 256, 64>}, {pipeline_mode = #tpu.pipeline_mode<synchronous>, transform_indices = @transform_8, window_bounds = array<i64: 1, 64>}, {pipeline_mode = #tpu.pipeline_mode<synchronous>, transform_indices = @transform_9, window_bounds = array<i64: 64, 128>}, {pipeline_mode = #tpu.pipeline_mode<synchronous>, transform_indices = @transform_10, window_bounds = array<i64: 1, 128>}, {pipeline_mode = #tpu.pipeline_mode<synchronous>, transform_indices = @transform_11, window_bounds = array<i64: 1, 128>}, {transform_indices = @transform_12, window_bounds = array<i64: 256, 128>}]} {
    %c0 = arith.constant 0 : index
    %c0_0 = arith.constant 0 : index
    %0 = vector.load %arg1[%c0, %c0_0] : memref<256x1024xbf16, #tpu.memory_space<vmem>>, vector<256x1024xbf16>
    %c0_1 = arith.constant 0 : index
    %c0_2 = arith.constant 0 : index
    %1 = vector.load %arg2[%c0_1, %c0_2] : memref<1024x256xbf16, #tpu.memory_space<vmem>>, vector<1024x256xbf16>
    %cst = arith.constant dense<0.000000e+00> : vector<256x256xf32>
    %2 = tpu.matmul %0, %1, %cst {dimension_numbers = #tpu.dot_dimension_numbers<[1], [0], [0], [1], [0, 0, 1, 1], [], []>} : vector<256x1024xbf16>, vector<1024x256xbf16>, vector<256x256xf32> -> vector<256x256xf32>
    %c0_3 = arith.constant 0 : index
    %c0_4 = arith.constant 0 : index
    %3 = vector.load %arg3[%c0_3, %c0_4] : memref<1x256xf32, #tpu.memory_space<vmem>>, vector<1x256xf32>
    %4 = vector.broadcast %3 : vector<1x256xf32> to vector<256x256xf32>
    %5 = arith.addf %2, %4 : vector<256x256xf32>
    %cst_5 = arith.constant 0.000000e+00 : f32
    %6 = vector.broadcast %cst_5 : f32 to vector<256x256xf32>
    %7 = arith.maximumf %5, %6 : vector<256x256xf32>
    %8 = arith.truncf %7 : vector<256x256xf32> to vector<256x256xbf16>
    %c0_6 = arith.constant 0 : index
    %c0_7 = arith.constant 0 : index
    %9 = vector.load %arg4[%c0_6, %c0_7] : memref<256x256xbf16, #tpu.memory_space<vmem>>, vector<256x256xbf16>
    %cst_8 = arith.constant dense<0.000000e+00> : vector<256x256xf32>
    %10 = tpu.matmul %8, %9, %cst_8 {dimension_numbers = #tpu.dot_dimension_numbers<[1], [0], [0], [1], [0, 0, 1, 1], [], []>} : vector<256x256xbf16>, vector<256x256xbf16>, vector<256x256xf32> -> vector<256x256xf32>
    %c0_9 = arith.constant 0 : index
    %c0_10 = arith.constant 0 : index
    %11 = vector.load %arg5[%c0_9, %c0_10] : memref<1x256xf32, #tpu.memory_space<vmem>>, vector<1x256xf32>
    %12 = vector.broadcast %11 : vector<1x256xf32> to vector<256x256xf32>
    %13 = arith.addf %10, %12 : vector<256x256xf32>
    %cst_11 = arith.constant 0.000000e+00 : f32
    %14 = vector.broadcast %cst_11 : f32 to vector<256x256xf32>
    %15 = arith.maximumf %13, %14 : vector<256x256xf32>
    %16 = arith.truncf %15 : vector<256x256xf32> to vector<256x256xbf16>
    %c0_12 = arith.constant 0 : index
    %c0_13 = arith.constant 0 : index
    %17 = vector.load %arg6[%c0_12, %c0_13] : memref<256x256xbf16, #tpu.memory_space<vmem>>, vector<256x256xbf16>
    %cst_14 = arith.constant dense<0.000000e+00> : vector<256x256xf32>
    %18 = tpu.matmul %16, %17, %cst_14 {dimension_numbers = #tpu.dot_dimension_numbers<[1], [0], [0], [1], [0, 0, 1, 1], [], []>} : vector<256x256xbf16>, vector<256x256xbf16>, vector<256x256xf32> -> vector<256x256xf32>
    %c0_15 = arith.constant 0 : index
    %c0_16 = arith.constant 0 : index
    %19 = vector.load %arg7[%c0_15, %c0_16] : memref<1x256xf32, #tpu.memory_space<vmem>>, vector<1x256xf32>
    %20 = vector.broadcast %19 : vector<1x256xf32> to vector<256x256xf32>
    %21 = arith.addf %18, %20 : vector<256x256xf32>
    %cst_17 = arith.constant 0.000000e+00 : f32
    %22 = vector.broadcast %cst_17 : f32 to vector<256x256xf32>
    %23 = arith.subf %22, %21 : vector<256x256xf32>
    %24 = math.exp %23 : vector<256x256xf32>
    %cst_18 = arith.constant 1.000000e+00 : f32
    %25 = vector.broadcast %cst_18 : f32 to vector<256x256xf32>
    %26 = arith.addf %25, %24 : vector<256x256xf32>
    %cst_19 = arith.constant 1.000000e+00 : f32
    %27 = vector.broadcast %cst_19 : f32 to vector<256x256xf32>
    %28 = arith.divf %27, %26 : vector<256x256xf32>
    %29 = arith.truncf %28 : vector<256x256xf32> to vector<256x256xbf16>
    %c0_20 = arith.constant 0 : index
    %c0_21 = arith.constant 0 : index
    %30 = vector.load %arg8[%c0_20, %c0_21] : memref<256x64xbf16, #tpu.memory_space<vmem>>, vector<256x64xbf16>
    %cst_22 = arith.constant dense<0.000000e+00> : vector<256x64xf32>
    %31 = tpu.matmul %29, %30, %cst_22 {dimension_numbers = #tpu.dot_dimension_numbers<[1], [0], [0], [1], [0, 0, 1, 1], [], []>} : vector<256x256xbf16>, vector<256x64xbf16>, vector<256x64xf32> -> vector<256x64xf32>
    %c0_23 = arith.constant 0 : index
    %c0_24 = arith.constant 0 : index
    %32 = vector.load %arg9[%c0_23, %c0_24] : memref<1x64xf32, #tpu.memory_space<vmem>>, vector<1x64xf32>
    %33 = vector.broadcast %32 : vector<1x64xf32> to vector<256x64xf32>
    %34 = arith.addf %31, %33 : vector<256x64xf32>
    %cst_25 = arith.constant 0.000000e+00 : f32
    %35 = vector.broadcast %cst_25 : f32 to vector<256x64xf32>
    %36 = arith.maximumf %34, %35 : vector<256x64xf32>
    %37 = arith.truncf %36 : vector<256x64xf32> to vector<256x64xbf16>
    %c0_26 = arith.constant 0 : index
    %c0_27 = arith.constant 0 : index
    %38 = vector.load %arg10[%c0_26, %c0_27] : memref<64x128xbf16, #tpu.memory_space<vmem>>, vector<64x128xbf16>
    %cst_28 = arith.constant dense<0.000000e+00> : vector<256x128xf32>
    %39 = tpu.matmul %37, %38, %cst_28 {dimension_numbers = #tpu.dot_dimension_numbers<[1], [0], [0], [1], [0, 0, 1, 1], [], []>} : vector<256x64xbf16>, vector<64x128xbf16>, vector<256x128xf32> -> vector<256x128xf32>
    %c0_29 = arith.constant 0 : index
    %c0_30 = arith.constant 0 : index
    %40 = vector.load %arg11[%c0_29, %c0_30] : memref<1x128xf32, #tpu.memory_space<vmem>>, vector<1x128xf32>
    %41 = vector.broadcast %40 : vector<1x128xf32> to vector<256x128xf32>
    %42 = arith.addf %39, %41 : vector<256x128xf32>
    %c0_31 = arith.constant 0 : index
    %c0_32 = arith.constant 0 : index
    %43 = vector.load %arg12[%c0_31, %c0_32] : memref<1x128xf32, #tpu.memory_space<vmem>>, vector<1x128xf32>
    %44 = vector.broadcast %43 : vector<1x128xf32> to vector<256x128xf32>
    %45 = arith.mulf %42, %44 : vector<256x128xf32>
    %46 = math.absf %45 : vector<256x128xf32>
    %c0_33 = arith.constant 0 : index
    %c0_34 = arith.constant 0 : index
    %47 = vector.load %arg13[%c0_33, %c0_34] : memref<256x128xf32, #tpu.memory_space<vmem>>, vector<256x128xf32>
    tpu.vector_store %arg13[%c0_33, %c0_34], %46 {strides = array<i32>} : memref<256x128xf32, #tpu.memory_space<vmem>>, vector<256x128xf32>,
    return
  }
  func.func @transform_0(%arg0: i32) -> (i32, i32) {
    %c0_i32 = arith.constant 0 : i32
    %c0_i32_0 = arith.constant 0 : i32
    return %arg0, %c0_i32 : i32, i32
  }
  func.func @transform_1(%arg0: i32) -> (i32, i32) {
    %c0_i32 = arith.constant 0 : i32
    %c0_i32_0 = arith.constant 0 : i32
    %c0_i32_1 = arith.constant 0 : i32
    return %c0_i32, %c0_i32_0 : i32, i32
  }
  func.func @transform_2(%arg0: i32) -> (i32, i32) {
    %c0_i32 = arith.constant 0 : i32
    %c0_i32_0 = arith.constant 0 : i32
    %c0_i32_1 = arith.constant 0 : i32
    return %c0_i32, %c0_i32_0 : i32, i32
  }
  func.func @transform_3(%arg0: i32) -> (i32, i32) {
    %c0_i32 = arith.constant 0 : i32
    %c0_i32_0 = arith.constant 0 : i32
    %c0_i32_1 = arith.constant 0 : i32
    return %c0_i32, %c0_i32_0 : i32, i32
  }
  func.func @transform_4(%arg0: i32) -> (i32, i32) {
    %c0_i32 = arith.constant 0 : i32
    %c0_i32_0 = arith.constant 0 : i32
    %c0_i32_1 = arith.constant 0 : i32
    return %c0_i32, %c0_i32_0 : i32, i32
  }
  func.func @transform_5(%arg0: i32) -> (i32, i32) {
    %c0_i32 = arith.constant 0 : i32
    %c0_i32_0 = arith.constant 0 : i32
    %c0_i32_1 = arith.constant 0 : i32
    return %c0_i32, %c0_i32_0 : i32, i32
  }
  func.func @transform_6(%arg0: i32) -> (i32, i32) {
    %c0_i32 = arith.constant 0 : i32
    %c0_i32_0 = arith.constant 0 : i32
    %c0_i32_1 = arith.constant 0 : i32
    return %c0_i32, %c0_i32_0 : i32, i32
  }
  func.func @transform_7(%arg0: i32) -> (i32, i32) {
    %c0_i32 = arith.constant 0 : i32
    %c0_i32_0 = arith.constant 0 : i32
    %c0_i32_1 = arith.constant 0 : i32
    return %c0_i32, %c0_i32_0 : i32, i32
  }
  func.func @transform_8(%arg0: i32) -> (i32, i32) {
    %c0_i32 = arith.constant 0 : i32
    %c0_i32_0 = arith.constant 0 : i32
    %c0_i32_1 = arith.constant 0 : i32
    return %c0_i32, %c0_i32_0 : i32, i32
  }
  func.func @transform_9(%arg0: i32) -> (i32, i32) {
    %c0_i32 = arith.constant 0 : i32
    %c0_i32_0 = arith.constant 0 : i32
    %c0_i32_1 = arith.constant 0 : i32
    return %c0_i32, %c0_i32_0 : i32, i32
  }
  func.func @transform_10(%arg0: i32) -> (i32, i32) {
    %c0_i32 = arith.constant 0 : i32
    %c0_i32_0 = arith.constant 0 : i32
    %c0_i32_1 = arith.constant 0 : i32
    return %c0_i32, %c0_i32_0 : i32, i32
  }
  func.func @transform_11(%arg0: i32) -> (i32, i32) {
    %c0_i32 = arith.constant 0 : i32
    %c0_i32_0 = arith.constant 0 : i32
    %c0_i32_1 = arith.constant 0 : i32
    return %c0_i32, %c0_i32_0 : i32, i32
  }
  func.func @transform_12(%arg0: i32) -> (i32, i32) {
    %c0_i32 = arith.constant 0 : i32
    %c0_i32_0 = arith.constant 0 : i32
    return %arg0, %c0_i32 : i32, i32
  }
}

</mosaic_0001>

<bundles_post_ra>
// kernel: tpu_custom_call.1
= control target key start
LH: loop header
LB: loop body
LE: loop exit
PB: predicated region body
PF: predicated region fallthrough
CT: control target
= control target key end

     0   :  { %s7582_s0 = inlined_call_operand.hbm [shape: bf16[512,1024], index: 0, kind: input, shape index: {}]   ;;  %s7583_s1 = inlined_call_operand.hbm [shape: bf16[1024,256], index: 1, kind: input, shape index: {}]   ;;  %s7584_s2 = inlined_call_operand.vmem [shape: f32[1,256], index: 2, kind: input, shape index: {}]   ;;  %s7585_s3 = inlined_call_operand.hbm [shape: bf16[256,256], index: 3, kind: input, shape index: {}]   ;;  %s7586_s4 = inlined_call_operand.vmem [shape: f32[1,256], index: 4, kind: input, shape index: {}]   ;;  %s7587_s5 = inlined_call_operand.hbm [shape: bf16[256,256], index: 5, kind: input, shape index: {}]   ;;  %s7588_s6 = inlined_call_operand.vmem [shape: f32[1,256], index: 6, kind: input, shape index: {}]   ;;  %s7589_s7 = inlined_call_operand.vmem [shape: bf16[256,64], index: 7, kind: input, shape index: {}]   ;;  %s7590_s8 = inlined_call_operand.vmem [shape: f32[1,64], index: 8, kind: input, shape index: {}]   ;;  %s7591_s9 = inlined_call_operand.vmem [shape: bf16[64,128], index: 9, kind: input, shape index: {}]   ;;  %s7592_s10 = inlined_call_operand.vmem [shape: f32[1,128], index: 10, kind: input, shape index: {}]   ;;  %s7593_s11 = inlined_call_operand.vmem [shape: f32[1,128], index: 11, kind: input, shape index: {}]   ;;  %s7594_s12 = inlined_call_operand.hbm [shape: f32[512,128], index: 12, kind: output, shape index: {}]  }
   0x1   :  { %7601 = sst [smem:[#allocation17_spill]] %s7590_s8 }
   0x2   :  { %7602 = sst [smem:[#allocation18_spill]] %s7592_s10 }
   0x3   :  { %7603 = sst [smem:[#allocation19_spill]] %s7593_s11 }
   0x4   :  { %7604 = sst [smem:[#allocation20_spill]] %s7594_s12 }
   0x5   :  { %17 = vsyncpa [#allocation3], 0 }
   0x6   :  { %19 = vsyncpa [#allocation3 + $0x1], 0 }
   0x7   :  { %20 = vsyncpa [#allocation6], 0 }
   0x8   :  { %21 = vsyncpa [#allocation9], 0 }
   0x9   :  { %22 = vsyncpa [#allocation4], 0 }
   0xa   :  { %24 = vsyncpa [#allocation4 + $0x1], 0  ;;  %s6738_s21 = smov 0   ;;  %s6740_s22 = smov 0  }
   0xb   :  { %s6742_s23 = smov 0   ;;  %s6744_s24 = smov 0  }
   0xc LB: > { %7605 = sst [smem:[#allocation15_spill]] %s6648_s21  ;;  %s6759_s25 = sadd.s32 4294967295, %s6660_s24   ;;  %s6660_s24 = sphi %s6744_s24, %s7633_s24   ;;  %s6656_s23 = sphi %s6742_s23, %s7632_s23   ;;  %s6652_s22 = sphi %s6740_s22, %s7631_s22   ;;  %s6648_s21 = sphi %s6738_s21, %s7630_s21  }
   0xd   : > { %s5014_s26 = sadd.s32 4294967294, %s6660_s24   ;;  %p50_p0 = scmp.ne.s32.totalorder %s6652_s22, %s6648_s21 }
   0xe   : > { %p7597_p1 = scmp.eq.s32.totalorder %s6759_s25, 0  ;;  %p311_p3 = scmp.eq.s32.totalorder %s5014_s26, 1 }
   0xf   : > { %p5015_p5 = scmp.ge.s32.totalorder %s6660_s24, 1  ;;  %p318_p7 = scmp.lt.s32.totalorder %s6660_s24, 3 }
  0x10   : > { %p6768_p4 = por %p7597_p1, %p50_p0  ;;  %p6773_p6 = por %p311_p3, %p50_p0 }
  0x11   : > { %p6778_p8 = pnand %p5015_p5, %p318_p7  ;;  %s6662_s30 = smov [#allocation5]  }
  0x12   : > { %s7606_s27 = scalar_select %p6768_p4, 1, 0 }
  0x13   : > { %s7607_s28 = scalar_select %p6773_p6, 1, 0 }
  0x14   : > { %s7609_s29 = scalar_select %p6778_p8, 1, 0 }
  0x15   : > { %7608 = sst [smem:[#allocation16_spill]] %s7607_s28  ;;  %s330_s13 = sshll.u32 %s6662_s30, 4  ;;  %s6782_s13 = int_to_ptr.vmem [resolvable:$true] %s330_s13 }
  0x16   : > { %p5841_p9 = pneg %p6778_p8  ;;  %s6663_s15 = smov [#allocation7]  }
  0x17   : > { %s346_s16 = sshll.u32 %s6663_s15, 4  ;;  %s6664_s17 = smov [#allocation8]   ;;  %s6793_s16 = int_to_ptr.vmem [resolvable:$true] %s346_s16 }
  0x18   : > { %p6789_p11 = pnand %p5841_p9, %p7597_p1  ;;  %s6795_s18 = sshll.u32 %s6664_s17, 4  ;;  %s363_s18 = int_to_ptr.vmem [resolvable:$true] %s6795_s18 }
  0x19   : > { %s6472_s26 = scalar_lea.hbm %s7583_s1, 16384 }
  0x1a   : > { %p6473_p12 = scmp.ne.s32.totalorder %s7583_s1, %s6472_s26  ;;  %p6805_p13 = pneg %p6789_p11 }
  0x1b   : > { %p6479_p5 = scmp.lt.u32.totalorder %s6472_s26, %s7583_s1 }
  0x1c   : > { %p6475_p0 = pnand %p6805_p13, %p6473_p12 }
  0x1e   : > { %p6476_p3 = pneg %p6475_p0 }
  0x20   : > { %p6481_p7 = pnand %p6479_p5, %p6476_p3 }
  0x22   : > { %6484 = shalt.err (!%p6481_p7)
}
  0x23   : > { %s6485_s28 = scalar_lea.vmem %s6782_s13, 16384  ;;  %p6493_p2 = scmp.lt.s32.totalorder %s6782_s13, %s6782_s13 }
  0x24   : > { %p6486_p9 = scmp.ne.s32.totalorder %s6782_s13, %s6485_s28  ;;  %p6494_p6 = scmp.lt.s32.totalorder %s6485_s28, %s6485_s28 }
  0x26   : > { %p6488_p10 = pnand %p6486_p9, %p6805_p13  ;;  %p6495_p12 = por %p6494_p6, %p6493_p2 }
  0x28   : > { %p6489_p1 = pneg %p6488_p10 }
  0x2a   : > { %p6496_p0 = pnand %p6495_p12, %p6489_p1 }
  0x2c   : > { %6499 = shalt.err (!%p6496_p0)
}
  0x2d   : > { %s6665_s19 = smov 128   ;;  %s6666_s20 = smov 8  }
  0x2e   : > { %5844 = dma.hbm_to_vmem [thread:$0]  (!%p6789_p11), %s7583_s1, 16384, %s6782_s13, [#allocation6], %s6665_s19, %s6665_s19, %s6666_s20  }
  0x2f   : > { %s6500_s28 = scalar_lea.hbm %s7585_s3, 4096 }
  0x30   : > { %p6501_p1 = scmp.ne.s32.totalorder %s7585_s3, %s6500_s28  ;;  %p6507_p10 = scmp.lt.u32.totalorder %s6500_s28, %s7585_s3 }
  0x32   : > { %p6503_p2 = pnand %p6501_p1, %p6805_p13 }
  0x34   : > { %p6504_p6 = pneg %p6503_p2 }
  0x36   : > { %p6509_p3 = pnand %p6507_p10, %p6504_p6 }
  0x38   : > { %6512 = shalt.err (!%p6509_p3)
}
  0x39   : > { %s6513_s13 = scalar_lea.vmem %s6793_s16, 4096  ;;  %p6521_p12 = scmp.lt.s32.totalorder %s6793_s16, %s6793_s16 }
  0x3a   : > { %p6514_p5 = scmp.ne.s32.totalorder %s6793_s16, %s6513_s13  ;;  %p6522_p0 = scmp.lt.s32.totalorder %s6513_s13, %s6513_s13 }
  0x3c   : > { %p6516_p7 = pnand %p6514_p5, %p6805_p13  ;;  %p6523_p1 = por %p6522_p0, %p6521_p12 }
  0x3e   : > { %p6517_p9 = pneg %p6516_p7 }
  0x40   : > { %p6524_p2 = pnand %p6523_p1, %p6517_p9 }
  0x42   : > { %6527 = shalt.err (!%p6524_p2)
}
  0x43   : > { %5847 = dma.hbm_to_vmem [thread:$0]  (!%p6789_p11), %s7585_s3, 4096, %s6793_s16, [#allocation6], %s6665_s19, %s6665_s19, %s6666_s20  }
  0x44   : > { %s6528_s26 = scalar_lea.hbm %s7587_s5, 4096 }
  0x45   : > { %p6529_p6 = scmp.ne.s32.totalorder %s7587_s5, %s6528_s26  ;;  %p6535_p5 = scmp.lt.u32.totalorder %s6528_s26, %s7587_s5 }
  0x47   : > { %p6531_p10 = pnand %p6529_p6, %p6805_p13 }
  0x49   : > { %p6532_p3 = pneg %p6531_p10 }
  0x4b   : > { %p6537_p7 = pnand %p6535_p5, %p6532_p3 }
  0x4d   : > { %6540 = shalt.err (!%p6537_p7)
}
  0x4e   : > { %s6541_s13 = scalar_lea.vmem %s363_s18, 4096  ;;  %p6549_p1 = scmp.lt.s32.totalorder %s363_s18, %s363_s18 }
  0x4f   : > { %p6542_p9 = scmp.ne.s32.totalorder %s363_s18, %s6541_s13  ;;  %p6550_p2 = scmp.lt.s32.totalorder %s6541_s13, %s6541_s13 }
  0x51   : > { %p6544_p12 = pnand %p6542_p9, %p6805_p13  ;;  %p6551_p4 = por %p6550_p2, %p6549_p1 }
  0x53   : > { %p6545_p0 = pneg %p6544_p12 }
  0x55   : > { %p6552_p8 = pnand %p6551_p4, %p6545_p0 }
  0x57   : > { %6555 = shalt.err (!%p6552_p8)
}
  0x58   : > { %5850 = dma.hbm_to_vmem [thread:$0]  (!%p6789_p11), %s7587_s5, 4096, %s363_s18, [#allocation9], %s6665_s19, %s6665_s19, %s6666_s20  }
  0x59   : > { %s6878_s21 = sadd.s32 1, %s6660_s24   ;;  %s37_s10 = sadd.s32 1, %s6656_s23 }
  0x5a   : > { %s34_s14 = ssub.s32 %s6660_s24, %s6878_s21  ;;  %p44_p8 = scmp.ne.s32.totalorder %s6656_s23, %s6652_s22 }
  0x5b   : > { %p35_p4 = scmp.eq.s32.totalorder %s34_s14, 0  ;;  %p45_p13 = scmp.eq.s32.totalorder %s6660_s24, 0 }
  0x5c   : > { %p5862_p6 = scmp.lt.s32.totalorder %s6660_s24, 2  ;;  %p7612_p3 = scmp.eq.s32.totalorder %s6759_s25, 1 }
  0x5d   : > { %s6888_s11 = scalar_select %p35_p4, %s6656_s23, %s37_s10  }
  0x5e   : > { %p46_p10 = por %p45_p13, %p44_p8  ;;  %p6892_p5 = por %p7612_p3, %p44_p8 }
  0x5f   : > { %s394_s26 = sand.u32 1, %s6656_s23   ;;  %s5395_s30 = sshll.u32 %s6660_s24, 14 }
  0x60   : > { %s5020_s18 = sshll.u32 %s394_s26, 10  ;;  %s6901_s15 = scalar_lea.hbm %s7582_s0, %s5395_s30 }
  0x61   : > { %s398_s17 = scalar_lea.vmem [#allocation2], %s5020_s18  ;;  %p6903_p11 = pnand %p5862_p6, %p46_p10 }
  0x62   : > { %s406_s28 = sshll.u32 %s398_s17, 4  ;;  %s6909_s16 = scalar_lea.sflag [#allocation3], %s394_s26  ;;  %s6907_s28 = int_to_ptr.vmem [resolvable:$true] %s406_s28 }
  0x63   : > { %s6556_s8 = scalar_lea.hbm %s6901_s15, 16384  ;;  %p6558_p9 = pneg %p6903_p11 }
  0x64   : > { %p6557_p7 = scmp.ne.s32.totalorder %s6901_s15, %s6556_s8  ;;  %s6561_s30 = scalar_lea.hbm %s7582_s0, 32768 }
  0x65   : > { %p6562_p1 = scmp.lt.u32.totalorder %s6901_s15, %s7582_s0  ;;  %p6563_p2 = scmp.lt.u32.totalorder %s6561_s30, %s6556_s8 }
  0x66   : > { %p6559_p12 = pnand %p6558_p9, %p6557_p7  ;;  %p6565_p8 = scmp.lt.u32.totalorder %s6556_s8, %s6901_s15 }
  0x67   : > { %p6564_p4 = por %p6563_p2, %p6562_p1 }
  0x68   : > { %p6560_p0 = pneg %p6559_p12 }
  0x69   : > { %p6566_p13 = por %p6565_p8, %p6564_p4 }
  0x6b   : > { %p6567_p6 = pnand %p6566_p13, %p6560_p0 }
  0x6d   : > { %6570 = shalt.err (!%p6567_p6)
}
  0x6e   : > { %s6571_s26 = scalar_lea.vmem %s6907_s28, 16384  ;;  %s6667_s20 = smov [#allocation2]  }
  0x6f   : > { %p6572_p10 = scmp.ne.s32.totalorder %s6907_s28, %s6571_s26  ;;  %s6576_s17 = sshll.u32 %s6667_s20, 4  ;;  %s6577_s17 = int_to_ptr.vmem [resolvable:$false] %s6576_s17 }
  0x70   : > { %s6578_s14 = scalar_lea.vmem %s6577_s17, 32768  ;;  %p6579_p12 = scmp.lt.s32.totalorder %s6907_s28, %s6577_s17 }
  0x71   : > { %p6574_p3 = pnand %p6572_p10, %p6558_p9  ;;  %p6580_p1 = scmp.lt.s32.totalorder %s6578_s14, %s6571_s26 }
  0x73   : > { %p6575_p7 = pneg %p6574_p3  ;;  %p6581_p2 = por %p6580_p1, %p6579_p12 }
  0x75   : > { %p6582_p4 = pnand %p6581_p2, %p6575_p7 }
  0x77   : > { %6585 = shalt.err (!%p6582_p4)
}
  0x78   : > { %s6668_s8 = smov 512   ;;  %s6669_s10 = smov 32  }
  0x79   : > { %5854 = dma.hbm_to_vmem [thread:$0]  (!%p6903_p11), %s6901_s15, 16384, %s6907_s28, %s6909_s16, %s6668_s8, %s6668_s8, %s6669_s10  }
  0x7a   : > { %p7615_p9 = scmp.ne.s32.totalorder %s7609_s29, 0 }
  0x7b   : > { %s6940_s30 = sand.u32 (!%p7615_p9), 1, %s6652_s22   ;;  %p7616_p0 = scmp.ne.s32.totalorder (!%p7615_p9), %s7606_s27, 0 }
  0x7c   : > { %418 = sbr.rel (%p7615_p9) target bundleno = 1865 (0x749), region = 68  ;;  %s5025_s18 = sshll.u32 (!%p7615_p9), %s6940_s30, 10 }
  0x7d   : > { %s421_s19 = scalar_lea.sflag (!%p7615_p9), [#allocation3], %s6940_s30  ;;  %s6944_s26 = scalar_lea.vmem (!%p7615_p9), [#allocation2], %s5025_s18 }
  0x83   : > { %6631 = dma.done.wait (%p7616_p0), %s421_s19, 16384  }
  0x84   : > { %6633 = vsyncadd (%p7616_p0), %s421_s19, 4294950912  ;;  %p7617_p11 = scmp.eq.s32.totalorder %s6759_s25, 0 }
  0x86   : > { %6635 = dma.done.wait (%p7617_p11), [#allocation6], 20480   ;;  %p7618_p8 = pmov %p7617_p11 }
  0x88   : > { %6637 = vsyncadd (%p7618_p8), [#allocation6], 4294946816  ;;  %p7619_p13 = pmov %p7618_p8 }
  0x89   : > { %p7620_p6 = pmov %p7618_p8 }
  0x8a   : > { %6639 = dma.done.wait (%p7619_p13), [#allocation9], 4096  }
  0x8b   : > { %6641 = vsyncadd (%p7620_p6), [#allocation9], 4294963200  ;;  %v5908_v0 = vld [vmem:[#allocation5 + $0x4] ss:$8 sps:$4 sm:$0xff]   ;;  %v5910_v1 = vld [vmem:[#allocation5] ss:$8 sps:$4 sm:$0xff]  }
  0x8c   : > { %2028 = vmatprep.subr.bf16.mxu0 %v5908_v0  ;;  %v5911_v2 = vld [vmem:[#allocation5 + $0x14] ss:$8 sps:$4 sm:$0xff]   ;;  %v5913_v3 = vld [vmem:[#allocation5 + $0x10] ss:$8 sps:$4 sm:$0xff]   ;;  %v5914_v4 = vld [vmem:[#allocation5 + $0x24] ss:$8 sps:$4 sm:$0xff]  }
  0x8d   : > { %2029 = vmatpush1.bf16.msra.mxu0 %v5910_v1  ;;  %v5916_v5 = vld [vmem:[#allocation5 + $0x20] ss:$8 sps:$4 sm:$0xff]   ;;  %v5917_v6 = vld [vmem:[#allocation5 + $0x34] ss:$8 sps:$4 sm:$0xff]   ;;  %v5919_v7 = vld [vmem:[#allocation5 + $0x30] ss:$8 sps:$4 sm:$0xff]  }
  0x8e   : > { %2030 = vmatprep.subr.bf16.mxu0 %v5911_v2  ;;  %v5920_v8 = vld [vmem:[#allocation5 + $0x44] ss:$8 sps:$4 sm:$0xff]   ;;  %v5922_v9 = vld [vmem:[#allocation5 + $0x40] ss:$8 sps:$4 sm:$0xff]   ;;  %v5923_v10 = vld [vmem:[#allocation5 + $0x54] ss:$8 sps:$4 sm:$0xff]  }
  0x8f   : > { %v5925_v11 = vld [vmem:[#allocation5 + $0x50] ss:$8 sps:$4 sm:$0xff]   ;;  %v5926_v12 = vld [vmem:[#allocation5 + $0x64] ss:$8 sps:$4 sm:$0xff]   ;;  %v5928_v16 = vld [vmem:[#allocation5 + $0x60] ss:$8 sps:$4 sm:$0xff]  }
  0x90   : > { %v480_v13 = vld [vmem:[%s6944_s26] sm:$0xff]  ;;  %v5929_v17 = vld [vmem:[#allocation5 + $0x74] ss:$8 sps:$4 sm:$0xff]   ;;  %v5931_v18 = vld [vmem:[#allocation5 + $0x70] ss:$8 sps:$4 sm:$0xff]   ;;  %s7621_s20 = sld [smem:[#allocation17_spill]] }
  0x91   : > { %2031 = vmatpush1.bf16.msra.mxu0 %v5913_v3  ;;  %v484_v14 = vld [vmem:[%s6944_s26 + $0x20] sm:$0xff]  ;;  %v5935_v21 = vld [vmem:[#allocation5 + $0x94] ss:$8 sps:$4 sm:$0xff]   ;;  %v5937_v22 = vld [vmem:[#allocation5 + $0x90] ss:$8 sps:$4 sm:$0xff]   ;;  %vm4585_vm0 = vcmask 523264  }
  0x92   : > { %2032 = vmatprep.subr.bf16.mxu0 %v5914_v4  ;;  %v5031_v15 = vcombine.high %v480_v13, %v484_v14  ;;  %v5932_v19 = vld [vmem:[#allocation5 + $0x84] ss:$8 sps:$4 sm:$0xff]   ;;  %v5934_v20 = vld [vmem:[#allocation5 + $0x80] ss:$8 sps:$4 sm:$0xff]   ;;  %v5941_v25 = vld [vmem:[#allocation5 + $0xb4] ss:$8 sps:$4 sm:$0xff]   ;;  %v5030_v39 = vcombine.low %v480_v13, %v484_v14 }
  0x93   : > { %v5938_v23 = vld [vmem:[#allocation5 + $0xa4] ss:$8 sps:$4 sm:$0xff]   ;;  %v5940_v24 = vld [vmem:[#allocation5 + $0xa0] ss:$8 sps:$4 sm:$0xff]   ;;  %v5943_v26 = vld [vmem:[#allocation5 + $0xb0] ss:$8 sps:$4 sm:$0xff]  }
  0x94   : > { %2060 = vmatprep.mubr.bf16.mxu0 %v5031_v15  ;;  %v5944_v27 = vld [vmem:[#allocation5 + $0xc4] ss:$8 sps:$4 sm:$0xff]   ;;  %v5946_v28 = vld [vmem:[#allocation5 + $0xc0] ss:$8 sps:$4 sm:$0xff]   ;;  %v5947_v29 = vld [vmem:[#allocation5 + $0xd4] ss:$8 sps:$4 sm:$0xff]  }
  0x95   : > { %2033 = vmatpush1.bf16.msra.mxu0 %v5916_v5  ;;  %v5949_v30 = vld [vmem:[#allocation5 + $0xd0] ss:$8 sps:$4 sm:$0xff]   ;;  %v5950_v31 = vld [vmem:[#allocation5 + $0xe4] ss:$8 sps:$4 sm:$0xff]   ;;  %v5952_v32 = vld [vmem:[#allocation5 + $0xe0] ss:$8 sps:$4 sm:$0xff]  }
  0x96   : > { %2034 = vmatprep.subr.bf16.mxu0 %v5917_v6  ;;  %v5953_v33 = vld [vmem:[#allocation5 + $0xf4] ss:$8 sps:$4 sm:$0xff]   ;;  %v5955_v34 = vld [vmem:[#allocation5 + $0xf0] ss:$8 sps:$4 sm:$0xff]   ;;  %v5958_v35 = vld [vmem:[#allocation5 + $0x104] ss:$8 sps:$4 sm:$0xff]  }
  0x97   : > { %v488_v36 = vld [vmem:[%s6944_s26 + $0x40] sm:$0xff]  ;;  %v5961_v40 = vld [vmem:[#allocation5 + $0x114] ss:$8 sps:$4 sm:$0xff]   ;;  %v5959_v42 = vld [vmem:[#allocation5 + $0x110] ss:$8 sps:$4 sm:$0xff]   ;;  %s7622_s8 = sld [smem:[#allocation18_spill]] }
  0x98   : > { %v492_v37 = vld [vmem:[%s6944_s26 + $0x60] sm:$0xff]  ;;  %v5967_v48 = vld [vmem:[#allocation5 + $0x134] ss:$8 sps:$4 sm:$0xff]   ;;  %v5965_v52 = vld [vmem:[#allocation5 + $0x130] ss:$8 sps:$4 sm:$0xff]   ;;  %s7623_s19 = sld [smem:[#allocation19_spill]] }
  0x99   : > { %2035 = vmatpush1.bf16.msra.mxu0 %v5919_v7  ;;  %v5956_v38 = vld [vmem:[#allocation5 + $0x100] ss:$8 sps:$4 sm:$0xff]   ;;  %v5039_v41 = vcombine.high %v488_v36, %v492_v37  ;;  %v5964_v45 = vld [vmem:[#allocation5 + $0x124] ss:$8 sps:$4 sm:$0xff]   ;;  %v5038_v47 = vcombine.low %v488_v36, %v492_v37  ;;  %v5973_v56 = vld [vmem:[#allocation5 + $0x154] ss:$8 sps:$4 sm:$0xff]  }
  0x9a   : > { %2036 = vmatprep.subr.bf16.mxu0 %v5920_v8  ;;  %v496_v43 = vld [vmem:[%s6944_s26 + $0x80] sm:$0xff]  ;;  %v5971_v60 = vld [vmem:[#allocation5 + $0x150] ss:$8 sps:$4 sm:$0xff]   ;;  %v5979_v0 = vld [vmem:[#allocation5 + $0x174] ss:$8 sps:$4 sm:$0xff]   ;;  %s5396_s29 = sshll.u32 %s6759_s25, 12 }
  0x9b   : > { %v500_v44 = vld [vmem:[%s6944_s26 + $0xa0] sm:$0xff]  ;;  %v5977_v4 = vld [vmem:[#allocation5 + $0x170] ss:$8 sps:$4 sm:$0xff]   ;;  %v5985_v8 = vld [vmem:[#allocation5 + $0x194] ss:$8 sps:$4 sm:$0xff]   ;;  %s7624_s16 = sld [smem:[#allocation20_spill]] }
  0x9c   : > { %v5962_v46 = vld [vmem:[#allocation5 + $0x120] ss:$8 sps:$4 sm:$0xff]   ;;  %v5047_v49 = vcombine.high %v496_v43, %v500_v44  ;;  %v5970_v53 = vld [vmem:[#allocation5 + $0x144] ss:$8 sps:$4 sm:$0xff]   ;;  %v5046_v55 = vcombine.low %v496_v43, %v500_v44  ;;  %s4899_s25 = scalar_lea.sflag [#allocation4], %s6940_s30  ;;  %s6670_s14 = smov [#allocation10]  }
  0x9d   : > { %2037 = vmatpush1.bf16.msra.mxu0 %v5922_v9  ;;  %v504_v50 = vld [vmem:[%s6944_s26 + $0xc0] sm:$0xff] }
  0x9e   : > { %2038 = vmatprep.subr.bf16.mxu0 %v5923_v10  ;;  %v508_v51 = vld [vmem:[%s6944_s26 + $0xe0] sm:$0xff] }
  0x9f   : > { %v5968_v54 = vld [vmem:[#allocation5 + $0x140] ss:$8 sps:$4 sm:$0xff]   ;;  %v5055_v57 = vcombine.high %v504_v50, %v508_v51  ;;  %v5976_v61 = vld [vmem:[#allocation5 + $0x164] ss:$8 sps:$4 sm:$0xff]   ;;  %v5054_v63 = vcombine.low %v504_v50, %v508_v51 }
  0xa0   : > { %v512_v58 = vld [vmem:[%s6944_s26 + $0x100] sm:$0xff] }
  0xa1   : > { %2039 = vmatpush1.bf16.msra.mxu0 %v5925_v11  ;;  %v516_v59 = vld [vmem:[%s6944_s26 + $0x120] sm:$0xff] }
  0xa2   : > { %2040 = vmatprep.subr.bf16.mxu0 %v5926_v12  ;;  %v5974_v62 = vld [vmem:[#allocation5 + $0x160] ss:$8 sps:$4 sm:$0xff]   ;;  %v5063_v1 = vcombine.high %v512_v58, %v516_v59  ;;  %v5982_v5 = vld [vmem:[#allocation5 + $0x184] ss:$8 sps:$4 sm:$0xff]   ;;  %v5062_v7 = vcombine.low %v512_v58, %v516_v59  ;;  %v5983_v12 = vld [vmem:[#allocation5 + $0x190] ss:$8 sps:$4 sm:$0xff]  }
  0xa3   : > { %v520_v2 = vld [vmem:[%s6944_s26 + $0x140] sm:$0xff] }
  0xa4   : > { %v524_v3 = vld [vmem:[%s6944_s26 + $0x160] sm:$0xff] }
  0xa5   : > { %2041 = vmatpush1.bf16.msra.mxu0 %v5928_v16  ;;  %v5980_v6 = vld [vmem:[#allocation5 + $0x180] ss:$8 sps:$4 sm:$0xff]   ;;  %v5071_v9 = vcombine.high %v520_v2, %v524_v3  ;;  %v5988_v13 = vld [vmem:[#allocation5 + $0x1a4] ss:$8 sps:$4 sm:$0xff]   ;;  %v5070_v15 = vcombine.low %v520_v2, %v524_v3  ;;  %v5991_v16 = vld [vmem:[#allocation5 + $0x1b4] ss:$8 sps:$4 sm:$0xff]  }
  0xa6   : > { %2042 = vmatprep.subr.bf16.mxu0 %v5929_v17  ;;  %v528_v10 = vld [vmem:[%s6944_s26 + $0x180] sm:$0xff] }
  0xa7   : > { %v532_v11 = vld [vmem:[%s6944_s26 + $0x1a0] sm:$0xff] }
  0xa8   : > { %v5986_v14 = vld [vmem:[#allocation5 + $0x1a0] ss:$8 sps:$4 sm:$0xff]   ;;  %v5079_v17 = vcombine.high %v528_v10, %v532_v11  ;;  %v6006_v37 = vld [vmem:[#allocation5 + $0x204] ss:$8 sps:$4 sm:$0xff]  }
  0xa9   : > { %2043 = vmatpush1.bf16.msra.mxu0 %v5931_v18  ;;  %v536_v18 = vld [vmem:[%s6944_s26 + $0x1c0] sm:$0xff] }
  0xaa   : > { %2044 = vmatprep.subr.bf16.mxu0 %v5932_v19  ;;  %v540_v19 = vld [vmem:[%s6944_s26 + $0x1e0] sm:$0xff] }
  0xab   : > { %v556_v36 = vld [vmem:[%s6944_s26 + $0x260] sm:$0xff] }
  0xac   : > { %v568_v44 = vld [vmem:[%s6944_s26 + $0x2c0] sm:$0xff] }
  0xad   : > { %2045 = vmatpush1.bf16.msra.mxu0 %v5934_v20  ;;  %v5989_v20 = vld [vmem:[#allocation5 + $0x1b0] ss:$8 sps:$4 sm:$0xff]  }
  0xae   : > { %2046 = vmatprep.subr.bf16.mxu0 %v5935_v21  ;;  %v5994_v21 = vld [vmem:[#allocation5 + $0x1c4] ss:$8 sps:$4 sm:$0xff]  }
  0xb1   : > { %2047 = vmatpush1.bf16.msra.mxu0 %v5937_v22  ;;  %v5992_v22 = vld [vmem:[#allocation5 + $0x1c0] ss:$8 sps:$4 sm:$0xff]  }
  0xb2   : > { %2048 = vmatprep.subr.bf16.mxu0 %v5938_v23  ;;  %v5078_v23 = vcombine.low %v528_v10, %v532_v11  ;;  %v6007_v10 = vld [vmem:[#allocation5 + $0x210] ss:$8 sps:$4 sm:$0xff]   ;;  %v497_v11 = vld [vmem:[%s6944_s26 + $0x88] sm:$0xff] }
  0xb5   : > { %2049 = vmatpush1.bf16.msra.mxu0 %v5940_v24  ;;  %v5997_v24 = vld [vmem:[#allocation5 + $0x1d4] ss:$8 sps:$4 sm:$0xff]  }
  0xb6   : > { %2050 = vmatprep.subr.bf16.mxu0 %v5941_v25  ;;  %v5087_v25 = vcombine.high %v536_v18, %v540_v19 }
  0xb9   : > { %2051 = vmatpush1.bf16.msra.mxu0 %v5943_v26  ;;  %v544_v26 = vld [vmem:[%s6944_s26 + $0x200] sm:$0xff] }
  0xba   : > { %2052 = vmatprep.subr.bf16.mxu0 %v5944_v27  ;;  %v548_v27 = vld [vmem:[%s6944_s26 + $0x220] sm:$0xff] }
  0xbd   : > { %2053 = vmatpush1.bf16.msra.mxu0 %v5946_v28  ;;  %v5995_v28 = vld [vmem:[#allocation5 + $0x1d0] ss:$8 sps:$4 sm:$0xff]  }
  0xbe   : > { %2054 = vmatprep.subr.bf16.mxu0 %v5947_v29  ;;  %v6000_v29 = vld [vmem:[#allocation5 + $0x1e4] ss:$8 sps:$4 sm:$0xff]  }
  0xc1   : > { %2055 = vmatpush1.bf16.msra.mxu0 %v5949_v30  ;;  %v5086_v30 = vcombine.low %v536_v18, %v540_v19  ;;  %v6013_v18 = vld [vmem:[#allocation5 + $0x230] ss:$8 sps:$4 sm:$0xff]   ;;  %v505_v19 = vld [vmem:[%s6944_s26 + $0xc8] sm:$0xff] }
  0xc2   : > { %2056 = vmatprep.subr.bf16.mxu0 %v5950_v31  ;;  %v5095_v31 = vcombine.high %v544_v26, %v548_v27 }
  0xc5   : > { %2057 = vmatpush1.bf16.msra.mxu0 %v5952_v32  ;;  %v5998_v32 = vld [vmem:[#allocation5 + $0x1e0] ss:$8 sps:$4 sm:$0xff]  }
  0xc6   : > { %2058 = vmatprep.subr.bf16.mxu0 %v5953_v33  ;;  %v6003_v33 = vld [vmem:[#allocation5 + $0x1f4] ss:$8 sps:$4 sm:$0xff]  }
  0xc9   : > { %2059 = vmatpush1.bf16.msra.mxu0 %v5955_v34  ;;  %v6001_v34 = vld [vmem:[#allocation5 + $0x1f0] ss:$8 sps:$4 sm:$0xff]  }
  0xca   : > { %2221 = vmatprep.subr.bf16.mxu0 %v5958_v35  ;;  %v552_v35 = vld [vmem:[%s6944_s26 + $0x240] sm:$0xff] }
  0xcc   : > { %2061 = vmatmul.mubr.bf16.vlgmr.msra.gmra.mrb[0].mxu0 %v5030_v39  ;;  %v5103_v39 = vcombine.high %v552_v35, %v556_v36 }
  0xcd   : > { %2222 = vmatpush1.bf16.msra.mxu0 %v5956_v38  ;;  %2070 = vmatprep.mubr.bf16.mxu0 %v5039_v41  ;;  %v5094_v38 = vcombine.low %v544_v26, %v548_v27  ;;  %v564_v41 = vld [vmem:[%s6944_s26 + $0x2a0] sm:$0xff]  ;;  %v6019_v26 = vld [vmem:[#allocation5 + $0x250] ss:$8 sps:$4 sm:$0xff]   ;;  %v513_v27 = vld [vmem:[%s6944_s26 + $0x108] sm:$0xff] }
  0xce   : > { %2223 = vmatprep.subr.bf16.mxu0 %v5961_v40  ;;  %v560_v40 = vld [vmem:[%s6944_s26 + $0x280] sm:$0xff] }
  0xcf   : > { %v5111_v43 = vcombine.high %v560_v40, %v564_v41 }
  0xd1   : > { %2224 = vmatpush1.bf16.msra.mxu0 %v5959_v42  ;;  %v5102_v42 = vcombine.low %v552_v35, %v556_v36  ;;  %v521_v35 = vld [vmem:[%s6944_s26 + $0x148] sm:$0xff] }
  0xd2   : > { %2225 = vmatprep.subr.bf16.mxu0 %v5964_v45  ;;  %v572_v45 = vld [vmem:[%s6944_s26 + $0x2e0] sm:$0xff]  ;;  %v525_v36 = vld [vmem:[%s6944_s26 + $0x168] sm:$0xff] }
  0xd3   : > { %v5118_v50 = vcombine.low %v568_v44, %v572_v45 }
  0xd4   : > { %2071 = vmatmul.mubr.bf16.gmra.mrb[4].mxu0 %v5038_v47  ;;  %v5119_v47 = vcombine.high %v568_v44, %v572_v45  ;;  %v533_v44 = vld [vmem:[%s6944_s26 + $0x1a8] sm:$0xff] }
  0xd5   : > { %2080 = vmatprep.mubr.bf16.mxu0 %v5047_v49  ;;  %2226 = vmatpush1.bf16.msra.mxu0 %v5962_v46  ;;  %v5110_v46 = vcombine.low %v560_v40, %v564_v41  ;;  %v580_v49 = vld [vmem:[%s6944_s26 + $0x320] sm:$0xff]  ;;  %v6033_v41 = vld [vmem:[#allocation5 + $0x294] ss:$8 sps:$4 sm:$0xff]  }
  0xd6   : > { %2227 = vmatprep.subr.bf16.mxu0 %v5967_v48  ;;  %v576_v48 = vld [vmem:[%s6944_s26 + $0x300] sm:$0xff] }
  0xd7   : > { %v5127_v51 = vcombine.high %v576_v48, %v580_v49  ;;  %v6028_v40 = vld [vmem:[#allocation5 + $0x280] ss:$8 sps:$4 sm:$0xff]   ;;  %v6036_v45 = vld [vmem:[#allocation5 + $0x2a4] ss:$8 sps:$4 sm:$0xff]  }
  0xd9   : > { %2228 = vmatpush1.bf16.msra.mxu0 %v5965_v52  ;;  %v584_v52 = vld [vmem:[%s6944_s26 + $0x340] sm:$0xff] }
  0xda   : > { %2229 = vmatprep.subr.bf16.mxu0 %v5970_v53  ;;  %v588_v53 = vld [vmem:[%s6944_s26 + $0x360] sm:$0xff] }
  0xdb   : > { %v5134_v58 = vcombine.low %v584_v52, %v588_v53 }
  0xdc   : > { %2081 = vmatmul.mubr.bf16.gmra.mrb[8].mxu0 %v5046_v55  ;;  %v5135_v55 = vcombine.high %v584_v52, %v588_v53  ;;  %v541_v52 = vld [vmem:[%s6944_s26 + $0x1e8] sm:$0xff] }
  0xdd   : > { %2090 = vmatprep.mubr.bf16.mxu0 %v5055_v57  ;;  %2230 = vmatpush1.bf16.msra.mxu0 %v5968_v54  ;;  %v5126_v54 = vcombine.low %v576_v48, %v580_v49  ;;  %v596_v57 = vld [vmem:[%s6944_s26 + $0x3a0] sm:$0xff]  ;;  %v6039_v49 = vld [vmem:[#allocation5 + $0x2b4] ss:$8 sps:$4 sm:$0xff]  }
  0xde   : > { %2231 = vmatprep.subr.bf16.mxu0 %v5973_v56  ;;  %v592_v56 = vld [vmem:[%s6944_s26 + $0x380] sm:$0xff] }
  0xdf   : > { %v5143_v59 = vcombine.high %v592_v56, %v596_v57  ;;  %v6034_v48 = vld [vmem:[#allocation5 + $0x2a0] ss:$8 sps:$4 sm:$0xff]   ;;  %v6042_v53 = vld [vmem:[#allocation5 + $0x2c4] ss:$8 sps:$4 sm:$0xff]  }
  0xe1   : > { %2232 = vmatpush1.bf16.msra.mxu0 %v5971_v60  ;;  %v600_v60 = vld [vmem:[%s6944_s26 + $0x3c0] sm:$0xff] }
  0xe2   : > { %2233 = vmatprep.subr.bf16.mxu0 %v5976_v61  ;;  %v604_v61 = vld [vmem:[%s6944_s26 + $0x3e0] sm:$0xff] }
  0xe3   : > { %v5150_v2 = vcombine.low %v600_v60, %v604_v61 }
  0xe4   : > { %2091 = vmatmul.mubr.bf16.gmra.mrb[12].mxu0 %v5054_v63  ;;  %v5151_v63 = vcombine.high %v600_v60, %v604_v61  ;;  %v549_v60 = vld [vmem:[%s6944_s26 + $0x228] sm:$0xff] }
  0xe5   : > { %2100 = vmatprep.mubr.bf16.mxu0 %v5063_v1  ;;  %2234 = vmatpush1.bf16.msra.mxu0 %v5974_v62  ;;  %v5142_v62 = vcombine.low %v592_v56, %v596_v57  ;;  %v485_v1 = vld [vmem:[%s6944_s26 + $0x28] sm:$0xff]  ;;  %v6045_v57 = vld [vmem:[#allocation5 + $0x2d4] ss:$8 sps:$4 sm:$0xff]  }
  0xe6   : > { %2235 = vmatprep.subr.bf16.mxu0 %v5979_v0  ;;  %v481_v0 = vld [vmem:[%s6944_s26 + $0x8] sm:$0xff] }
  0xe7   : > { %v5033_v3 = vcombine.high %v481_v0, %v485_v1  ;;  %v6040_v56 = vld [vmem:[#allocation5 + $0x2c0] ss:$8 sps:$4 sm:$0xff]   ;;  %v6048_v61 = vld [vmem:[#allocation5 + $0x2e4] ss:$8 sps:$4 sm:$0xff]  }
  0xe9   : > { %2236 = vmatpush1.bf16.msra.mxu0 %v5977_v4  ;;  %v489_v4 = vld [vmem:[%s6944_s26 + $0x48] sm:$0xff] }
  0xea   : > { %2237 = vmatprep.subr.bf16.mxu0 %v5982_v5  ;;  %v493_v5 = vld [vmem:[%s6944_s26 + $0x68] sm:$0xff] }
  0xec   : > { %2101 = vmatmul.mubr.bf16.gmra.mrb[16].mxu0 %v5062_v7  ;;  %v6004_v7 = vld [vmem:[#allocation5 + $0x200] ss:$8 sps:$4 sm:$0xff]  }
  0xed   : > { %2110 = vmatprep.mubr.bf16.mxu0 %v5071_v9  ;;  %2238 = vmatpush1.bf16.msra.mxu0 %v5980_v6  ;;  %v5032_v6 = vcombine.low %v481_v0, %v485_v1  ;;  %v6009_v9 = vld [vmem:[#allocation5 + $0x214] ss:$8 sps:$4 sm:$0xff]   ;;  %v6046_v0 = vld [vmem:[#allocation5 + $0x2e0] ss:$8 sps:$4 sm:$0xff]  }
  0xee   : > { %2239 = vmatprep.subr.bf16.mxu0 %v5985_v8  ;;  %v5041_v8 = vcombine.high %v489_v4, %v493_v5  ;;  %v6051_v1 = vld [vmem:[#allocation5 + $0x2f4] ss:$8 sps:$4 sm:$0xff]  }
  0xf1   : > { %2240 = vmatpush1.bf16.msra.mxu0 %v5983_v12  ;;  %v501_v12 = vld [vmem:[%s6944_s26 + $0xa8] sm:$0xff] }
  0xf2   : > { %2241 = vmatprep.subr.bf16.mxu0 %v5988_v13  ;;  %v6012_v13 = vld [vmem:[#allocation5 + $0x224] ss:$8 sps:$4 sm:$0xff]  }
  0xf4   : > { %2111 = vmatmul.mubr.bf16.gmra.mrb[20].mxu0 %v5070_v15  ;;  %v5049_v15 = vcombine.high %v497_v11, %v501_v12 }
  0xf5   : > { %2120 = vmatprep.mubr.bf16.mxu0 %v5079_v17  ;;  %2242 = vmatpush1.bf16.msra.mxu0 %v5986_v14  ;;  %v5040_v14 = vcombine.low %v489_v4, %v493_v5  ;;  %v6015_v17 = vld [vmem:[#allocation5 + $0x234] ss:$8 sps:$4 sm:$0xff]   ;;  %v557_v4 = vld [vmem:[%s6944_s26 + $0x268] sm:$0xff] }
  0xf6   : > { %2243 = vmatprep.subr.bf16.mxu0 %v5991_v16  ;;  %v6010_v16 = vld [vmem:[#allocation5 + $0x220] ss:$8 sps:$4 sm:$0xff]   ;;  %v6054_v5 = vld [vmem:[#allocation5 + $0x304] ss:$8 sps:$4 sm:$0xff]  }
  0xf9   : > { %2244 = vmatpush1.bf16.msra.mxu0 %v5989_v20  ;;  %v509_v20 = vld [vmem:[%s6944_s26 + $0xe8] sm:$0xff] }
  0xfa   : > { %2245 = vmatprep.subr.bf16.mxu0 %v5994_v21  ;;  %v6018_v21 = vld [vmem:[#allocation5 + $0x244] ss:$8 sps:$4 sm:$0xff]  }
  0xfc   : > { %2121 = vmatmul.mubr.bf16.gmra.mrb[24].mxu0 %v5078_v23  ;;  %v5057_v23 = vcombine.high %v505_v19, %v509_v20 }
  0xfd   : > { %2130 = vmatprep.mubr.bf16.mxu0 %v5087_v25  ;;  %2246 = vmatpush1.bf16.msra.mxu0 %v5992_v22  ;;  %v5048_v22 = vcombine.low %v497_v11, %v501_v12  ;;  %v6021_v25 = vld [vmem:[#allocation5 + $0x254] ss:$8 sps:$4 sm:$0xff]   ;;  %v569_v12 = vld [vmem:[%s6944_s26 + $0x2c8] sm:$0xff] }
  0xfe   : > { %2247 = vmatprep.subr.bf16.mxu0 %v5997_v24  ;;  %v6016_v24 = vld [vmem:[#allocation5 + $0x240] ss:$8 sps:$4 sm:$0xff]  }
 0x101   : > { %2248 = vmatpush1.bf16.msra.mxu0 %v5995_v28  ;;  %v517_v28 = vld [vmem:[%s6944_s26 + $0x128] sm:$0xff] }
 0x102   : > { %2249 = vmatprep.subr.bf16.mxu0 %v6000_v29  ;;  %v6024_v29 = vld [vmem:[#allocation5 + $0x264] ss:$8 sps:$4 sm:$0xff]  }
 0x104   : > { %2131 = vmatmul.mubr.bf16.gmra.mrb[28].mxu0 %v5086_v30  ;;  %v5056_v30 = vcombine.low %v505_v19, %v509_v20  ;;  %v585_v20 = vld [vmem:[%s6944_s26 + $0x348] sm:$0xff] }
 0x105   : > { %2140 = vmatprep.mubr.bf16.mxu0 %v5095_v31  ;;  %2250 = vmatpush1.bf16.msra.mxu0 %v5998_v32  ;;  %v5065_v31 = vcombine.high %v513_v27, %v517_v28  ;;  %v6022_v32 = vld [vmem:[#allocation5 + $0x260] ss:$8 sps:$4 sm:$0xff]  }
 0x106   : > { %2251 = vmatprep.subr.bf16.mxu0 %v6003_v33  ;;  %v6027_v33 = vld [vmem:[#allocation5 + $0x274] ss:$8 sps:$4 sm:$0xff]  }
 0x109   : > { %2252 = vmatpush1.bf16.msra.mxu0 %v6001_v34  ;;  %v6025_v34 = vld [vmem:[#allocation5 + $0x270] ss:$8 sps:$4 sm:$0xff]  }
 0x10a   : > { %2414 = vmatprep.subr.bf16.mxu0 %v6006_v37  ;;  %v6030_v37 = vld [vmem:[#allocation5 + $0x284] ss:$8 sps:$4 sm:$0xff]  }
 0x10c   : > { %2141 = vmatmul.mubr.bf16.gmra.mrb[32].mxu0 %v5094_v38  ;;  %v5064_v38 = vcombine.low %v513_v27, %v517_v28  ;;  %v601_v28 = vld [vmem:[%s6944_s26 + $0x3c8] sm:$0xff] }
 0x10d   : > { %2150 = vmatprep.mubr.bf16.mxu0 %v5103_v39  ;;  %v5073_v39 = vcombine.high %v521_v35, %v525_v36 }
 0x114   : > { %2151 = vmatmul.mubr.bf16.gmra.mrb[36].mxu0 %v5102_v42  ;;  %v6031_v42 = vld [vmem:[#allocation5 + $0x290] ss:$8 sps:$4 sm:$0xff]  }
 0x115   : > { %2160 = vmatprep.mubr.bf16.mxu0 %v5111_v43  ;;  %v529_v43 = vld [vmem:[%s6944_s26 + $0x188] sm:$0xff] }
 0x11c   : > { %2161 = vmatmul.mubr.bf16.gmra.mrb[40].mxu0 %v5110_v46  ;;  %v5072_v46 = vcombine.low %v521_v35, %v525_v36  ;;  %v490_v36 = vld [vmem:[%s6944_s26 + $0x50] sm:$0xff] }
 0x11d   : > { %2170 = vmatprep.mubr.bf16.mxu0 %v5119_v47  ;;  %v5081_v47 = vcombine.high %v529_v43, %v533_v44 }
 0x124   : > { %2171 = vmatmul.mubr.bf16.gmra.mrb[44].mxu0 %v5118_v50  ;;  %v6037_v50 = vld [vmem:[#allocation5 + $0x2b0] ss:$8 sps:$4 sm:$0xff]  }
 0x125   : > { %2180 = vmatprep.mubr.bf16.mxu0 %v5127_v51  ;;  %v537_v51 = vld [vmem:[%s6944_s26 + $0x1c8] sm:$0xff] }
 0x12c   : > { %2181 = vmatmul.mubr.bf16.gmra.mrb[48].mxu0 %v5126_v54  ;;  %v5080_v54 = vcombine.low %v529_v43, %v533_v44  ;;  %v498_v43 = vld [vmem:[%s6944_s26 + $0x90] sm:$0xff] }
 0x12d   : > { %2190 = vmatprep.mubr.bf16.mxu0 %v5135_v55  ;;  %v5089_v55 = vcombine.high %v537_v51, %v541_v52  ;;  %v502_v44 = vld [vmem:[%s6944_s26 + $0xb0] sm:$0xff] }
 0x134   : > { %2191 = vmatmul.mubr.bf16.gmra.mrb[52].mxu0 %v5134_v58  ;;  %v6043_v58 = vld [vmem:[#allocation5 + $0x2d0] ss:$8 sps:$4 sm:$0xff]  }
 0x135   : > { %2200 = vmatprep.mubr.bf16.mxu0 %v5143_v59  ;;  %v545_v59 = vld [vmem:[%s6944_s26 + $0x208] sm:$0xff] }
 0x13c   : > { %2201 = vmatmul.mubr.bf16.gmra.mrb[56].mxu0 %v5142_v62  ;;  %v5088_v62 = vcombine.low %v537_v51, %v541_v52  ;;  %v506_v51 = vld [vmem:[%s6944_s26 + $0xd0] sm:$0xff] }
 0x13d   : > { %2210 = vmatprep.mubr.bf16.mxu0 %v5151_v63  ;;  %v5097_v63 = vcombine.high %v545_v59, %v549_v60  ;;  %v510_v52 = vld [vmem:[%s6944_s26 + $0xf0] sm:$0xff] }
 0x144   : > { %2211 = vmatmul.mubr.bf16.gmra.mrb[60].mxu0 %v5150_v2  ;;  %v6049_v2 = vld [vmem:[#allocation5 + $0x2f0] ss:$8 sps:$4 sm:$0xff]  }
 0x145   : > { %2253 = vmatprep.mubr.bf16.mxu0 %v5033_v3  ;;  %v553_v3 = vld [vmem:[%s6944_s26 + $0x248] sm:$0xff] }
 0x14c   : > { %2254 = vmatmul.mubr.bf16.vlgmr.msra.gmra.mrb[0].mxu0 %v5032_v6  ;;  %v5096_v6 = vcombine.low %v545_v59, %v549_v60  ;;  %v514_v59 = vld [vmem:[%s6944_s26 + $0x110] sm:$0xff] }
 0x14d   : > { %2415 = vmatpush1.bf16.msra.mxu0 %v6004_v7  ;;  %2263 = vmatprep.mubr.bf16.mxu0 %v5041_v8  ;;  %v5105_v7 = vcombine.high %v553_v3, %v557_v4  ;;  %v561_v8 = vld [vmem:[%s6944_s26 + $0x288] sm:$0xff]  ;;  %v518_v60 = vld [vmem:[%s6944_s26 + $0x130] sm:$0xff] }
 0x14e   : > { %2416 = vmatprep.subr.bf16.mxu0 %v6009_v9  ;;  %v565_v9 = vld [vmem:[%s6944_s26 + $0x2a8] sm:$0xff] }
 0x14f   : > { %v5113_v11 = vcombine.high %v561_v8, %v565_v9 }
 0x151   : > { %2417 = vmatpush1.bf16.msra.mxu0 %v6007_v10  ;;  %v5104_v10 = vcombine.low %v553_v3, %v557_v4  ;;  %v522_v3 = vld [vmem:[%s6944_s26 + $0x150] sm:$0xff] }
 0x152   : > { %2418 = vmatprep.subr.bf16.mxu0 %v6012_v13  ;;  %v573_v13 = vld [vmem:[%s6944_s26 + $0x2e8] sm:$0xff]  ;;  %v526_v4 = vld [vmem:[%s6944_s26 + $0x170] sm:$0xff] }
 0x154   : > { %2264 = vmatmul.mubr.bf16.gmra.mrb[4].mxu0 %v5040_v14  ;;  %v5112_v14 = vcombine.low %v561_v8, %v565_v9  ;;  %v6076_v8 = vld [vmem:[#allocation5 + $0x380] ss:$8 sps:$4 sm:$0xff]   ;;  %v6081_v9 = vld [vmem:[#allocation5 + $0x394] ss:$8 sps:$4 sm:$0xff]  }
 0x155   : > { %2273 = vmatprep.mubr.bf16.mxu0 %v5049_v15  ;;  %2419 = vmatpush1.bf16.msra.mxu0 %v6010_v16  ;;  %v5121_v15 = vcombine.high %v569_v12, %v573_v13  ;;  %v577_v16 = vld [vmem:[%s6944_s26 + $0x308] sm:$0xff] }
 0x156   : > { %2420 = vmatprep.subr.bf16.mxu0 %v6015_v17  ;;  %v581_v17 = vld [vmem:[%s6944_s26 + $0x328] sm:$0xff] }
 0x157   : > { %v5129_v19 = vcombine.high %v577_v16, %v581_v17 }
 0x159   : > { %2421 = vmatpush1.bf16.msra.mxu0 %v6013_v18  ;;  %v5120_v18 = vcombine.low %v569_v12, %v573_v13  ;;  %v534_v12 = vld [vmem:[%s6944_s26 + $0x1b0] sm:$0xff]  ;;  %v6084_v13 = vld [vmem:[#allocation5 + $0x3a4] ss:$8 sps:$4 sm:$0xff]  }
 0x15a   : > { %2422 = vmatprep.subr.bf16.mxu0 %v6018_v21  ;;  %v589_v21 = vld [vmem:[%s6944_s26 + $0x368] sm:$0xff] }
 0x15c   : > { %2274 = vmatmul.mubr.bf16.gmra.mrb[8].mxu0 %v5048_v22  ;;  %v5128_v22 = vcombine.low %v577_v16, %v581_v17  ;;  %v6082_v16 = vld [vmem:[#allocation5 + $0x3a0] ss:$8 sps:$4 sm:$0xff]   ;;  %v6087_v17 = vld [vmem:[#allocation5 + $0x3b4] ss:$8 sps:$4 sm:$0xff]  }
 0x15d   : > { %2283 = vmatprep.mubr.bf16.mxu0 %v5057_v23  ;;  %2423 = vmatpush1.bf16.msra.mxu0 %v6016_v24  ;;  %v5137_v23 = vcombine.high %v585_v20, %v589_v21  ;;  %v593_v24 = vld [vmem:[%s6944_s26 + $0x388] sm:$0xff] }
 0x15e   : > { %2424 = vmatprep.subr.bf16.mxu0 %v6021_v25  ;;  %v597_v25 = vld [vmem:[%s6944_s26 + $0x3a8] sm:$0xff] }
 0x15f   : > { %v5145_v27 = vcombine.high %v593_v24, %v597_v25 }
 0x161   : > { %2425 = vmatpush1.bf16.msra.mxu0 %v6019_v26  ;;  %v5136_v26 = vcombine.low %v585_v20, %v589_v21  ;;  %v542_v20 = vld [vmem:[%s6944_s26 + $0x1f0] sm:$0xff]  ;;  %v6090_v21 = vld [vmem:[#allocation5 + $0x3c4] ss:$8 sps:$4 sm:$0xff]  }
 0x162   : > { %2426 = vmatprep.subr.bf16.mxu0 %v6024_v29  ;;  %v605_v29 = vld [vmem:[%s6944_s26 + $0x3e8] sm:$0xff] }
 0x164   : > { %2284 = vmatmul.mubr.bf16.gmra.mrb[12].mxu0 %v5056_v30  ;;  %v5144_v30 = vcombine.low %v593_v24, %v597_v25  ;;  %v6088_v24 = vld [vmem:[#allocation5 + $0x3c0] ss:$8 sps:$4 sm:$0xff]   ;;  %v6093_v25 = vld [vmem:[#allocation5 + $0x3d4] ss:$8 sps:$4 sm:$0xff]  }
 0x165   : > { %2293 = vmatprep.mubr.bf16.mxu0 %v5065_v31  ;;  %2427 = vmatpush1.bf16.msra.mxu0 %v6022_v32  ;;  %v5153_v31 = vcombine.high %v601_v28, %v605_v29  ;;  %v482_v32 = vld [vmem:[%s6944_s26 + $0x10] sm:$0xff] }
 0x166   : > { %2428 = vmatprep.subr.bf16.mxu0 %v6027_v33  ;;  %v486_v33 = vld [vmem:[%s6944_s26 + $0x30] sm:$0xff] }
 0x167   : > { %v5035_v35 = vcombine.high %v482_v32, %v486_v33 }
 0x169   : > { %2429 = vmatpush1.bf16.msra.mxu0 %v6025_v34  ;;  %v5152_v34 = vcombine.low %v601_v28, %v605_v29  ;;  %v550_v28 = vld [vmem:[%s6944_s26 + $0x230] sm:$0xff]  ;;  %v6096_v29 = vld [vmem:[#allocation5 + $0x3e4] ss:$8 sps:$4 sm:$0xff]  }
 0x16a   : > { %2430 = vmatprep.subr.bf16.mxu0 %v6030_v37  ;;  %v494_v37 = vld [vmem:[%s6944_s26 + $0x70] sm:$0xff] }
 0x16c   : > { %2294 = vmatmul.mubr.bf16.gmra.mrb[16].mxu0 %v5064_v38  ;;  %v5034_v38 = vcombine.low %v482_v32, %v486_v33  ;;  %v6094_v32 = vld [vmem:[#allocation5 + $0x3e0] ss:$8 sps:$4 sm:$0xff]   ;;  %v6099_v33 = vld [vmem:[#allocation5 + $0x3f4] ss:$8 sps:$4 sm:$0xff]  }
 0x16d   : > { %2303 = vmatprep.mubr.bf16.mxu0 %v5073_v39  ;;  %2431 = vmatpush1.bf16.msra.mxu0 %v6028_v40  ;;  %v6052_v39 = vld [vmem:[#allocation5 + $0x300] ss:$8 sps:$4 sm:$0xff]   ;;  %v5043_v40 = vcombine.high %v490_v36, %v494_v37 }
 0x16e   : > { %2432 = vmatprep.subr.bf16.mxu0 %v6033_v41  ;;  %v6057_v41 = vld [vmem:[#allocation5 + $0x314] ss:$8 sps:$4 sm:$0xff]  }
 0x171   : > { %2433 = vmatpush1.bf16.msra.mxu0 %v6031_v42  ;;  %v6055_v42 = vld [vmem:[#allocation5 + $0x310] ss:$8 sps:$4 sm:$0xff]  }
 0x172   : > { %2434 = vmatprep.subr.bf16.mxu0 %v6036_v45  ;;  %v6060_v45 = vld [vmem:[#allocation5 + $0x324] ss:$8 sps:$4 sm:$0xff]  }
 0x174   : > { %2304 = vmatmul.mubr.bf16.gmra.mrb[20].mxu0 %v5072_v46  ;;  %v5042_v46 = vcombine.low %v490_v36, %v494_v37  ;;  %v558_v36 = vld [vmem:[%s6944_s26 + $0x270] sm:$0xff] }
 0x175   : > { %2313 = vmatprep.mubr.bf16.mxu0 %v5081_v47  ;;  %2435 = vmatpush1.bf16.msra.mxu0 %v6034_v48  ;;  %v5051_v47 = vcombine.high %v498_v43, %v502_v44  ;;  %v6058_v48 = vld [vmem:[#allocation5 + $0x320] ss:$8 sps:$4 sm:$0xff]  }
 0x176   : > { %2436 = vmatprep.subr.bf16.mxu0 %v6039_v49  ;;  %v6063_v49 = vld [vmem:[#allocation5 + $0x334] ss:$8 sps:$4 sm:$0xff]  }
 0x179   : > { %2437 = vmatpush1.bf16.msra.mxu0 %v6037_v50  ;;  %v6061_v50 = vld [vmem:[#allocation5 + $0x330] ss:$8 sps:$4 sm:$0xff]  }
 0x17a   : > { %2438 = vmatprep.subr.bf16.mxu0 %v6042_v53  ;;  %v6066_v53 = vld [vmem:[#allocation5 + $0x344] ss:$8 sps:$4 sm:$0xff]  }
 0x17c   : > { %2314 = vmatmul.mubr.bf16.gmra.mrb[24].mxu0 %v5080_v54  ;;  %v5050_v54 = vcombine.low %v498_v43, %v502_v44  ;;  %v570_v43 = vld [vmem:[%s6944_s26 + $0x2d0] sm:$0xff] }
 0x17d   : > { %2323 = vmatprep.mubr.bf16.mxu0 %v5089_v55  ;;  %2439 = vmatpush1.bf16.msra.mxu0 %v6040_v56  ;;  %v5059_v55 = vcombine.high %v506_v51, %v510_v52  ;;  %v6064_v56 = vld [vmem:[#allocation5 + $0x340] ss:$8 sps:$4 sm:$0xff]   ;;  %v574_v44 = vld [vmem:[%s6944_s26 + $0x2f0] sm:$0xff] }
 0x17e   : > { %2440 = vmatprep.subr.bf16.mxu0 %v6045_v57  ;;  %v6069_v57 = vld [vmem:[#allocation5 + $0x354] ss:$8 sps:$4 sm:$0xff]  }
 0x181   : > { %2441 = vmatpush1.bf16.msra.mxu0 %v6043_v58  ;;  %v6067_v58 = vld [vmem:[#allocation5 + $0x350] ss:$8 sps:$4 sm:$0xff]  }
 0x182   : > { %2442 = vmatprep.subr.bf16.mxu0 %v6048_v61  ;;  %v6072_v61 = vld [vmem:[#allocation5 + $0x364] ss:$8 sps:$4 sm:$0xff]  }
 0x184   : > { %2324 = vmatmul.mubr.bf16.gmra.mrb[28].mxu0 %v5088_v62  ;;  %v5058_v62 = vcombine.low %v506_v51, %v510_v52  ;;  %v586_v51 = vld [vmem:[%s6944_s26 + $0x350] sm:$0xff] }
 0x185   : > { %2333 = vmatprep.mubr.bf16.mxu0 %v5097_v63  ;;  %2443 = vmatpush1.bf16.msra.mxu0 %v6046_v0  ;;  %v5067_v63 = vcombine.high %v514_v59, %v518_v60  ;;  %v6070_v0 = vld [vmem:[#allocation5 + $0x360] ss:$8 sps:$4 sm:$0xff]   ;;  %v590_v52 = vld [vmem:[%s6944_s26 + $0x370] sm:$0xff] }
 0x186   : > { %2444 = vmatprep.subr.bf16.mxu0 %v6051_v1  ;;  %v6075_v1 = vld [vmem:[#allocation5 + $0x374] ss:$8 sps:$4 sm:$0xff]  }
 0x189   : > { %2445 = vmatpush1.bf16.msra.mxu0 %v6049_v2  ;;  %v6073_v2 = vld [vmem:[#allocation5 + $0x370] ss:$8 sps:$4 sm:$0xff]  }
 0x18a   : > { %2607 = vmatprep.subr.bf16.mxu0 %v6054_v5  ;;  %v6078_v5 = vld [vmem:[#allocation5 + $0x384] ss:$8 sps:$4 sm:$0xff]  }
 0x18c   : > { %2334 = vmatmul.mubr.bf16.gmra.mrb[32].mxu0 %v5096_v6  ;;  %v5066_v6 = vcombine.low %v514_v59, %v518_v60  ;;  %v602_v59 = vld [vmem:[%s6944_s26 + $0x3d0] sm:$0xff] }
 0x18d   : > { %2343 = vmatprep.mubr.bf16.mxu0 %v5105_v7  ;;  %v5075_v7 = vcombine.high %v522_v3, %v526_v4  ;;  %v606_v60 = vld [vmem:[%s6944_s26 + $0x3f0] sm:$0xff] }
 0x194   : > { %2344 = vmatmul.mubr.bf16.gmra.mrb[36].mxu0 %v5104_v10  ;;  %v6079_v10 = vld [vmem:[#allocation5 + $0x390] ss:$8 sps:$4 sm:$0xff]  }
 0x195   : > { %2353 = vmatprep.mubr.bf16.mxu0 %v5113_v11  ;;  %v530_v11 = vld [vmem:[%s6944_s26 + $0x190] sm:$0xff] }
 0x19c   : > { %2354 = vmatmul.mubr.bf16.gmra.mrb[40].mxu0 %v5112_v14  ;;  %v5074_v14 = vcombine.low %v522_v3, %v526_v4  ;;  %v6100_v3 = vld [vmem:[#allocation7 + $0x4] ss:$8 sps:$4 sm:$0xff]   ;;  %v6102_v4 = vld [vmem:[#allocation7] ss:$8 sps:$4 sm:$0xff]  }
 0x19d   : > { %2363 = vmatprep.mubr.bf16.mxu0 %v5121_v15  ;;  %v5083_v15 = vcombine.high %v530_v11, %v534_v12  ;;  %3100 = vmatprep.subr.bf16.mxu1 %v6100_v3  ;;  %v567_v3 = vld [vmem:[%s6944_s26 + $0x2b8] sm:$0xff] }
 0x19e   : > { %3101 = vmatpush1.bf16.msra.mxu1 %v6102_v4 }
 0x1a4   : > { %2364 = vmatmul.mubr.bf16.gmra.mrb[44].mxu0 %v5120_v18  ;;  %v6085_v18 = vld [vmem:[#allocation5 + $0x3b0] ss:$8 sps:$4 sm:$0xff]  }
 0x1a5   : > { %2373 = vmatprep.mubr.bf16.mxu0 %v5129_v19  ;;  %v538_v19 = vld [vmem:[%s6944_s26 + $0x1d0] sm:$0xff] }
 0x1ac   : > { %2374 = vmatmul.mubr.bf16.gmra.mrb[48].mxu0 %v5128_v22  ;;  %v5082_v22 = vcombine.low %v530_v11, %v534_v12  ;;  %v6108_v12 = vld [vmem:[#allocation7 + $0x20] ss:$8 sps:$4 sm:$0xff]  }
 0x1ad   : > { %2383 = vmatprep.mubr.bf16.mxu0 %v5137_v23  ;;  %v5091_v23 = vcombine.high %v538_v19, %v542_v20 }
 0x1b4   : > { %2384 = vmatmul.mubr.bf16.gmra.mrb[52].mxu0 %v5136_v26  ;;  %v6091_v26 = vld [vmem:[#allocation5 + $0x3d0] ss:$8 sps:$4 sm:$0xff]  }
 0x1b5   : > { %2393 = vmatprep.mubr.bf16.mxu0 %v5145_v27  ;;  %v546_v27 = vld [vmem:[%s6944_s26 + $0x210] sm:$0xff] }
 0x1b6   : > { %v5098_v37 = vcombine.low %v546_v27, %v550_v28 }
 0x1bc   : > { %2394 = vmatmul.mubr.bf16.gmra.mrb[56].mxu0 %v5144_v30  ;;  %v5090_v30 = vcombine.low %v538_v19, %v542_v20  ;;  %v6114_v20 = vld [vmem:[#allocation7 + $0x40] ss:$8 sps:$4 sm:$0xff]  }
 0x1bd   : > { %2403 = vmatprep.mubr.bf16.mxu0 %v5153_v31  ;;  %v5099_v31 = vcombine.high %v546_v27, %v550_v28  ;;  %v6120_v28 = vld [vmem:[#allocation7 + $0x60] ss:$8 sps:$4 sm:$0xff]  }
 0x1c4   : > { %2404 = vmatmul.mubr.bf16.gmra.mrb[60].mxu0 %v5152_v34  ;;  %v6097_v34 = vld [vmem:[#allocation5 + $0x3f0] ss:$8 sps:$4 sm:$0xff]  }
 0x1c5   : > { %2446 = vmatprep.mubr.bf16.mxu0 %v5035_v35  ;;  %v554_v35 = vld [vmem:[%s6944_s26 + $0x250] sm:$0xff] }
 0x1cc   : > { %2447 = vmatmul.mubr.bf16.vlgmr.msra.gmra.mrb[0].mxu0 %v5034_v38  ;;  %v5107_v38 = vcombine.high %v554_v35, %v558_v36 }
 0x1cd   : > { %2608 = vmatpush1.bf16.msra.mxu0 %v6052_v39  ;;  %2456 = vmatprep.mubr.bf16.mxu0 %v5043_v40  ;;  %v562_v39 = vld [vmem:[%s6944_s26 + $0x290] sm:$0xff] }
 0x1ce   : > { %2609 = vmatprep.subr.bf16.mxu0 %v6057_v41  ;;  %v566_v40 = vld [vmem:[%s6944_s26 + $0x2b0] sm:$0xff]  ;;  %v5106_v41 = vcombine.low %v554_v35, %v558_v36  ;;  %v6126_v36 = vld [vmem:[#allocation7 + $0x80] ss:$8 sps:$4 sm:$0xff]  }
 0x1d1   : > { %2610 = vmatpush1.bf16.msra.mxu0 %v6055_v42  ;;  %v5115_v42 = vcombine.high %v562_v39, %v566_v40 }
 0x1d2   : > { %2611 = vmatprep.subr.bf16.mxu0 %v6060_v45  ;;  %v5114_v45 = vcombine.low %v562_v39, %v566_v40  ;;  %v527_v39 = vld [vmem:[%s6944_s26 + $0x178] sm:$0xff] }
 0x1d3   : > { %v6129_v40 = vld [vmem:[#allocation7 + $0x90] ss:$8 sps:$4 sm:$0xff]  }
 0x1d4   : > { %2457 = vmatmul.mubr.bf16.gmra.mrb[4].mxu0 %v5042_v46  ;;  %v5123_v46 = vcombine.high %v570_v43, %v574_v44 }
 0x1d5   : > { %2466 = vmatprep.mubr.bf16.mxu0 %v5051_v47  ;;  %2612 = vmatpush1.bf16.msra.mxu0 %v6058_v48  ;;  %v578_v47 = vld [vmem:[%s6944_s26 + $0x310] sm:$0xff] }
 0x1d6   : > { %2613 = vmatprep.subr.bf16.mxu0 %v6063_v49  ;;  %v582_v48 = vld [vmem:[%s6944_s26 + $0x330] sm:$0xff]  ;;  %v5122_v49 = vcombine.low %v570_v43, %v574_v44  ;;  %v6132_v44 = vld [vmem:[#allocation7 + $0xa0] ss:$8 sps:$4 sm:$0xff]  }
 0x1d9   : > { %2614 = vmatpush1.bf16.msra.mxu0 %v6061_v50  ;;  %v5131_v50 = vcombine.high %v578_v47, %v582_v48 }
 0x1da   : > { %2615 = vmatprep.subr.bf16.mxu0 %v6066_v53  ;;  %v5130_v53 = vcombine.low %v578_v47, %v582_v48  ;;  %v535_v47 = vld [vmem:[%s6944_s26 + $0x1b8] sm:$0xff] }
 0x1db   : > { %v6135_v48 = vld [vmem:[#allocation7 + $0xb0] ss:$8 sps:$4 sm:$0xff]  }
 0x1dc   : > { %2467 = vmatmul.mubr.bf16.gmra.mrb[8].mxu0 %v5050_v54  ;;  %v5139_v54 = vcombine.high %v586_v51, %v590_v52 }
 0x1dd   : > { %2476 = vmatprep.mubr.bf16.mxu0 %v5059_v55  ;;  %2616 = vmatpush1.bf16.msra.mxu0 %v6064_v56  ;;  %v594_v55 = vld [vmem:[%s6944_s26 + $0x390] sm:$0xff] }
 0x1de   : > { %2617 = vmatprep.subr.bf16.mxu0 %v6069_v57  ;;  %v598_v56 = vld [vmem:[%s6944_s26 + $0x3b0] sm:$0xff]  ;;  %v5138_v57 = vcombine.low %v586_v51, %v590_v52  ;;  %v6138_v52 = vld [vmem:[#allocation7 + $0xc0] ss:$8 sps:$4 sm:$0xff]  }
 0x1e1   : > { %2618 = vmatpush1.bf16.msra.mxu0 %v6067_v58  ;;  %v5147_v58 = vcombine.high %v594_v55, %v598_v56 }
 0x1e2   : > { %2619 = vmatprep.subr.bf16.mxu0 %v6072_v61  ;;  %v5146_v61 = vcombine.low %v594_v55, %v598_v56  ;;  %v543_v55 = vld [vmem:[%s6944_s26 + $0x1f8] sm:$0xff] }
 0x1e4   : > { %2477 = vmatmul.mubr.bf16.gmra.mrb[12].mxu0 %v5058_v62  ;;  %v5155_v62 = vcombine.high %v602_v59, %v606_v60 }
 0x1e5   : > { %2486 = vmatprep.mubr.bf16.mxu0 %v5067_v63  ;;  %2620 = vmatpush1.bf16.msra.mxu0 %v6070_v0  ;;  %v483_v63 = vld [vmem:[%s6944_s26 + $0x18] sm:$0xff] }
 0x1e6   : > { %2621 = vmatprep.subr.bf16.mxu0 %v6075_v1  ;;  %v487_v0 = vld [vmem:[%s6944_s26 + $0x38] sm:$0xff]  ;;  %v5154_v1 = vcombine.low %v602_v59, %v606_v60 }
 0x1e7   : > { %v551_v59 = vld [vmem:[%s6944_s26 + $0x238] sm:$0xff] }
 0x1e9   : > { %2622 = vmatpush1.bf16.msra.mxu0 %v6073_v2  ;;  %v5037_v2 = vcombine.high %v483_v63, %v487_v0 }
 0x1ea   : > { %2623 = vmatprep.subr.bf16.mxu0 %v6078_v5  ;;  %v6103_v5 = vld [vmem:[#allocation7 + $0x14] ss:$8 sps:$4 sm:$0xff]  }
 0x1eb   : > { %3102 = vmatprep.subr.bf16.mxu1 %v6103_v5 }
 0x1ec   : > { %2487 = vmatmul.mubr.bf16.gmra.mrb[16].mxu0 %v5066_v6  ;;  %v491_v6 = vld [vmem:[%s6944_s26 + $0x58] sm:$0xff] }
 0x1ed   : > { %2496 = vmatprep.mubr.bf16.mxu0 %v5075_v7  ;;  %2624 = vmatpush1.bf16.msra.mxu0 %v6076_v8  ;;  %v495_v7 = vld [vmem:[%s6944_s26 + $0x78] sm:$0xff] }
 0x1ee   : > { %2625 = vmatprep.subr.bf16.mxu0 %v6081_v9  ;;  %v6105_v8 = vld [vmem:[#allocation7 + $0x10] ss:$8 sps:$4 sm:$0xff]   ;;  %v5036_v9 = vcombine.low %v483_v63, %v487_v0  ;;  %v5045_v11 = vcombine.high %v491_v6, %v495_v7 }
 0x1ef   : > { %3103 = vmatpush1.bf16.msra.mxu1 %v6105_v8  ;;  %v559_v63 = vld [vmem:[%s6944_s26 + $0x278] sm:$0xff] }
 0x1f1   : > { %2626 = vmatpush1.bf16.msra.mxu0 %v6079_v10  ;;  %v6106_v10 = vld [vmem:[#allocation7 + $0x24] ss:$8 sps:$4 sm:$0xff]  }
 0x1f2   : > { %2627 = vmatprep.subr.bf16.mxu0 %v6084_v13  ;;  %3104 = vmatprep.subr.bf16.mxu1 %v6106_v10  ;;  %v6109_v13 = vld [vmem:[#allocation7 + $0x34] ss:$8 sps:$4 sm:$0xff]   ;;  %v6141_v10 = vld [vmem:[#allocation7 + $0xd0] ss:$8 sps:$4 sm:$0xff]  }
 0x1f3   : > { %3105 = vmatpush1.bf16.msra.mxu1 %v6108_v12  ;;  %v583_v12 = vld [vmem:[%s6944_s26 + $0x338] sm:$0xff] }
 0x1f4   : > { %2497 = vmatmul.mubr.bf16.gmra.mrb[20].mxu0 %v5074_v14  ;;  %v499_v14 = vld [vmem:[%s6944_s26 + $0x98] sm:$0xff]  ;;  %3106 = vmatprep.subr.bf16.mxu1 %v6109_v13 }
 0x1f5   : > { %2506 = vmatprep.mubr.bf16.mxu0 %v5083_v15  ;;  %2628 = vmatpush1.bf16.msra.mxu0 %v6082_v16  ;;  %v503_v15 = vld [vmem:[%s6944_s26 + $0xb8] sm:$0xff] }
 0x1f6   : > { %2629 = vmatprep.subr.bf16.mxu0 %v6087_v17  ;;  %v6111_v16 = vld [vmem:[#allocation7 + $0x30] ss:$8 sps:$4 sm:$0xff]   ;;  %v5044_v17 = vcombine.low %v491_v6, %v495_v7  ;;  %v5053_v19 = vcombine.high %v499_v14, %v503_v15 }
 0x1f7   : > { %3107 = vmatpush1.bf16.msra.mxu1 %v6111_v16  ;;  %v571_v6 = vld [vmem:[%s6944_s26 + $0x2d8] sm:$0xff]  ;;  %v6144_v16 = vld [vmem:[#allocation7 + $0xe0] ss:$8 sps:$4 sm:$0xff]  }
 0x1f8   : > { %v575_v7 = vld [vmem:[%s6944_s26 + $0x2f8] sm:$0xff] }
 0x1f9   : > { %2630 = vmatpush1.bf16.msra.mxu0 %v6085_v18  ;;  %v6112_v18 = vld [vmem:[#allocation7 + $0x44] ss:$8 sps:$4 sm:$0xff]   ;;  %v5124_v13 = vcombine.low %v571_v6, %v575_v7 }
 0x1fa   : > { %2631 = vmatprep.subr.bf16.mxu0 %v6090_v21  ;;  %3108 = vmatprep.subr.bf16.mxu1 %v6112_v18  ;;  %v6115_v21 = vld [vmem:[#allocation7 + $0x54] ss:$8 sps:$4 sm:$0xff]   ;;  %v6147_v18 = vld [vmem:[#allocation7 + $0xf0] ss:$8 sps:$4 sm:$0xff]  }
 0x1fb   : > { %3109 = vmatpush1.bf16.msra.mxu1 %v6114_v20  ;;  %v591_v20 = vld [vmem:[%s6944_s26 + $0x378] sm:$0xff] }
 0x1fc   : > { %2507 = vmatmul.mubr.bf16.gmra.mrb[24].mxu0 %v5082_v22  ;;  %v507_v22 = vld [vmem:[%s6944_s26 + $0xd8] sm:$0xff]  ;;  %3110 = vmatprep.subr.bf16.mxu1 %v6115_v21 }
 0x1fd   : > { %2516 = vmatprep.mubr.bf16.mxu0 %v5091_v23  ;;  %2632 = vmatpush1.bf16.msra.mxu0 %v6088_v24  ;;  %v511_v23 = vld [vmem:[%s6944_s26 + $0xf8] sm:$0xff] }
 0x1fe   : > { %2633 = vmatprep.subr.bf16.mxu0 %v6093_v25  ;;  %v6117_v24 = vld [vmem:[#allocation7 + $0x50] ss:$8 sps:$4 sm:$0xff]   ;;  %v5052_v25 = vcombine.low %v499_v14, %v503_v15  ;;  %v5061_v27 = vcombine.high %v507_v22, %v511_v23  ;;  %v6142_v14 = vld [vmem:[#allocation7 + $0xe4] ss:$8 sps:$4 sm:$0xff]  }
 0x1ff   : > { %3111 = vmatpush1.bf16.msra.mxu1 %v6117_v24  ;;  %v599_v24 = vld [vmem:[%s6944_s26 + $0x3b8] sm:$0xff] }
 0x201   : > { %2634 = vmatpush1.bf16.msra.mxu0 %v6091_v26  ;;  %v6118_v26 = vld [vmem:[#allocation7 + $0x64] ss:$8 sps:$4 sm:$0xff]  }
 0x202   : > { %2635 = vmatprep.subr.bf16.mxu0 %v6096_v29  ;;  %3112 = vmatprep.subr.bf16.mxu1 %v6118_v26  ;;  %v6121_v29 = vld [vmem:[#allocation7 + $0x74] ss:$8 sps:$4 sm:$0xff]  }
 0x203   : > { %3113 = vmatpush1.bf16.msra.mxu1 %v6120_v28  ;;  %v607_v28 = vld [vmem:[%s6944_s26 + $0x3f8] sm:$0xff] }
 0x204   : > { %2517 = vmatmul.mubr.bf16.gmra.mrb[28].mxu0 %v5090_v30  ;;  %v515_v30 = vld [vmem:[%s6944_s26 + $0x118] sm:$0xff]  ;;  %3114 = vmatprep.subr.bf16.mxu1 %v6121_v29 }
 0x205   : > { %2526 = vmatprep.mubr.bf16.mxu0 %v5099_v31  ;;  %2636 = vmatpush1.bf16.msra.mxu0 %v6094_v32  ;;  %v519_v31 = vld [vmem:[%s6944_s26 + $0x138] sm:$0xff] }
 0x206   : > { %2637 = vmatprep.subr.bf16.mxu0 %v6099_v33  ;;  %v6123_v32 = vld [vmem:[#allocation7 + $0x70] ss:$8 sps:$4 sm:$0xff]   ;;  %v5060_v33 = vcombine.low %v507_v22, %v511_v23  ;;  %v5069_v35 = vcombine.high %v515_v30, %v519_v31 }
 0x207   : > { %3115 = vmatpush1.bf16.msra.mxu1 %v6123_v32  ;;  %v595_v23 = vld [vmem:[%s6944_s26 + $0x398] sm:$0xff]  ;;  %v6150_v32 = vld [vmem:[#allocation8 + $0x4] ss:$8 sps:$4 sm:$0xff]  }
 0x208   : > { %v5149_v26 = vcombine.high %v595_v23, %v599_v24  ;;  %v5148_v29 = vcombine.low %v595_v23, %v599_v24 }
 0x209   : > { %2638 = vmatpush1.bf16.msra.mxu0 %v6097_v34  ;;  %v6124_v34 = vld [vmem:[#allocation7 + $0x84] ss:$8 sps:$4 sm:$0xff]  }
 0x20a   : > { %3116 = vmatprep.subr.bf16.mxu1 %v6124_v34 }
 0x20b   : > { %3117 = vmatpush1.bf16.msra.mxu1 %v6126_v36  ;;  %v736_v36 = vld [vmem:[%s7584_s2] sm:$0x3] }
 0x20c   : > { %2527 = vmatmul.mubr.bf16.gmra.mrb[32].mxu0 %v5098_v37  ;;  %v6127_v37 = vld [vmem:[#allocation7 + $0x94] ss:$8 sps:$4 sm:$0xff]  }
 0x20d   : > { %2536 = vmatprep.mubr.bf16.mxu0 %v5107_v38  ;;  %v523_v38 = vld [vmem:[%s6944_s26 + $0x158] sm:$0xff]  ;;  %3118 = vmatprep.subr.bf16.mxu1 %v6127_v37 }
 0x20e   : > { %v5077_v43 = vcombine.high %v523_v38, %v527_v39 }
 0x20f   : > { %3119 = vmatpush1.bf16.msra.mxu1 %v6129_v40 }
 0x214   : > { %2537 = vmatmul.mubr.bf16.gmra.mrb[36].mxu0 %v5106_v41  ;;  %v5068_v41 = vcombine.low %v515_v30, %v519_v31 }
 0x215   : > { %2546 = vmatprep.mubr.bf16.mxu0 %v5115_v42  ;;  %v6130_v42 = vld [vmem:[#allocation7 + $0xa4] ss:$8 sps:$4 sm:$0xff]  }
 0x216   : > { %3120 = vmatprep.subr.bf16.mxu1 %v6130_v42 }
 0x217   : > { %3121 = vmatpush1.bf16.msra.mxu1 %v6132_v44 }
 0x21c   : > { %2547 = vmatmul.mubr.bf16.gmra.mrb[40].mxu0 %v5114_v45  ;;  %v6133_v45 = vld [vmem:[#allocation7 + $0xb4] ss:$8 sps:$4 sm:$0xff]  }
 0x21d   : > { %2556 = vmatprep.mubr.bf16.mxu0 %v5123_v46  ;;  %v531_v46 = vld [vmem:[%s6944_s26 + $0x198] sm:$0xff]  ;;  %3122 = vmatprep.subr.bf16.mxu1 %v6133_v45 }
 0x21e   : > { %v5085_v51 = vcombine.high %v531_v46, %v535_v47  ;;  %3123 = vmatpush1.bf16.msra.mxu1 %v6135_v48  ;;  %v5084_v56 = vcombine.low %v531_v46, %v535_v47 }
 0x224   : > { %2557 = vmatmul.mubr.bf16.gmra.mrb[44].mxu0 %v5122_v49  ;;  %v5076_v49 = vcombine.low %v523_v38, %v527_v39 }
 0x225   : > { %2566 = vmatprep.mubr.bf16.mxu0 %v5131_v50  ;;  %v6136_v50 = vld [vmem:[#allocation7 + $0xc4] ss:$8 sps:$4 sm:$0xff]  }
 0x226   : > { %3124 = vmatprep.subr.bf16.mxu1 %v6136_v50 }
 0x227   : > { %3125 = vmatpush1.bf16.msra.mxu1 %v6138_v52 }
 0x22c   : > { %2567 = vmatmul.mubr.bf16.gmra.mrb[48].mxu0 %v5130_v53  ;;  %v6139_v53 = vld [vmem:[#allocation7 + $0xd4] ss:$8 sps:$4 sm:$0xff]  }
 0x22d   : > { %2576 = vmatprep.mubr.bf16.mxu0 %v5139_v54  ;;  %v539_v54 = vld [vmem:[%s6944_s26 + $0x1d8] sm:$0xff]  ;;  %3126 = vmatprep.subr.bf16.mxu1 %v6139_v53 }
 0x22e   : > { %v5092_v60 = vcombine.low %v539_v54, %v543_v55  ;;  %3127 = vmatpush1.bf16.msra.mxu1 %v6141_v10 }
 0x22f   : > { %3128 = vmatprep.subr.bf16.mxu1 %v6142_v14 }
 0x232   : > { %3129 = vmatpush1.bf16.msra.mxu1 %v6144_v16 }
 0x234   : > { %2577 = vmatmul.mubr.bf16.gmra.mrb[52].mxu0 %v5138_v57  ;;  %v5093_v57 = vcombine.high %v539_v54, %v543_v55  ;;  %v6148_v55 = vld [vmem:[#allocation8] ss:$8 sps:$4 sm:$0xff]  }
 0x235   : > { %2586 = vmatprep.mubr.bf16.mxu0 %v5147_v58  ;;  %v547_v58 = vld [vmem:[%s6944_s26 + $0x218] sm:$0xff] }
 0x236   : > { %v5100_v0 = vcombine.low %v547_v58, %v551_v59 }
 0x23c   : > { %2587 = vmatmul.mubr.bf16.gmra.mrb[56].mxu0 %v5146_v61  ;;  %v5101_v61 = vcombine.high %v547_v58, %v551_v59  ;;  %v6153_v58 = vld [vmem:[#allocation8 + $0x14] ss:$8 sps:$4 sm:$0xff]  }
 0x23d   : > { %2596 = vmatprep.mubr.bf16.mxu0 %v5155_v62  ;;  %v555_v62 = vld [vmem:[%s6944_s26 + $0x258] sm:$0xff] }
 0x23e   : > { %v5108_v4 = vcombine.low %v555_v62, %v559_v63 }
 0x244   : > { %2597 = vmatmul.mubr.bf16.gmra.mrb[60].mxu0 %v5154_v1  ;;  %v5109_v1 = vcombine.high %v555_v62, %v559_v63 }
 0x245   : > { %2639 = vmatprep.mubr.bf16.mxu0 %v5037_v2  ;;  %v563_v2 = vld [vmem:[%s6944_s26 + $0x298] sm:$0xff] }
 0x246   : > { %v5117_v5 = vcombine.high %v563_v2, %v567_v3  ;;  %v5116_v8 = vcombine.low %v563_v2, %v567_v3  ;;  %v6156_v3 = vld [vmem:[#allocation8 + $0x24] ss:$8 sps:$4 sm:$0xff]  }
 0x24c   : > { %2640 = vmatmul.mubr.bf16.vlgmr.msra.gmra.mrb[0].mxu0 %v5036_v9  ;;  %v5125_v9 = vcombine.high %v571_v6, %v575_v7 }
 0x24d   : > { %2649 = vmatprep.mubr.bf16.mxu0 %v5045_v11  ;;  %v579_v11 = vld [vmem:[%s6944_s26 + $0x318] sm:$0xff] }
 0x24e   : > { %v5133_v15 = vcombine.high %v579_v11, %v583_v12  ;;  %v5132_v21 = vcombine.low %v579_v11, %v583_v12  ;;  %v6159_v12 = vld [vmem:[#allocation8 + $0x34] ss:$8 sps:$4 sm:$0xff]  }
 0x254   : > { %2650 = vmatmul.mubr.bf16.gmra.mrb[4].mxu0 %v5044_v17  ;;  %v6145_v17 = vld [vmem:[#allocation7 + $0xf4] ss:$8 sps:$4 sm:$0xff]  }
 0x255   : > { %2659 = vmatprep.mubr.bf16.mxu0 %v5053_v19  ;;  %v587_v19 = vld [vmem:[%s6944_s26 + $0x358] sm:$0xff]  ;;  %3130 = vmatprep.subr.bf16.mxu1 %v6145_v17 }
 0x256   : > { %3131 = vmatpush1.bf16.msra.mxu1 %v6147_v18  ;;  %v5141_v22 = vcombine.high %v587_v19, %v591_v20  ;;  %v6157_v18 = vld [vmem:[#allocation8 + $0x30] ss:$8 sps:$4 sm:$0xff]  }
 0x257   : > { %3593 = vmatprep.subr.bf16.mxu1 %v6150_v32 }
 0x25c   : > { %2660 = vmatmul.mubr.bf16.gmra.mrb[8].mxu0 %v5052_v25  ;;  %v5140_v25 = vcombine.low %v587_v19, %v591_v20 }
 0x25d   : > { %2669 = vmatprep.mubr.bf16.mxu0 %v5061_v27  ;;  %v603_v27 = vld [vmem:[%s6944_s26 + $0x3d8] sm:$0xff]  ;;  %s5029_s26 = sshll.u32 %s6940_s30, 8 }
 0x25e   : > { %v5157_v30 = vcombine.high %v603_v27, %v607_v28  ;;  %v5156_v31 = vcombine.low %v603_v27, %v607_v28  ;;  %v6160_v27 = vld [vmem:[#allocation8 + $0x40] ss:$8 sps:$4 sm:$0xff]   ;;  %s7441_s27 = scalar_lea.vmem [#allocation10], %s5029_s26 }
 0x25f   : > { %s4912_s15 = sshll.u32 %s7441_s27, 4  ;;  %s7535_s15 = int_to_ptr.vmem [resolvable:$true] %s4912_s15 }
 0x260   : > { %s6586_s17 = scalar_lea.vmem %s7535_s15, 4096 }
 0x261   : > { %p6587_p10 = scmp.ne.s32.totalorder %s7535_s15, %s6586_s17 }
 0x263   : > { %p6588_p3 = pnand %p6587_p10, %p6892_p5 }
 0x264   : > { %2670 = vmatmul.mubr.bf16.gmra.mrb[12].mxu0 %v5060_v33  ;;  %v738_v33 = vlaneseq }
 0x265   : > { %2679 = vmatprep.mubr.bf16.mxu0 %v5069_v35  ;;  %p6589_p7 = pneg %p6588_p3 }
 0x266   : > { %v739_v34 = vshrl.u32 %v738_v33, 7 }
 0x268   : > { %v7086_v35 = vsub.s32 0, %v739_v34  ;;  %v7091_v37 = vsub.s32 1, %v739_v34 }
 0x26a   : > { %v7094_v38 = vrot.slane %v736_v36, %v7086_v35  ;;  %v7097_v39 = vrot.slane %v736_v36, %v7091_v37 }
 0x26c   : > { %2680 = vmatmul.mubr.bf16.gmra.mrb[16].mxu0 %v5068_v41 }
 0x26d   : > { %2689 = vmatprep.mubr.bf16.mxu0 %v5077_v43 }
 0x274   : > { %2690 = vmatmul.mubr.bf16.gmra.mrb[20].mxu0 %v5076_v49 }
 0x275   : > { %2699 = vmatprep.mubr.bf16.mxu0 %v5085_v51 }
 0x27c   : > { %2700 = vmatmul.mubr.bf16.gmra.mrb[24].mxu0 %v5084_v56 }
 0x27d   : > { %2709 = vmatprep.mubr.bf16.mxu0 %v5093_v57 }
 0x284   : > { %2710 = vmatmul.mubr.bf16.gmra.mrb[28].mxu0 %v5092_v60 }
 0x285   : > { %2719 = vmatprep.mubr.bf16.mxu0 %v5101_v61 }
 0x28c   : > { %2720 = vmatmul.mubr.bf16.gmra.mrb[32].mxu0 %v5100_v0  ;;  %v6151_v0 = vld [vmem:[#allocation8 + $0x10] ss:$8 sps:$4 sm:$0xff]  }
 0x28d   : > { %2729 = vmatprep.mubr.bf16.mxu0 %v5109_v1 }
 0x294   : > { %2730 = vmatmul.mubr.bf16.gmra.mrb[36].mxu0 %v5108_v4 }
 0x295   : > { %2739 = vmatprep.mubr.bf16.mxu0 %v5117_v5 }
 0x29c   : > { %2740 = vmatmul.mubr.bf16.gmra.mrb[40].mxu0 %v5116_v8 }
 0x29d   : > { %2749 = vmatprep.mubr.bf16.mxu0 %v5125_v9  ;;  %v6154_v9 = vld [vmem:[#allocation8 + $0x20] ss:$8 sps:$4 sm:$0xff]  }
 0x2a4   : > { %2750 = vmatmul.mubr.bf16.gmra.mrb[44].mxu0 %v5124_v13 }
 0x2a5   : > { %2759 = vmatprep.mubr.bf16.mxu0 %v5133_v15 }
 0x2ac   : > { %2760 = vmatmul.mubr.bf16.gmra.mrb[48].mxu0 %v5132_v21  ;;  %v6162_v21 = vld [vmem:[#allocation8 + $0x44] ss:$8 sps:$4 sm:$0xff]  }
 0x2ad   : > { %2769 = vmatprep.mubr.bf16.mxu0 %v5141_v22 }
 0x2b4   : > { %2770 = vmatmul.mubr.bf16.gmra.mrb[52].mxu0 %v5140_v25 }
 0x2b5   : > { %2779 = vmatprep.mubr.bf16.mxu0 %v5149_v26 }
 0x2bc   : > { %2780 = vmatmul.mubr.bf16.gmra.mrb[56].mxu0 %v5148_v29 }
 0x2bd   : > { %2789 = vmatprep.mubr.bf16.mxu0 %v5157_v30  ;;  %v6165_v30 = vld [vmem:[#allocation8 + $0x54] ss:$8 sps:$4 sm:$0xff]  }
 0x2c4   : > { %2790 = vmatmul.mubr.bf16.gmra.mrb[60].mxu0 %v5156_v31 }
 0x31f   : > { %v2641_v40 = vpop.f32.mrb[0].mxu0 }
 0x320   : > { %v5569_v41 = vadd.f32 %v2641_v40, %v7094_v38  ;;  %v2643_v42 = vpop.f32.mrb[1].mxu0  ;;  %v6163_v40 = vld [vmem:[#allocation8 + $0x50] ss:$8 sps:$4 sm:$0xff]  }
 0x321   : > { %v5570_v43 = vadd.f32 %v2643_v42, %v7097_v39  ;;  %v2645_v44 = vpop.f32.mrb[2].mxu0 }
 0x322   : > { %v5571_v45 = vadd.f32 %v2645_v44, %v7094_v38  ;;  %v2647_v46 = vpop.f32.mrb[3].mxu0  ;;  %v2800_v48 = vmax.f32 %v5569_v41, 0.0 }
 0x323   : > { %v5572_v47 = vadd.f32 %v2647_v46, %v7097_v39  ;;  %v2801_v50 = vmax.f32 %v5570_v43, 0.0  ;;  %v6168_v43 = vld [vmem:[#allocation8 + $0x64] ss:$8 sps:$4 sm:$0xff]  }
 0x324   : > { %v2802_v49 = vmax.f32 %v5571_v45, 0.0 }
 0x325   : > { %v2803_v51 = vmax.f32 %v5572_v47, 0.0 }
 0x326   : > { %v2864_v52 = vpack.c.bf16 %v2802_v49, %v2800_v48  ;;  %v6166_v49 = vld [vmem:[#allocation8 + $0x60] ss:$8 sps:$4 sm:$0xff]  }
 0x327   : > { %v2651_v53 = vpop.f32.mrb[4].mxu0  ;;  %v2865_v54 = vpack.c.bf16 %v2803_v51, %v2801_v50 }
 0x328   : > { %v5573_v56 = vadd.f32 %v2651_v53, %v7094_v38  ;;  %v2653_v57 = vpop.f32.mrb[5].mxu0 }
 0x329   : > { %v5574_v59 = vadd.f32 %v2653_v57, %v7097_v39  ;;  %v2655_v60 = vpop.f32.mrb[6].mxu0  ;;  %3132 = vmatprep.mubr.bf16.mxu1 %v2865_v54 }
 0x32a   : > { %v5575_v61 = vadd.f32 %v2655_v60, %v7094_v38  ;;  %v2657_v62 = vpop.f32.mrb[7].mxu0  ;;  %3133 = vmatmul.mubr.bf16.vlgmr.msra.gmra.mrb[0].mxu1 %v2864_v52  ;;  %v2804_v1 = vmax.f32 %v5573_v56, 0.0  ;;  %v6171_v52 = vld [vmem:[#allocation8 + $0x74] ss:$8 sps:$4 sm:$0xff]  }
 0x32b   : > { %v5576_v63 = vadd.f32 %v2657_v62, %v7097_v39  ;;  %3594 = vmatpush1.bf16.msra.mxu1 %v6148_v55  ;;  %v2805_v4 = vmax.f32 %v5574_v59, 0.0 }
 0x32c   : > { %v2806_v2 = vmax.f32 %v5575_v61, 0.0  ;;  %3595 = vmatprep.subr.bf16.mxu1 %v6153_v58  ;;  %v6169_v58 = vld [vmem:[#allocation8 + $0x70] ss:$8 sps:$4 sm:$0xff]   ;;  %v6174_v61 = vld [vmem:[#allocation8 + $0x84] ss:$8 sps:$4 sm:$0xff]  }
 0x32d   : > { %v2807_v5 = vmax.f32 %v5576_v63, 0.0 }
 0x32e   : > { %v2866_v6 = vpack.c.bf16 %v2806_v2, %v2804_v1 }
 0x32f   : > { %v2867_v7 = vpack.c.bf16 %v2807_v5, %v2805_v4  ;;  %v2661_v8 = vpop.f32.mrb[8].mxu0  ;;  %3596 = vmatpush1.bf16.msra.mxu1 %v6151_v0 }
 0x330   : > { %v5577_v10 = vadd.f32 %v2661_v8, %v7094_v38  ;;  %v2663_v11 = vpop.f32.mrb[9].mxu0  ;;  %3597 = vmatprep.subr.bf16.mxu1 %v6156_v3  ;;  %v6172_v3 = vld [vmem:[#allocation8 + $0x80] ss:$8 sps:$4 sm:$0xff]  }
 0x331   : > { %v5578_v13 = vadd.f32 %v2663_v11, %v7097_v39  ;;  %v2665_v14 = vpop.f32.mrb[10].mxu0  ;;  %3142 = vmatprep.mubr.bf16.mxu1 %v2867_v7 }
 0x332   : > { %v5579_v15 = vadd.f32 %v2665_v14, %v7094_v38  ;;  %v2667_v16 = vpop.f32.mrb[11].mxu0  ;;  %3143 = vmatmul.mubr.bf16.gmra.mrb[4].mxu1 %v2866_v6  ;;  %v2808_v19 = vmax.f32 %v5577_v10, 0.0  ;;  %v6177_v6 = vld [vmem:[#allocation8 + $0x94] ss:$8 sps:$4 sm:$0xff]  }
 0x333   : > { %v5580_v17 = vadd.f32 %v2667_v16, %v7097_v39  ;;  %3598 = vmatpush1.bf16.msra.mxu1 %v6154_v9  ;;  %v2809_v22 = vmax.f32 %v5578_v13, 0.0 }
 0x334   : > { %v2810_v20 = vmax.f32 %v5579_v15, 0.0  ;;  %3599 = vmatprep.subr.bf16.mxu1 %v6159_v12  ;;  %v6175_v12 = vld [vmem:[#allocation8 + $0x90] ss:$8 sps:$4 sm:$0xff]   ;;  %v6180_v15 = vld [vmem:[#allocation8 + $0xa4] ss:$8 sps:$4 sm:$0xff]  }
 0x335   : > { %v2811_v23 = vmax.f32 %v5580_v17, 0.0 }
 0x336   : > { %v2868_v24 = vpack.c.bf16 %v2810_v20, %v2808_v19 }
 0x337   : > { %v2869_v25 = vpack.c.bf16 %v2811_v23, %v2809_v22  ;;  %v2671_v26 = vpop.f32.mrb[12].mxu0  ;;  %3600 = vmatpush1.bf16.msra.mxu1 %v6157_v18 }
 0x338   : > { %v5581_v28 = vadd.f32 %v2671_v26, %v7094_v38  ;;  %v2673_v29 = vpop.f32.mrb[13].mxu0  ;;  %3601 = vmatprep.subr.bf16.mxu1 %v6162_v21  ;;  %v6178_v21 = vld [vmem:[#allocation8 + $0xa0] ss:$8 sps:$4 sm:$0xff]  }
 0x339   : > { %v5582_v31 = vadd.f32 %v2673_v29, %v7097_v39  ;;  %v2675_v32 = vpop.f32.mrb[14].mxu0  ;;  %3152 = vmatprep.mubr.bf16.mxu1 %v2869_v25 }
 0x33a   : > { %v5583_v33 = vadd.f32 %v2675_v32, %v7094_v38  ;;  %v2677_v34 = vpop.f32.mrb[15].mxu0  ;;  %3153 = vmatmul.mubr.bf16.gmra.mrb[8].mxu1 %v2868_v24  ;;  %v2812_v41 = vmax.f32 %v5581_v28, 0.0  ;;  %v6183_v24 = vld [vmem:[#allocation8 + $0xb4] ss:$8 sps:$4 sm:$0xff]  }
 0x33b   : > { %v5584_v36 = vadd.f32 %v2677_v34, %v7097_v39  ;;  %3602 = vmatpush1.bf16.msra.mxu1 %v6160_v27  ;;  %v2813_v44 = vmax.f32 %v5582_v31, 0.0 }
 0x33c   : > { %v2814_v42 = vmax.f32 %v5583_v33, 0.0  ;;  %3603 = vmatprep.subr.bf16.mxu1 %v6165_v30  ;;  %v6181_v30 = vld [vmem:[#allocation8 + $0xb0] ss:$8 sps:$4 sm:$0xff]   ;;  %v6186_v33 = vld [vmem:[#allocation8 + $0xc4] ss:$8 sps:$4 sm:$0xff]  }
 0x33d   : > { %v2815_v45 = vmax.f32 %v5584_v36, 0.0 }
 0x33e   : > { %v2870_v46 = vpack.c.bf16 %v2814_v42, %v2812_v41 }
 0x33f   : > { %v2871_v47 = vpack.c.bf16 %v2815_v45, %v2813_v44  ;;  %v2681_v48 = vpop.f32.mrb[16].mxu0  ;;  %3604 = vmatpush1.bf16.msra.mxu1 %v6163_v40 }
 0x340   : > { %v5585_v50 = vadd.f32 %v2681_v48, %v7094_v38  ;;  %v2683_v51 = vpop.f32.mrb[17].mxu0  ;;  %3605 = vmatprep.subr.bf16.mxu1 %v6168_v43  ;;  %v6184_v43 = vld [vmem:[#allocation8 + $0xc0] ss:$8 sps:$4 sm:$0xff]  }
 0x341   : > { %v5586_v53 = vadd.f32 %v2683_v51, %v7097_v39  ;;  %v2685_v54 = vpop.f32.mrb[18].mxu0  ;;  %3162 = vmatprep.mubr.bf16.mxu1 %v2871_v47 }
 0x342   : > { %v5587_v55 = vadd.f32 %v2685_v54, %v7094_v38  ;;  %v2687_v56 = vpop.f32.mrb[19].mxu0  ;;  %3163 = vmatmul.mubr.bf16.gmra.mrb[12].mxu1 %v2870_v46  ;;  %v2816_v59 = vmax.f32 %v5585_v50, 0.0  ;;  %v6189_v46 = vld [vmem:[#allocation8 + $0xd4] ss:$8 sps:$4 sm:$0xff]  }
 0x343   : > { %v5588_v57 = vadd.f32 %v2687_v56, %v7097_v39  ;;  %3606 = vmatpush1.bf16.msra.mxu1 %v6166_v49  ;;  %v2817_v62 = vmax.f32 %v5586_v53, 0.0 }
 0x344   : > { %v2818_v60 = vmax.f32 %v5587_v55, 0.0  ;;  %3607 = vmatprep.subr.bf16.mxu1 %v6171_v52  ;;  %v6187_v52 = vld [vmem:[#allocation8 + $0xd0] ss:$8 sps:$4 sm:$0xff]   ;;  %v6192_v55 = vld [vmem:[#allocation8 + $0xe4] ss:$8 sps:$4 sm:$0xff]  }
 0x345   : > { %v2819_v63 = vmax.f32 %v5588_v57, 0.0 }
 0x346   : > { %v2872_v0 = vpack.c.bf16 %v2818_v60, %v2816_v59 }
 0x347   : > { %v2873_v1 = vpack.c.bf16 %v2819_v63, %v2817_v62  ;;  %v2691_v2 = vpop.f32.mrb[20].mxu0  ;;  %3608 = vmatpush1.bf16.msra.mxu1 %v6169_v58 }
 0x348   : > { %v5589_v4 = vadd.f32 %v2691_v2, %v7094_v38  ;;  %v2693_v5 = vpop.f32.mrb[21].mxu0  ;;  %3609 = vmatprep.subr.bf16.mxu1 %v6174_v61  ;;  %v6190_v61 = vld [vmem:[#allocation8 + $0xe0] ss:$8 sps:$4 sm:$0xff]  }
 0x349   : > { %v5590_v7 = vadd.f32 %v2693_v5, %v7097_v39  ;;  %v2695_v8 = vpop.f32.mrb[22].mxu0  ;;  %3172 = vmatprep.mubr.bf16.mxu1 %v2873_v1 }
 0x34a   : > { %v5591_v9 = vadd.f32 %v2695_v8, %v7094_v38  ;;  %v2697_v10 = vpop.f32.mrb[23].mxu0  ;;  %3173 = vmatmul.mubr.bf16.gmra.mrb[16].mxu1 %v2872_v0  ;;  %v2820_v13 = vmax.f32 %v5589_v4, 0.0 }
 0x34b   : > { %v5592_v11 = vadd.f32 %v2697_v10, %v7097_v39  ;;  %3610 = vmatpush1.bf16.msra.mxu1 %v6172_v3  ;;  %v2821_v16 = vmax.f32 %v5590_v7, 0.0 }
 0x34c   : > { %v2822_v14 = vmax.f32 %v5591_v9, 0.0  ;;  %3611 = vmatprep.subr.bf16.mxu1 %v6177_v6 }
 0x34d   : > { %v2823_v17 = vmax.f32 %v5592_v11, 0.0 }
 0x34e   : > { %v2874_v18 = vpack.c.bf16 %v2822_v14, %v2820_v13 }
 0x34f   : > { %v2875_v19 = vpack.c.bf16 %v2823_v17, %v2821_v16  ;;  %v2701_v20 = vpop.f32.mrb[24].mxu0  ;;  %3612 = vmatpush1.bf16.msra.mxu1 %v6175_v12 }
 0x350   : > { %v5593_v22 = vadd.f32 %v2701_v20, %v7094_v38  ;;  %v2703_v23 = vpop.f32.mrb[25].mxu0  ;;  %3613 = vmatprep.subr.bf16.mxu1 %v6180_v15 }
 0x351   : > { %v5594_v25 = vadd.f32 %v2703_v23, %v7097_v39  ;;  %v2705_v26 = vpop.f32.mrb[26].mxu0  ;;  %3182 = vmatprep.mubr.bf16.mxu1 %v2875_v19 }
 0x352   : > { %v5595_v27 = vadd.f32 %v2705_v26, %v7094_v38  ;;  %v2707_v28 = vpop.f32.mrb[27].mxu0  ;;  %3183 = vmatmul.mubr.bf16.gmra.mrb[20].mxu1 %v2874_v18  ;;  %v2824_v31 = vmax.f32 %v5593_v22, 0.0 }
 0x353   : > { %v5596_v29 = vadd.f32 %v2707_v28, %v7097_v39  ;;  %3614 = vmatpush1.bf16.msra.mxu1 %v6178_v21  ;;  %v2825_v34 = vmax.f32 %v5594_v25, 0.0 }
 0x354   : > { %v2826_v32 = vmax.f32 %v5595_v27, 0.0  ;;  %3615 = vmatprep.subr.bf16.mxu1 %v6183_v24 }
 0x355   : > { %v2827_v36 = vmax.f32 %v5596_v29, 0.0 }
 0x356   : > { %v2876_v40 = vpack.c.bf16 %v2826_v32, %v2824_v31 }
 0x357   : > { %v2877_v41 = vpack.c.bf16 %v2827_v36, %v2825_v34  ;;  %v2711_v42 = vpop.f32.mrb[28].mxu0  ;;  %3616 = vmatpush1.bf16.msra.mxu1 %v6181_v30 }
 0x358   : > { %v5597_v44 = vadd.f32 %v2711_v42, %v7094_v38  ;;  %v2713_v45 = vpop.f32.mrb[29].mxu0  ;;  %3617 = vmatprep.subr.bf16.mxu1 %v6186_v33 }
 0x359   : > { %v5598_v47 = vadd.f32 %v2713_v45, %v7097_v39  ;;  %v2715_v48 = vpop.f32.mrb[30].mxu0  ;;  %3192 = vmatprep.mubr.bf16.mxu1 %v2877_v41 }
 0x35a   : > { %v5599_v49 = vadd.f32 %v2715_v48, %v7094_v38  ;;  %v2717_v50 = vpop.f32.mrb[31].mxu0  ;;  %3193 = vmatmul.mubr.bf16.gmra.mrb[24].mxu1 %v2876_v40  ;;  %v2828_v53 = vmax.f32 %v5597_v44, 0.0 }
 0x35b   : > { %v5600_v51 = vadd.f32 %v2717_v50, %v7097_v39  ;;  %3618 = vmatpush1.bf16.msra.mxu1 %v6184_v43  ;;  %v2829_v56 = vmax.f32 %v5598_v47, 0.0 }
 0x35c   : > { %v2830_v54 = vmax.f32 %v5599_v49, 0.0  ;;  %3619 = vmatprep.subr.bf16.mxu1 %v6189_v46 }
 0x35d   : > { %v2831_v57 = vmax.f32 %v5600_v51, 0.0 }
 0x35e   : > { %v2878_v58 = vpack.c.bf16 %v2830_v54, %v2828_v53 }
 0x35f   : > { %v2879_v59 = vpack.c.bf16 %v2831_v57, %v2829_v56  ;;  %v2721_v60 = vpop.f32.mrb[32].mxu0  ;;  %3620 = vmatpush1.bf16.msra.mxu1 %v6187_v52 }
 0x360   : > { %v5601_v62 = vadd.f32 %v2721_v60, %v7094_v38  ;;  %v2723_v63 = vpop.f32.mrb[33].mxu0  ;;  %3621 = vmatprep.subr.bf16.mxu1 %v6192_v55 }
 0x361   : > { %v5602_v0 = vadd.f32 %v2723_v63, %v7097_v39  ;;  %v2725_v1 = vpop.f32.mrb[34].mxu0  ;;  %3202 = vmatprep.mubr.bf16.mxu1 %v2879_v59 }
 0x362   : > { %v5603_v2 = vadd.f32 %v2725_v1, %v7094_v38  ;;  %v2727_v3 = vpop.f32.mrb[35].mxu0  ;;  %3203 = vmatmul.mubr.bf16.gmra.mrb[28].mxu1 %v2878_v58  ;;  %v2832_v5 = vmax.f32 %v5601_v62, 0.0 }
 0x363   : > { %v5604_v4 = vadd.f32 %v2727_v3, %v7097_v39  ;;  %3622 = vmatpush1.bf16.msra.mxu1 %v6190_v61  ;;  %v2833_v7 = vmax.f32 %v5602_v0, 0.0  ;;  %v6195_v0 = vld [vmem:[#allocation8 + $0xf4] ss:$8 sps:$4 sm:$0xff]  }
 0x364   : > { %v2834_v6 = vmax.f32 %v5603_v2, 0.0  ;;  %v6193_v2 = vld [vmem:[#allocation8 + $0xf0] ss:$8 sps:$4 sm:$0xff]   ;;  %3623 = vmatprep.subr.bf16.mxu1 %v6195_v0 }
 0x365   : > { %v2835_v8 = vmax.f32 %v5604_v4, 0.0 }
 0x366   : > { %v2880_v9 = vpack.c.bf16 %v2834_v6, %v2832_v5 }
 0x367   : > { %v2881_v10 = vpack.c.bf16 %v2835_v8, %v2833_v7  ;;  %v2731_v11 = vpop.f32.mrb[36].mxu0  ;;  %3624 = vmatpush1.bf16.msra.mxu1 %v6193_v2 }
 0x368   : > { %v5605_v12 = vadd.f32 %v2731_v11, %v7094_v38  ;;  %v2733_v13 = vpop.f32.mrb[37].mxu0 }
 0x369   : > { %v5606_v14 = vadd.f32 %v2733_v13, %v7097_v39  ;;  %v2735_v15 = vpop.f32.mrb[38].mxu0  ;;  %3212 = vmatprep.mubr.bf16.mxu1 %v2881_v10 }
 0x36a   : > { %v5607_v16 = vadd.f32 %v2735_v15, %v7094_v38  ;;  %v2737_v17 = vpop.f32.mrb[39].mxu0  ;;  %3213 = vmatmul.mubr.bf16.gmra.mrb[32].mxu1 %v2880_v9  ;;  %v2836_v19 = vmax.f32 %v5605_v12, 0.0 }
 0x36b   : > { %v5608_v18 = vadd.f32 %v2737_v17, %v7097_v39  ;;  %v2837_v21 = vmax.f32 %v5606_v14, 0.0 }
 0x36c   : > { %v2838_v20 = vmax.f32 %v5607_v16, 0.0 }
 0x36d   : > { %v2839_v22 = vmax.f32 %v5608_v18, 0.0 }
 0x36e   : > { %v2882_v23 = vpack.c.bf16 %v2838_v20, %v2836_v19 }
 0x36f   : > { %v2883_v24 = vpack.c.bf16 %v2839_v22, %v2837_v21  ;;  %v2741_v25 = vpop.f32.mrb[40].mxu0 }
 0x370   : > { %v5609_v26 = vadd.f32 %v2741_v25, %v7094_v38  ;;  %v2743_v27 = vpop.f32.mrb[41].mxu0 }
 0x371   : > { %v5610_v28 = vadd.f32 %v2743_v27, %v7097_v39  ;;  %v2745_v29 = vpop.f32.mrb[42].mxu0  ;;  %3222 = vmatprep.mubr.bf16.mxu1 %v2883_v24 }
 0x372   : > { %v5611_v30 = vadd.f32 %v2745_v29, %v7094_v38  ;;  %v2747_v31 = vpop.f32.mrb[43].mxu0  ;;  %3223 = vmatmul.mubr.bf16.gmra.mrb[36].mxu1 %v2882_v23  ;;  %v2840_v33 = vmax.f32 %v5609_v26, 0.0 }
 0x373   : > { %v5612_v32 = vadd.f32 %v2747_v31, %v7097_v39  ;;  %v2841_v36 = vmax.f32 %v5610_v28, 0.0 }
 0x374   : > { %v2842_v34 = vmax.f32 %v5611_v30, 0.0 }
 0x375   : > { %v2843_v40 = vmax.f32 %v5612_v32, 0.0 }
 0x376   : > { %v2884_v41 = vpack.c.bf16 %v2842_v34, %v2840_v33 }
 0x377   : > { %v2885_v42 = vpack.c.bf16 %v2843_v40, %v2841_v36  ;;  %v2751_v43 = vpop.f32.mrb[44].mxu0 }
 0x378   : > { %v5613_v44 = vadd.f32 %v2751_v43, %v7094_v38  ;;  %v2753_v45 = vpop.f32.mrb[45].mxu0 }
 0x379   : > { %v5614_v46 = vadd.f32 %v2753_v45, %v7097_v39  ;;  %v2755_v47 = vpop.f32.mrb[46].mxu0  ;;  %3232 = vmatprep.mubr.bf16.mxu1 %v2885_v42 }
 0x37a   : > { %v5615_v48 = vadd.f32 %v2755_v47, %v7094_v38  ;;  %v2757_v49 = vpop.f32.mrb[47].mxu0  ;;  %3233 = vmatmul.mubr.bf16.gmra.mrb[40].mxu1 %v2884_v41  ;;  %v2844_v51 = vmax.f32 %v5613_v44, 0.0 }
 0x37b   : > { %v5616_v50 = vadd.f32 %v2757_v49, %v7097_v39  ;;  %v2845_v53 = vmax.f32 %v5614_v46, 0.0 }
 0x37c   : > { %v2846_v52 = vmax.f32 %v5615_v48, 0.0 }
 0x37d   : > { %v2847_v54 = vmax.f32 %v5616_v50, 0.0 }
 0x37e   : > { %v2886_v55 = vpack.c.bf16 %v2846_v52, %v2844_v51 }
 0x37f   : > { %v2887_v56 = vpack.c.bf16 %v2847_v54, %v2845_v53  ;;  %v2761_v57 = vpop.f32.mrb[48].mxu0 }
 0x380   : > { %v5617_v58 = vadd.f32 %v2761_v57, %v7094_v38  ;;  %v2763_v59 = vpop.f32.mrb[49].mxu0 }
 0x381   : > { %v5618_v60 = vadd.f32 %v2763_v59, %v7097_v39  ;;  %v2765_v61 = vpop.f32.mrb[50].mxu0  ;;  %3242 = vmatprep.mubr.bf16.mxu1 %v2887_v56 }
 0x382   : > { %v5619_v62 = vadd.f32 %v2765_v61, %v7094_v38  ;;  %v2767_v63 = vpop.f32.mrb[51].mxu0  ;;  %3243 = vmatmul.mubr.bf16.gmra.mrb[44].mxu1 %v2886_v55  ;;  %v2848_v3 = vmax.f32 %v5617_v58, 0.0  ;;  %v2928_v55 = vld [vmem:[%s7586_s4] sm:$0x3] }
 0x383   : > { %v5620_v1 = vadd.f32 %v2767_v63, %v7097_v39  ;;  %v2849_v5 = vmax.f32 %v5618_v60, 0.0  ;;  %v7167_v56 = vrot.slane %v2928_v55, %v7086_v35  ;;  %v6196_v63 = vld [vmem:[%s7589_s7 + $0x40] sm:$0xff]  }
 0x384   : > { %v2850_v4 = vmax.f32 %v5619_v62, 0.0  ;;  %5397 = vmatprep.subr.bf16.mxu1 %v6196_v63 }
 0x385   : > { %v2851_v6 = vmax.f32 %v5620_v1, 0.0 }
 0x386   : > { %v2888_v7 = vpack.c.bf16 %v2850_v4, %v2848_v3 }
 0x387   : > { %v2889_v8 = vpack.c.bf16 %v2851_v6, %v2849_v5  ;;  %v2771_v9 = vpop.f32.mrb[52].mxu0 }
 0x388   : > { %v5621_v10 = vadd.f32 %v2771_v9, %v7094_v38  ;;  %v2773_v11 = vpop.f32.mrb[53].mxu0 }
 0x389   : > { %v5622_v12 = vadd.f32 %v2773_v11, %v7097_v39  ;;  %v2775_v13 = vpop.f32.mrb[54].mxu0  ;;  %3252 = vmatprep.mubr.bf16.mxu1 %v2889_v8  ;;  %v6197_v8 = vld [vmem:[%s7589_s7] sm:$0xff]   ;;  %v6198_v11 = vld [vmem:[%s7589_s7 + $0x48] sm:$0xff]  }
 0x38a   : > { %v5623_v14 = vadd.f32 %v2775_v13, %v7094_v38  ;;  %v2777_v15 = vpop.f32.mrb[55].mxu0  ;;  %3253 = vmatmul.mubr.bf16.gmra.mrb[48].mxu1 %v2888_v7  ;;  %v2852_v17 = vmax.f32 %v5621_v10, 0.0 }
 0x38b   : > { %v5624_v16 = vadd.f32 %v2777_v15, %v7097_v39  ;;  %v2853_v19 = vmax.f32 %v5622_v12, 0.0 }
 0x38c   : > { %v2854_v18 = vmax.f32 %v5623_v14, 0.0 }
 0x38d   : > { %v2855_v20 = vmax.f32 %v5624_v16, 0.0 }
 0x38e   : > { %v2890_v21 = vpack.c.bf16 %v2854_v18, %v2852_v17  ;;  %v6199_v17 = vld [vmem:[%s7589_s7 + $0x8] sm:$0xff]  }
 0x38f   : > { %v2891_v22 = vpack.c.bf16 %v2855_v20, %v2853_v19  ;;  %v2781_v23 = vpop.f32.mrb[56].mxu0  ;;  %v6200_v20 = vld [vmem:[%s7589_s7 + $0x50] sm:$0xff]  }
 0x390   : > { %v5625_v24 = vadd.f32 %v2781_v23, %v7094_v38  ;;  %v2783_v25 = vpop.f32.mrb[57].mxu0 }
 0x391   : > { %v5626_v26 = vadd.f32 %v2783_v25, %v7097_v39  ;;  %v2785_v27 = vpop.f32.mrb[58].mxu0  ;;  %3262 = vmatprep.mubr.bf16.mxu1 %v2891_v22 }
 0x392   : > { %v5627_v28 = vadd.f32 %v2785_v27, %v7094_v38  ;;  %v2787_v29 = vpop.f32.mrb[59].mxu0  ;;  %3263 = vmatmul.mubr.bf16.gmra.mrb[52].mxu1 %v2890_v21  ;;  %v2856_v31 = vmax.f32 %v5625_v24, 0.0 }
 0x393   : > { %v5628_v30 = vadd.f32 %v2787_v29, %v7097_v39  ;;  %v2857_v33 = vmax.f32 %v5626_v26, 0.0  ;;  %v6201_v26 = vld [vmem:[%s7589_s7 + $0x10] sm:$0xff]   ;;  %v6202_v29 = vld [vmem:[%s7589_s7 + $0x58] sm:$0xff]  }
 0x394   : > { %v2858_v32 = vmax.f32 %v5627_v28, 0.0 }
 0x395   : > { %v2859_v34 = vmax.f32 %v5628_v30, 0.0 }
 0x396   : > { %v2892_v36 = vpack.c.bf16 %v2858_v32, %v2856_v31 }
 0x397   : > { %v2893_v40 = vpack.c.bf16 %v2859_v34, %v2857_v33  ;;  %v2791_v41 = vpop.f32.mrb[60].mxu0 }
 0x398   : > { %v5629_v42 = vadd.f32 %v2791_v41, %v7094_v38  ;;  %v2793_v43 = vpop.f32.mrb[61].mxu0 }
 0x399   : > { %v5630_v44 = vadd.f32 %v2793_v43, %v7097_v39  ;;  %v2795_v45 = vpop.f32.mrb[62].mxu0  ;;  %3272 = vmatprep.mubr.bf16.mxu1 %v2893_v40 }
 0x39a   : > { %v5631_v46 = vadd.f32 %v2795_v45, %v7094_v38  ;;  %v2797_v47 = vpop.f32.mrb[63].mxu0  ;;  %3273 = vmatmul.mubr.bf16.gmra.mrb[56].mxu1 %v2892_v36  ;;  %v2860_v49 = vmax.f32 %v5629_v42, 0.0  ;;  %v7170_v38 = vrot.slane %v2928_v55, %v7091_v37  ;;  %v6203_v36 = vld [vmem:[%s7589_s7 + $0x18] sm:$0xff]   ;;  %v6204_v42 = vld [vmem:[%s7589_s7 + $0x60] sm:$0xff]  }
 0x39b   : > { %v5632_v48 = vadd.f32 %v2797_v47, %v7097_v39  ;;  %v2861_v51 = vmax.f32 %v5630_v44, 0.0 }
 0x39c   : > { %v2862_v50 = vmax.f32 %v5631_v46, 0.0 }
 0x39d   : > { %v2863_v52 = vmax.f32 %v5632_v48, 0.0  ;;  %v6205_v48 = vld [vmem:[%s7589_s7 + $0x20] sm:$0xff]  }
 0x39e   : > { %v2894_v53 = vpack.c.bf16 %v2862_v50, %v2860_v49 }
 0x39f   : > { %v2895_v54 = vpack.c.bf16 %v2863_v52, %v2861_v51  ;;  %v6206_v51 = vld [vmem:[%s7589_s7 + $0x68] sm:$0xff]  }
 0x3a1   : > { %3282 = vmatprep.mubr.bf16.mxu1 %v2895_v54 }
 0x3a2   : > { %3283 = vmatmul.mubr.bf16.gmra.mrb[60].mxu1 %v2894_v53 }
 0x3fd   : > { %v3134_v57 = vpop.f32.mrb[0].mxu1 }
 0x3fe   : > { %v3135_v39 = vadd.f32 %v3134_v57, %v7167_v56  ;;  %v3136_v58 = vpop.f32.mrb[1].mxu1 }
 0x3ff   : > { %v3137_v59 = vadd.f32 %v3136_v58, %v7170_v38  ;;  %v3138_v60 = vpop.f32.mrb[2].mxu1 }
 0x400   : > { %v3139_v61 = vadd.f32 %v3138_v60, %v7167_v56  ;;  %v3140_v62 = vpop.f32.mrb[3].mxu1  ;;  %v3293_v1 = vmax.f32 %v3135_v39, 0.0  ;;  %v6207_v39 = vld [vmem:[%s7589_s7 + $0x28] sm:$0xff]  }
 0x401   : > { %v3141_v0 = vadd.f32 %v3140_v62, %v7170_v38  ;;  %v3294_v3 = vmax.f32 %v3137_v59, 0.0 }
 0x402   : > { %v3295_v2 = vmax.f32 %v3139_v61, 0.0 }
 0x403   : > { %v3296_v4 = vmax.f32 %v3141_v0, 0.0 }
 0x404   : > { %v3357_v5 = vpack.c.bf16 %v3295_v2, %v3293_v1 }
 0x405   : > { %v3358_v6 = vpack.c.bf16 %v3296_v4, %v3294_v3  ;;  %v3144_v7 = vpop.f32.mrb[4].mxu1 }
 0x406   : > { %v3145_v9 = vadd.f32 %v3144_v7, %v7167_v56  ;;  %v3146_v10 = vpop.f32.mrb[5].mxu1 }
 0x407   : > { %v3147_v12 = vadd.f32 %v3146_v10, %v7170_v38  ;;  %v3148_v13 = vpop.f32.mrb[6].mxu1  ;;  %3625 = vmatprep.mubr.bf16.mxu1 %v3358_v6 }
 0x408   : > { %v3149_v14 = vadd.f32 %v3148_v13, %v7167_v56  ;;  %v3150_v15 = vpop.f32.mrb[7].mxu1  ;;  %3626 = vmatmul.mubr.bf16.vlgmr.msra.gmra.mrb[64].mxu1 %v3357_v5  ;;  %v3297_v18 = vmax.f32 %v3145_v9, 0.0 }
 0x409   : > { %v3151_v16 = vadd.f32 %v3150_v15, %v7170_v38  ;;  %5398 = vmatpush3.bf16.msra.mxu1 %v6197_v8  ;;  %v3298_v21 = vmax.f32 %v3147_v12, 0.0 }
 0x40a   : > { %v3299_v19 = vmax.f32 %v3149_v14, 0.0  ;;  %5399 = vmatprep.subr.bf16.mxu1 %v6198_v11 }
 0x40b   : > { %v3300_v22 = vmax.f32 %v3151_v16, 0.0 }
 0x40c   : > { %v3359_v23 = vpack.c.bf16 %v3299_v19, %v3297_v18 }
 0x40d   : > { %v3360_v24 = vpack.c.bf16 %v3300_v22, %v3298_v21  ;;  %v3154_v25 = vpop.f32.mrb[8].mxu1  ;;  %5400 = vmatpush3.bf16.msra.mxu1 %v6199_v17 }
 0x40e   : > { %v3155_v27 = vadd.f32 %v3154_v25, %v7167_v56  ;;  %v3156_v28 = vpop.f32.mrb[9].mxu1  ;;  %5401 = vmatprep.subr.bf16.mxu1 %v6200_v20 }
 0x40f   : > { %v3157_v30 = vadd.f32 %v3156_v28, %v7170_v38  ;;  %v3158_v31 = vpop.f32.mrb[10].mxu1  ;;  %3635 = vmatprep.mubr.bf16.mxu1 %v3360_v24 }
 0x410   : > { %v3159_v32 = vadd.f32 %v3158_v31, %v7167_v56  ;;  %v3160_v33 = vpop.f32.mrb[11].mxu1  ;;  %3636 = vmatmul.mubr.bf16.gmra.mrb[68].mxu1 %v3359_v23  ;;  %v3301_v40 = vmax.f32 %v3155_v27, 0.0 }
 0x411   : > { %v3161_v34 = vadd.f32 %v3160_v33, %v7170_v38  ;;  %5402 = vmatpush3.bf16.msra.mxu1 %v6201_v26  ;;  %v3302_v43 = vmax.f32 %v3157_v30, 0.0 }
 0x412   : > { %v3303_v41 = vmax.f32 %v3159_v32, 0.0  ;;  %5403 = vmatprep.subr.bf16.mxu1 %v6202_v29 }
 0x413   : > { %v3304_v44 = vmax.f32 %v3161_v34, 0.0 }
 0x414   : > { %v3361_v45 = vpack.c.bf16 %v3303_v41, %v3301_v40 }
 0x415   : > { %v3362_v46 = vpack.c.bf16 %v3304_v44, %v3302_v43  ;;  %v3164_v47 = vpop.f32.mrb[12].mxu1  ;;  %5404 = vmatpush3.bf16.msra.mxu1 %v6203_v36 }
 0x416   : > { %v3165_v49 = vadd.f32 %v3164_v47, %v7167_v56  ;;  %v3166_v50 = vpop.f32.mrb[13].mxu1  ;;  %5405 = vmatprep.subr.bf16.mxu1 %v6204_v42 }
 0x417   : > { %v3167_v52 = vadd.f32 %v3166_v50, %v7170_v38  ;;  %v3168_v53 = vpop.f32.mrb[14].mxu1  ;;  %3645 = vmatprep.mubr.bf16.mxu1 %v3362_v46 }
 0x418   : > { %v3169_v54 = vadd.f32 %v3168_v53, %v7167_v56  ;;  %v3170_v55 = vpop.f32.mrb[15].mxu1  ;;  %3646 = vmatmul.mubr.bf16.gmra.mrb[72].mxu1 %v3361_v45  ;;  %v3305_v58 = vmax.f32 %v3165_v49, 0.0 }
 0x419   : > { %v3171_v57 = vadd.f32 %v3170_v55, %v7170_v38  ;;  %5406 = vmatpush3.bf16.msra.mxu1 %v6205_v48  ;;  %v3306_v60 = vmax.f32 %v3167_v52, 0.0 }
 0x41a   : > { %v3307_v59 = vmax.f32 %v3169_v54, 0.0  ;;  %5407 = vmatprep.subr.bf16.mxu1 %v6206_v51 }
 0x41b   : > { %v3308_v61 = vmax.f32 %v3171_v57, 0.0 }
 0x41c   : > { %v3363_v62 = vpack.c.bf16 %v3307_v59, %v3305_v58 }
 0x41d   : > { %v3364_v63 = vpack.c.bf16 %v3308_v61, %v3306_v60  ;;  %v3174_v0 = vpop.f32.mrb[16].mxu1  ;;  %5408 = vmatpush3.bf16.msra.mxu1 %v6207_v39 }
 0x41e   : > { %v3175_v1 = vadd.f32 %v3174_v0, %v7167_v56  ;;  %v3176_v2 = vpop.f32.mrb[17].mxu1 }
 0x41f   : > { %v3177_v3 = vadd.f32 %v3176_v2, %v7170_v38  ;;  %v3178_v4 = vpop.f32.mrb[18].mxu1  ;;  %3655 = vmatprep.mubr.bf16.mxu1 %v3364_v63 }
 0x420   : > { %v3179_v5 = vadd.f32 %v3178_v4, %v7167_v56  ;;  %v3180_v6 = vpop.f32.mrb[19].mxu1  ;;  %3656 = vmatmul.mubr.bf16.gmra.mrb[76].mxu1 %v3363_v62  ;;  %v3309_v8 = vmax.f32 %v3175_v1, 0.0 }
 0x421   : > { %v3181_v7 = vadd.f32 %v3180_v6, %v7170_v38  ;;  %v3310_v10 = vmax.f32 %v3177_v3, 0.0 }
 0x422   : > { %v3311_v9 = vmax.f32 %v3179_v5, 0.0 }
 0x423   : > { %v3312_v11 = vmax.f32 %v3181_v7, 0.0 }
 0x424   : > { %v3365_v12 = vpack.c.bf16 %v3311_v9, %v3309_v8 }
 0x425   : > { %v3366_v13 = vpack.c.bf16 %v3312_v11, %v3310_v10  ;;  %v3184_v14 = vpop.f32.mrb[20].mxu1 }
 0x426   : > { %v3185_v15 = vadd.f32 %v3184_v14, %v7167_v56  ;;  %v3186_v16 = vpop.f32.mrb[21].mxu1 }
 0x427   : > { %v3187_v17 = vadd.f32 %v3186_v16, %v7170_v38  ;;  %v3188_v18 = vpop.f32.mrb[22].mxu1  ;;  %3665 = vmatprep.mubr.bf16.mxu1 %v3366_v13 }
 0x428   : > { %v3189_v19 = vadd.f32 %v3188_v18, %v7167_v56  ;;  %v3190_v20 = vpop.f32.mrb[23].mxu1  ;;  %3666 = vmatmul.mubr.bf16.gmra.mrb[80].mxu1 %v3365_v12  ;;  %v3313_v22 = vmax.f32 %v3185_v15, 0.0 }
 0x429   : > { %v3191_v21 = vadd.f32 %v3190_v20, %v7170_v38  ;;  %v3314_v24 = vmax.f32 %v3187_v17, 0.0 }
 0x42a   : > { %v3315_v23 = vmax.f32 %v3189_v19, 0.0 }
 0x42b   : > { %v3316_v25 = vmax.f32 %v3191_v21, 0.0 }
 0x42c   : > { %v3367_v26 = vpack.c.bf16 %v3315_v23, %v3313_v22 }
 0x42d   : > { %v3368_v27 = vpack.c.bf16 %v3316_v25, %v3314_v24  ;;  %v3194_v28 = vpop.f32.mrb[24].mxu1 }
 0x42e   : > { %v3195_v29 = vadd.f32 %v3194_v28, %v7167_v56  ;;  %v3196_v30 = vpop.f32.mrb[25].mxu1 }
 0x42f   : > { %v3197_v31 = vadd.f32 %v3196_v30, %v7170_v38  ;;  %v3198_v32 = vpop.f32.mrb[26].mxu1  ;;  %3675 = vmatprep.mubr.bf16.mxu1 %v3368_v27 }
 0x430   : > { %v3199_v33 = vadd.f32 %v3198_v32, %v7167_v56  ;;  %v3200_v34 = vpop.f32.mrb[27].mxu1  ;;  %3676 = vmatmul.mubr.bf16.gmra.mrb[84].mxu1 %v3367_v26  ;;  %v3317_v40 = vmax.f32 %v3195_v29, 0.0 }
 0x431   : > { %v3201_v36 = vadd.f32 %v3200_v34, %v7170_v38  ;;  %v3318_v42 = vmax.f32 %v3197_v31, 0.0 }
 0x432   : > { %v3319_v41 = vmax.f32 %v3199_v33, 0.0 }
 0x433   : > { %v3320_v43 = vmax.f32 %v3201_v36, 0.0 }
 0x434   : > { %v3369_v44 = vpack.c.bf16 %v3319_v41, %v3317_v40 }
 0x435   : > { %v3370_v45 = vpack.c.bf16 %v3320_v43, %v3318_v42  ;;  %v3204_v46 = vpop.f32.mrb[28].mxu1 }
 0x436   : > { %v3205_v47 = vadd.f32 %v3204_v46, %v7167_v56  ;;  %v3206_v48 = vpop.f32.mrb[29].mxu1 }
 0x437   : > { %v3207_v49 = vadd.f32 %v3206_v48, %v7170_v38  ;;  %v3208_v50 = vpop.f32.mrb[30].mxu1  ;;  %3685 = vmatprep.mubr.bf16.mxu1 %v3370_v45 }
 0x438   : > { %v3209_v51 = vadd.f32 %v3208_v50, %v7167_v56  ;;  %v3210_v52 = vpop.f32.mrb[31].mxu1  ;;  %3686 = vmatmul.mubr.bf16.gmra.mrb[88].mxu1 %v3369_v44  ;;  %v3321_v54 = vmax.f32 %v3205_v47, 0.0 }
 0x439   : > { %v3211_v53 = vadd.f32 %v3210_v52, %v7170_v38  ;;  %v3322_v57 = vmax.f32 %v3207_v49, 0.0 }
 0x43a   : > { %v3323_v55 = vmax.f32 %v3209_v51, 0.0 }
 0x43b   : > { %v3324_v39 = vmax.f32 %v3211_v53, 0.0 }
 0x43c   : > { %v3371_v58 = vpack.c.bf16 %v3323_v55, %v3321_v54 }
 0x43d   : > { %v3372_v59 = vpack.c.bf16 %v3324_v39, %v3322_v57  ;;  %v3214_v60 = vpop.f32.mrb[32].mxu1 }
 0x43e   : > { %v3215_v61 = vadd.f32 %v3214_v60, %v7167_v56  ;;  %v3216_v62 = vpop.f32.mrb[33].mxu1 }
 0x43f   : > { %v3217_v63 = vadd.f32 %v3216_v62, %v7170_v38  ;;  %v3218_v0 = vpop.f32.mrb[34].mxu1  ;;  %3695 = vmatprep.mubr.bf16.mxu1 %v3372_v59 }
 0x440   : > { %v3219_v1 = vadd.f32 %v3218_v0, %v7167_v56  ;;  %v3220_v2 = vpop.f32.mrb[35].mxu1  ;;  %3696 = vmatmul.mubr.bf16.gmra.mrb[92].mxu1 %v3371_v58  ;;  %v3325_v4 = vmax.f32 %v3215_v61, 0.0 }
 0x441   : > { %v3221_v3 = vadd.f32 %v3220_v2, %v7170_v38  ;;  %v3326_v6 = vmax.f32 %v3217_v63, 0.0 }
 0x442   : > { %v3327_v5 = vmax.f32 %v3219_v1, 0.0 }
 0x443   : > { %v3328_v7 = vmax.f32 %v3221_v3, 0.0 }
 0x444   : > { %v3373_v8 = vpack.c.bf16 %v3327_v5, %v3325_v4 }
 0x445   : > { %v3374_v9 = vpack.c.bf16 %v3328_v7, %v3326_v6  ;;  %v3224_v10 = vpop.f32.mrb[36].mxu1 }
 0x446   : > { %v3225_v11 = vadd.f32 %v3224_v10, %v7167_v56  ;;  %v3226_v12 = vpop.f32.mrb[37].mxu1 }
 0x447   : > { %v3227_v13 = vadd.f32 %v3226_v12, %v7170_v38  ;;  %v3228_v14 = vpop.f32.mrb[38].mxu1  ;;  %3705 = vmatprep.mubr.bf16.mxu1 %v3374_v9 }
 0x448   : > { %v3229_v15 = vadd.f32 %v3228_v14, %v7167_v56  ;;  %v3230_v16 = vpop.f32.mrb[39].mxu1  ;;  %3706 = vmatmul.mubr.bf16.gmra.mrb[96].mxu1 %v3373_v8  ;;  %v3329_v18 = vmax.f32 %v3225_v11, 0.0 }
 0x449   : > { %v3231_v17 = vadd.f32 %v3230_v16, %v7170_v38  ;;  %v3330_v20 = vmax.f32 %v3227_v13, 0.0 }
 0x44a   : > { %v3331_v19 = vmax.f32 %v3229_v15, 0.0 }
 0x44b   : > { %v3332_v21 = vmax.f32 %v3231_v17, 0.0 }
 0x44c   : > { %v3375_v22 = vpack.c.bf16 %v3331_v19, %v3329_v18 }
 0x44d   : > { %v3376_v23 = vpack.c.bf16 %v3332_v21, %v3330_v20  ;;  %v3234_v24 = vpop.f32.mrb[40].mxu1 }
 0x44e   : > { %v3235_v25 = vadd.f32 %v3234_v24, %v7167_v56  ;;  %v3236_v26 = vpop.f32.mrb[41].mxu1 }
 0x44f   : > { %v3237_v27 = vadd.f32 %v3236_v26, %v7170_v38  ;;  %v3238_v28 = vpop.f32.mrb[42].mxu1  ;;  %3715 = vmatprep.mubr.bf16.mxu1 %v3376_v23 }
 0x450   : > { %v3239_v29 = vadd.f32 %v3238_v28, %v7167_v56  ;;  %v3240_v30 = vpop.f32.mrb[43].mxu1  ;;  %3716 = vmatmul.mubr.bf16.gmra.mrb[100].mxu1 %v3375_v22  ;;  %v3333_v32 = vmax.f32 %v3235_v25, 0.0 }
 0x451   : > { %v3241_v31 = vadd.f32 %v3240_v30, %v7170_v38  ;;  %v3334_v34 = vmax.f32 %v3237_v27, 0.0  ;;  %v6208_v30 = vld [vmem:[%s7589_s7 + $0x70] sm:$0xff]  }
 0x452   : > { %v3335_v33 = vmax.f32 %v3239_v29, 0.0  ;;  %5409 = vmatprep.subr.bf16.mxu1 %v6208_v30 }
 0x453   : > { %v3336_v36 = vmax.f32 %v3241_v31, 0.0  ;;  %v6209_v31 = vld [vmem:[%s7589_s7 + $0x30] sm:$0xff]  }
 0x454   : > { %v3377_v40 = vpack.c.bf16 %v3335_v33, %v3333_v32  ;;  %5410 = vmatpush3.bf16.msra.mxu1 %v6209_v31 }
 0x455   : > { %v3378_v41 = vpack.c.bf16 %v3336_v36, %v3334_v34  ;;  %v3244_v42 = vpop.f32.mrb[44].mxu1 }
 0x456   : > { %v3245_v43 = vadd.f32 %v3244_v42, %v7167_v56  ;;  %v3246_v44 = vpop.f32.mrb[45].mxu1 }
 0x457   : > { %v3247_v45 = vadd.f32 %v3246_v44, %v7170_v38  ;;  %v3248_v46 = vpop.f32.mrb[46].mxu1  ;;  %3725 = vmatprep.mubr.bf16.mxu1 %v3378_v41 }
 0x458   : > { %v3249_v47 = vadd.f32 %v3248_v46, %v7167_v56  ;;  %v3250_v48 = vpop.f32.mrb[47].mxu1  ;;  %3726 = vmatmul.mubr.bf16.gmra.mrb[104].mxu1 %v3377_v40  ;;  %v3337_v50 = vmax.f32 %v3245_v43, 0.0 }
 0x459   : > { %v3251_v49 = vadd.f32 %v3250_v48, %v7170_v38  ;;  %v3338_v52 = vmax.f32 %v3247_v45, 0.0 }
 0x45a   : > { %v3339_v51 = vmax.f32 %v3249_v47, 0.0 }
 0x45b   : > { %v3340_v53 = vmax.f32 %v3251_v49, 0.0 }
 0x45c   : > { %v3379_v54 = vpack.c.bf16 %v3339_v51, %v3337_v50 }
 0x45d   : > { %v3380_v55 = vpack.c.bf16 %v3340_v53, %v3338_v52  ;;  %v3254_v57 = vpop.f32.mrb[48].mxu1  ;;  %v6210_v52 = vld [vmem:[%s7589_s7 + $0x78] sm:$0xff]  }
 0x45e   : > { %v3255_v39 = vadd.f32 %v3254_v57, %v7167_v56  ;;  %v3256_v58 = vpop.f32.mrb[49].mxu1  ;;  %5411 = vmatprep.subr.bf16.mxu1 %v6210_v52 }
 0x45f   : > { %v3257_v59 = vadd.f32 %v3256_v58, %v7170_v38  ;;  %v3258_v60 = vpop.f32.mrb[50].mxu1  ;;  %3735 = vmatprep.mubr.bf16.mxu1 %v3380_v55 }
 0x460   : > { %v3259_v61 = vadd.f32 %v3258_v60, %v7167_v56  ;;  %v3260_v62 = vpop.f32.mrb[51].mxu1  ;;  %3736 = vmatmul.mubr.bf16.gmra.mrb[108].mxu1 %v3379_v54  ;;  %v3341_v0 = vmax.f32 %v3255_v39, 0.0  ;;  %v6211_v54 = vld [vmem:[%s7589_s7 + $0x38] sm:$0xff]  }
 0x461   : > { %v3261_v63 = vadd.f32 %v3260_v62, %v7170_v38  ;;  %v3342_v2 = vmax.f32 %v3257_v59, 0.0  ;;  %5412 = vmatpush3.bf16.msra.mxu1 %v6211_v54 }
 0x462   : > { %v3343_v1 = vmax.f32 %v3259_v61, 0.0 }
 0x463   : > { %v3344_v3 = vmax.f32 %v3261_v63, 0.0 }
 0x464   : > { %v3381_v4 = vpack.c.bf16 %v3343_v1, %v3341_v0 }
 0x465   : > { %v3382_v5 = vpack.c.bf16 %v3344_v3, %v3342_v2  ;;  %v3264_v6 = vpop.f32.mrb[52].mxu1 }
 0x466   : > { %v3265_v7 = vadd.f32 %v3264_v6, %v7167_v56  ;;  %v3266_v8 = vpop.f32.mrb[53].mxu1 }
 0x467   : > { %v3267_v9 = vadd.f32 %v3266_v8, %v7170_v38  ;;  %v3268_v10 = vpop.f32.mrb[54].mxu1  ;;  %3745 = vmatprep.mubr.bf16.mxu1 %v3382_v5 }
 0x468   : > { %v3269_v11 = vadd.f32 %v3268_v10, %v7167_v56  ;;  %v3270_v12 = vpop.f32.mrb[55].mxu1  ;;  %3746 = vmatmul.mubr.bf16.gmra.mrb[112].mxu1 %v3381_v4  ;;  %v3345_v14 = vmax.f32 %v3265_v7, 0.0 }
 0x469   : > { %v3271_v13 = vadd.f32 %v3270_v12, %v7170_v38  ;;  %v3346_v16 = vmax.f32 %v3267_v9, 0.0 }
 0x46a   : > { %v3347_v15 = vmax.f32 %v3269_v11, 0.0 }
 0x46b   : > { %v3348_v17 = vmax.f32 %v3271_v13, 0.0 }
 0x46c   : > { %v3383_v18 = vpack.c.bf16 %v3347_v15, %v3345_v14 }
 0x46d   : > { %v3384_v19 = vpack.c.bf16 %v3348_v17, %v3346_v16  ;;  %v3274_v20 = vpop.f32.mrb[56].mxu1 }
 0x46e   : > { %v3275_v21 = vadd.f32 %v3274_v20, %v7167_v56  ;;  %v3276_v22 = vpop.f32.mrb[57].mxu1 }
 0x46f   : > { %v3277_v23 = vadd.f32 %v3276_v22, %v7170_v38  ;;  %v3278_v24 = vpop.f32.mrb[58].mxu1  ;;  %3755 = vmatprep.mubr.bf16.mxu1 %v3384_v19 }
 0x470   : > { %v3279_v25 = vadd.f32 %v3278_v24, %v7167_v56  ;;  %v3280_v26 = vpop.f32.mrb[59].mxu1  ;;  %3756 = vmatmul.mubr.bf16.gmra.mrb[116].mxu1 %v3383_v18  ;;  %v3349_v28 = vmax.f32 %v3275_v21, 0.0 }
 0x471   : > { %v3281_v27 = vadd.f32 %v3280_v26, %v7170_v38  ;;  %v3350_v32 = vmax.f32 %v3277_v23, 0.0 }
 0x472   : > { %v3351_v29 = vmax.f32 %v3279_v25, 0.0 }
 0x473   : > { %v3352_v33 = vmax.f32 %v3281_v27, 0.0 }
 0x474   : > { %v3385_v34 = vpack.c.bf16 %v3351_v29, %v3349_v28 }
 0x475   : > { %v3386_v36 = vpack.c.bf16 %v3352_v33, %v3350_v32  ;;  %v3284_v40 = vpop.f32.mrb[60].mxu1 }
 0x476   : > { %v3285_v41 = vadd.f32 %v3284_v40, %v7167_v56  ;;  %v3286_v42 = vpop.f32.mrb[61].mxu1 }
 0x477   : > { %v3287_v43 = vadd.f32 %v3286_v42, %v7170_v38  ;;  %v3288_v44 = vpop.f32.mrb[62].mxu1  ;;  %3765 = vmatprep.mubr.bf16.mxu1 %v3386_v36 }
 0x478   : > { %v3289_v45 = vadd.f32 %v3288_v44, %v7167_v56  ;;  %v3290_v46 = vpop.f32.mrb[63].mxu1  ;;  %3766 = vmatmul.mubr.bf16.gmra.mrb[120].mxu1 %v3385_v34  ;;  %v3353_v48 = vmax.f32 %v3285_v41, 0.0  ;;  %v3421_v56 = vld [vmem:[%s7588_s6] sm:$0x3] }
 0x479   : > { %v3291_v47 = vadd.f32 %v3290_v46, %v7170_v38  ;;  %v3354_v50 = vmax.f32 %v3287_v43, 0.0  ;;  %v7288_v38 = vrot.slane %v3421_v56, %v7086_v35  ;;  %v7291_v57 = vrot.slane %v3421_v56, %v7091_v37 }
 0x47a   : > { %v3355_v49 = vmax.f32 %v3289_v45, 0.0 }
 0x47b   : > { %v3356_v51 = vmax.f32 %v3291_v47, 0.0 }
 0x47c   : > { %v3387_v53 = vpack.c.bf16 %v3355_v49, %v3353_v48 }
 0x47d   : > { %v3388_v55 = vpack.c.bf16 %v3356_v51, %v3354_v50 }
 0x47f   : > { %3775 = vmatprep.mubr.bf16.mxu1 %v3388_v55 }
 0x480   : > { %3776 = vmatmul.mubr.bf16.gmra.mrb[124].mxu1 %v3387_v53 }
 0x4db   : > { %v3627_v39 = vpop.f32.mrb[64].mxu1 }
 0x4dc   : > { %v3628_v58 = vadd.f32 %v3627_v39, %v7288_v38  ;;  %v3629_v59 = vpop.f32.mrb[65].mxu1 }
 0x4dd   : > { %v3630_v60 = vadd.f32 %v3629_v59, %v7291_v57  ;;  %v3631_v61 = vpop.f32.mrb[66].mxu1 }
 0x4de   : > { %v3786_v62 = vsub.f32 0.0, %v3628_v58  ;;  %v3632_v63 = vadd.f32 %v3631_v61, %v7288_v38  ;;  %v3633_v0 = vpop.f32.mrb[67].mxu1 }
 0x4df   : > { %v3787_v1 = vsub.f32 0.0, %v3630_v60  ;;  %v3634_v2 = vadd.f32 %v3633_v0, %v7291_v57 }
 0x4e0   : > { %v3850_v3 = vmul.f32 1.442695, %v3786_v62  ;;  %v3788_v35 = vsub.f32 0.0, %v3632_v63 }
 0x4e1   : > { %v3852_v4 = vmul.f32 1.442695, %v3787_v1  ;;  %v3789_v5 = vsub.f32 0.0, %v3634_v2 }
 0x4e2   : > { %6216 = vpow2.f32 %v3850_v3  ;;  %v3854_v37 = vmul.f32 1.442695, %v3788_v35 }
 0x4e3   : > { %6218 = vpow2.f32 %v3852_v4  ;;  %v3856_v6 = vmul.f32 1.442695, %v3789_v5  ;;  %v3637_v7 = vpop.f32.mrb[68].mxu1 }
 0x4e4   : > { %6220 = vpow2.f32 %v3854_v37  ;;  %v3638_v8 = vadd.f32 %v3637_v7, %v7288_v38  ;;  %v3639_v9 = vpop.f32.mrb[69].mxu1 }
 0x4e5   : > { %6222 = vpow2.f32 %v3856_v6  ;;  %v3640_v10 = vadd.f32 %v3639_v9, %v7291_v57  ;;  %v3641_v11 = vpop.f32.mrb[70].mxu1 }
 0x4e6   : > { %v3790_v12 = vsub.f32 0.0, %v3638_v8  ;;  %v3642_v13 = vadd.f32 %v3641_v11, %v7288_v38  ;;  %v3643_v14 = vpop.f32.mrb[71].mxu1 }
 0x4e7   : > { %v3791_v15 = vsub.f32 0.0, %v3640_v10  ;;  %v3644_v16 = vadd.f32 %v3643_v14, %v7291_v57 }
 0x4e8   : > { %v3858_v17 = vmul.f32 1.442695, %v3790_v12  ;;  %v3792_v18 = vsub.f32 0.0, %v3642_v13 }
 0x4e9   : > { %v3860_v19 = vmul.f32 1.442695, %v3791_v15  ;;  %v3793_v20 = vsub.f32 0.0, %v3644_v16 }
 0x4ea   : > { %6224 = vpow2.f32 %v3858_v17  ;;  %v3862_v21 = vmul.f32 1.442695, %v3792_v18 }
 0x4eb   : > { %6226 = vpow2.f32 %v3860_v19  ;;  %v3864_v22 = vmul.f32 1.442695, %v3793_v20  ;;  %v3647_v23 = vpop.f32.mrb[72].mxu1 }
 0x4ec   : > { %v6217_v24 = vpop.eup %6216  ;;  %6228 = vpow2.f32 %v3862_v21  ;;  %v3648_v25 = vadd.f32 %v3647_v23, %v7288_v38  ;;  %v3649_v26 = vpop.f32.mrb[73].mxu1 }
 0x4ed   : > { %v6219_v27 = vpop.eup %6218  ;;  %v3978_v28 = vadd.f32 1.0, %v6217_v24  ;;  %6230 = vpow2.f32 %v3864_v22  ;;  %v3650_v29 = vadd.f32 %v3649_v26, %v7291_v57  ;;  %v3651_v30 = vpop.f32.mrb[74].mxu1  ;;  %v6212_v26 = vld [vmem:[%s7591_s9] sm:$0xff]  }
 0x4ee   : > { %v6221_v31 = vpop.eup %6220  ;;  %v3979_v32 = vadd.f32 1.0, %v6219_v27  ;;  %v3794_v33 = vsub.f32 0.0, %v3648_v25  ;;  %v3652_v34 = vadd.f32 %v3651_v30, %v7288_v38  ;;  %v3653_v36 = vpop.f32.mrb[75].mxu1  ;;  %v6213_v27 = vld [vmem:[%s7591_s9 + $0x8] sm:$0xff]   ;;  %5529 = vmatprep.subr.bf16.mxu1 %v6212_v26 }
 0x4ef   : > { %v6223_v40 = vpop.eup %6222  ;;  %6232 = vrcp.f32 %v3978_v28  ;;  %v3980_v41 = vadd.f32 1.0, %v6221_v31  ;;  %v3795_v42 = vsub.f32 0.0, %v3650_v29  ;;  %v3654_v43 = vadd.f32 %v3653_v36, %v7291_v57 }
 0x4f0   : > { %6234 = vrcp.f32 %v3979_v32  ;;  %v3981_v44 = vadd.f32 1.0, %v6223_v40  ;;  %v3866_v45 = vmul.f32 1.442695, %v3794_v33  ;;  %v3796_v46 = vsub.f32 0.0, %v3652_v34 }
 0x4f1   : > { %6236 = vrcp.f32 %v3980_v41  ;;  %v3868_v47 = vmul.f32 1.442695, %v3795_v42  ;;  %v3797_v48 = vsub.f32 0.0, %v3654_v43 }
 0x4f2   : > { %6238 = vrcp.f32 %v3981_v44  ;;  %v3870_v49 = vmul.f32 1.442695, %v3796_v46 }
 0x4f3   : > { %6240 = vpow2.f32 %v3866_v45  ;;  %v3872_v50 = vmul.f32 1.442695, %v3797_v48  ;;  %v3657_v51 = vpop.f32.mrb[76].mxu1 }
 0x4f4   : > { %v6225_v52 = vpop.eup %6224  ;;  %6242 = vpow2.f32 %v3868_v47  ;;  %v3658_v53 = vadd.f32 %v3657_v51, %v7288_v38  ;;  %v3659_v54 = vpop.f32.mrb[77].mxu1 }
 0x4f5   : > { %v6227_v55 = vpop.eup %6226  ;;  %v3982_v56 = vadd.f32 1.0, %v6225_v52  ;;  %6244 = vpow2.f32 %v3870_v49  ;;  %v3660_v39 = vadd.f32 %v3659_v54, %v7291_v57  ;;  %v3661_v58 = vpop.f32.mrb[78].mxu1 }
 0x4f6   : > { %v6229_v59 = vpop.eup %6228  ;;  %v3983_v60 = vadd.f32 1.0, %v6227_v55  ;;  %6246 = vpow2.f32 %v3872_v50  ;;  %v3798_v61 = vsub.f32 0.0, %v3658_v53  ;;  %v3662_v62 = vadd.f32 %v3661_v58, %v7288_v38  ;;  %v3663_v63 = vpop.f32.mrb[79].mxu1 }
 0x4f7   : > { %v6231_v0 = vpop.eup %6230  ;;  %6248 = vrcp.f32 %v3982_v56  ;;  %v3984_v1 = vadd.f32 1.0, %v6229_v59  ;;  %v3799_v2 = vsub.f32 0.0, %v3660_v39  ;;  %v3664_v3 = vadd.f32 %v3663_v63, %v7291_v57 }
 0x4f8   : > { %6250 = vrcp.f32 %v3983_v60  ;;  %v3985_v35 = vadd.f32 1.0, %v6231_v0  ;;  %v3874_v4 = vmul.f32 1.442695, %v3798_v61  ;;  %v3800_v5 = vsub.f32 0.0, %v3662_v62 }
 0x4f9   : > { %v6233_v37 = vpop.eup %6232  ;;  %6252 = vrcp.f32 %v3984_v1  ;;  %v3876_v6 = vmul.f32 1.442695, %v3799_v2  ;;  %v3801_v7 = vsub.f32 0.0, %v3664_v3 }
 0x4fa   : > { %v6235_v8 = vpop.eup %6234  ;;  %6254 = vrcp.f32 %v3985_v35  ;;  %v3878_v9 = vmul.f32 1.442695, %v3800_v5 }
 0x4fb   : > { %v6237_v10 = vpop.eup %6236  ;;  %6256 = vpow2.f32 %v3874_v4  ;;  %v3880_v11 = vmul.f32 1.442695, %v3801_v7  ;;  %v3667_v12 = vpop.f32.mrb[80].mxu1 }
 0x4fc   : > { %v6239_v13 = vpop.eup %6238  ;;  %6258 = vpow2.f32 %v3876_v6  ;;  %v3668_v14 = vadd.f32 %v3667_v12, %v7288_v38  ;;  %v3669_v15 = vpop.f32.mrb[81].mxu1  ;;  %v4170_v16 = vpack.c.bf16 %v6237_v10, %v6233_v37 }
 0x4fd   : > { %v6241_v17 = vpop.eup %6240  ;;  %6260 = vpow2.f32 %v3878_v9  ;;  %v3670_v18 = vadd.f32 %v3669_v15, %v7291_v57  ;;  %v3671_v19 = vpop.f32.mrb[82].mxu1  ;;  %v4171_v20 = vpack.c.bf16 %v6239_v13, %v6235_v8 }
 0x4fe   : > { %v6243_v21 = vpop.eup %6242  ;;  %v3986_v22 = vadd.f32 1.0, %v6241_v17  ;;  %6262 = vpow2.f32 %v3880_v11  ;;  %v3802_v23 = vsub.f32 0.0, %v3668_v14  ;;  %v3672_v24 = vadd.f32 %v3671_v19, %v7288_v38  ;;  %v3673_v25 = vpop.f32.mrb[83].mxu1 }
 0x4ff   : > { %v6245_v28 = vpop.eup %6244  ;;  %v3987_v29 = vadd.f32 1.0, %v6243_v21  ;;  %v3803_v30 = vsub.f32 0.0, %v3670_v18  ;;  %v3674_v31 = vadd.f32 %v3673_v25, %v7291_v57  ;;  %4369 = vmatprep.mubr.bf16.mxu1 %v4171_v20 }
 0x500   : > { %v6247_v32 = vpop.eup %6246  ;;  %6264 = vrcp.f32 %v3986_v22  ;;  %v3988_v33 = vadd.f32 1.0, %v6245_v28  ;;  %v3882_v34 = vmul.f32 1.442695, %v3802_v23  ;;  %v3804_v36 = vsub.f32 0.0, %v3672_v24  ;;  %4370 = vmatmul.mubr.bf16.vlgmr.msra.gmra.mrb[128].mxu1 %v4170_v16 }
 0x501   : > { %v6249_v40 = vpop.eup %6248  ;;  %6266 = vrcp.f32 %v3987_v29  ;;  %v3989_v41 = vadd.f32 1.0, %v6247_v32  ;;  %v3884_v42 = vmul.f32 1.442695, %v3803_v30  ;;  %v3805_v43 = vsub.f32 0.0, %v3674_v31  ;;  %5530 = vmatpush3.bf16.msra.mxu1 %v6212_v26 }
 0x502   : > { %v6251_v44 = vpop.eup %6250  ;;  %6268 = vrcp.f32 %v3988_v33  ;;  %v3886_v45 = vmul.f32 1.442695, %v3804_v36  ;;  %5531 = vmatprep.subr.bf16.mxu1 %v6213_v27 }
 0x503   : > { %v6253_v46 = vpop.eup %6252  ;;  %6270 = vrcp.f32 %v3989_v41  ;;  %v3888_v47 = vmul.f32 1.442695, %v3805_v43  ;;  %v3677_v48 = vpop.f32.mrb[84].mxu1 }
 0x504   : > { %v6255_v49 = vpop.eup %6254  ;;  %6272 = vpow2.f32 %v3882_v34  ;;  %v3678_v50 = vadd.f32 %v3677_v48, %v7288_v38  ;;  %v3679_v51 = vpop.f32.mrb[85].mxu1  ;;  %v4172_v52 = vpack.c.bf16 %v6253_v46, %v6249_v40 }
 0x505   : > { %v6257_v53 = vpop.eup %6256  ;;  %6274 = vpow2.f32 %v3884_v42  ;;  %v3680_v54 = vadd.f32 %v3679_v51, %v7291_v57  ;;  %v3681_v55 = vpop.f32.mrb[86].mxu1  ;;  %v4173_v56 = vpack.c.bf16 %v6255_v49, %v6251_v44  ;;  %5532 = vmatpush3.bf16.msra.mxu1 %v6213_v27 }
 0x506   : > { %v6259_v39 = vpop.eup %6258  ;;  %v3990_v58 = vadd.f32 1.0, %v6257_v53  ;;  %6276 = vpow2.f32 %v3886_v45  ;;  %v3806_v59 = vsub.f32 0.0, %v3678_v50  ;;  %v3682_v60 = vadd.f32 %v3681_v55, %v7288_v38  ;;  %v3683_v61 = vpop.f32.mrb[87].mxu1 }
 0x507   : > { %v6261_v62 = vpop.eup %6260  ;;  %v3991_v63 = vadd.f32 1.0, %v6259_v39  ;;  %6278 = vpow2.f32 %v3888_v47  ;;  %v3807_v0 = vsub.f32 0.0, %v3680_v54  ;;  %v3684_v1 = vadd.f32 %v3683_v61, %v7291_v57  ;;  %4377 = vmatprep.mubr.bf16.mxu1 %v4173_v56 }
 0x508   : > { %v6263_v2 = vpop.eup %6262  ;;  %6280 = vrcp.f32 %v3990_v58  ;;  %v3992_v3 = vadd.f32 1.0, %v6261_v62  ;;  %v3890_v35 = vmul.f32 1.442695, %v3806_v59  ;;  %v3808_v4 = vsub.f32 0.0, %v3682_v60  ;;  %4378 = vmatmul.mubr.bf16.gmra.mrb[132].mxu1 %v4172_v52 }
 0x509   : > { %6282 = vrcp.f32 %v3991_v63  ;;  %v3993_v5 = vadd.f32 1.0, %v6263_v2  ;;  %v3892_v37 = vmul.f32 1.442695, %v3807_v0  ;;  %v3809_v6 = vsub.f32 0.0, %v3684_v1 }
 0x50a   : > { %v6265_v7 = vpop.eup %6264  ;;  %6284 = vrcp.f32 %v3992_v3  ;;  %v3894_v8 = vmul.f32 1.442695, %v3808_v4 }
 0x50b   : > { %v6267_v9 = vpop.eup %6266  ;;  %6286 = vrcp.f32 %v3993_v5  ;;  %v3896_v10 = vmul.f32 1.442695, %v3809_v6  ;;  %v3687_v11 = vpop.f32.mrb[88].mxu1 }
 0x50c   : > { %v6269_v12 = vpop.eup %6268  ;;  %6288 = vpow2.f32 %v3890_v35  ;;  %v3688_v13 = vadd.f32 %v3687_v11, %v7288_v38  ;;  %v3689_v14 = vpop.f32.mrb[89].mxu1 }
 0x50d   : > { %v6271_v15 = vpop.eup %6270  ;;  %6290 = vpow2.f32 %v3892_v37  ;;  %v3690_v16 = vadd.f32 %v3689_v14, %v7291_v57  ;;  %v3691_v17 = vpop.f32.mrb[90].mxu1  ;;  %v4174_v18 = vpack.c.bf16 %v6269_v12, %v6265_v7 }
 0x50e   : > { %v6273_v19 = vpop.eup %6272  ;;  %6292 = vpow2.f32 %v3894_v8  ;;  %v3810_v20 = vsub.f32 0.0, %v3688_v13  ;;  %v3692_v21 = vadd.f32 %v3691_v17, %v7288_v38  ;;  %v3693_v22 = vpop.f32.mrb[91].mxu1  ;;  %v4175_v23 = vpack.c.bf16 %v6271_v15, %v6267_v9 }
 0x50f   : > { %v6275_v24 = vpop.eup %6274  ;;  %v3994_v25 = vadd.f32 1.0, %v6273_v19  ;;  %6294 = vpow2.f32 %v3896_v10  ;;  %v3811_v26 = vsub.f32 0.0, %v3690_v16  ;;  %v3694_v27 = vadd.f32 %v3693_v22, %v7291_v57 }
 0x510   : > { %v6277_v28 = vpop.eup %6276  ;;  %v3995_v29 = vadd.f32 1.0, %v6275_v24  ;;  %v3812_v30 = vsub.f32 0.0, %v3692_v21  ;;  %4385 = vmatprep.mubr.bf16.mxu1 %v4175_v23  ;;  %v3898_v33 = vmul.f32 1.442695, %v3810_v20 }
 0x511   : > { %v6279_v31 = vpop.eup %6278  ;;  %6296 = vrcp.f32 %v3994_v25  ;;  %v3996_v32 = vadd.f32 1.0, %v6277_v28  ;;  %v3813_v34 = vsub.f32 0.0, %v3694_v27  ;;  %4386 = vmatmul.mubr.bf16.gmra.mrb[136].mxu1 %v4174_v18  ;;  %v3900_v41 = vmul.f32 1.442695, %v3811_v26 }
 0x512   : > { %v6281_v36 = vpop.eup %6280  ;;  %6298 = vrcp.f32 %v3995_v29  ;;  %v3997_v40 = vadd.f32 1.0, %v6279_v31  ;;  %v3902_v43 = vmul.f32 1.442695, %v3812_v30 }
 0x513   : > { %v6283_v42 = vpop.eup %6282  ;;  %6300 = vrcp.f32 %v3996_v32  ;;  %v3697_v44 = vpop.f32.mrb[92].mxu1  ;;  %v3904_v46 = vmul.f32 1.442695, %v3813_v34 }
 0x514   : > { %v6285_v45 = vpop.eup %6284  ;;  %6302 = vrcp.f32 %v3997_v40  ;;  %v3698_v47 = vadd.f32 %v3697_v44, %v7288_v38  ;;  %v3699_v48 = vpop.f32.mrb[93].mxu1 }
 0x515   : > { %v6287_v49 = vpop.eup %6286  ;;  %6304 = vpow2.f32 %v3898_v33  ;;  %v3700_v50 = vadd.f32 %v3699_v48, %v7291_v57  ;;  %v3701_v51 = vpop.f32.mrb[94].mxu1  ;;  %v4176_v52 = vpack.c.bf16 %v6285_v45, %v6281_v36 }
 0x516   : > { %v6289_v53 = vpop.eup %6288  ;;  %6306 = vpow2.f32 %v3900_v41  ;;  %v3814_v54 = vsub.f32 0.0, %v3698_v47  ;;  %v3702_v55 = vadd.f32 %v3701_v51, %v7288_v38  ;;  %v3703_v56 = vpop.f32.mrb[95].mxu1  ;;  %v4177_v39 = vpack.c.bf16 %v6287_v49, %v6283_v42 }
 0x517   : > { %v6291_v58 = vpop.eup %6290  ;;  %v3998_v59 = vadd.f32 1.0, %v6289_v53  ;;  %6308 = vpow2.f32 %v3902_v43  ;;  %v3815_v60 = vsub.f32 0.0, %v3700_v50  ;;  %v3704_v61 = vadd.f32 %v3703_v56, %v7291_v57 }
 0x518   : > { %v6293_v62 = vpop.eup %6292  ;;  %v3999_v63 = vadd.f32 1.0, %v6291_v58  ;;  %6310 = vpow2.f32 %v3904_v46  ;;  %v3816_v0 = vsub.f32 0.0, %v3702_v55  ;;  %4393 = vmatprep.mubr.bf16.mxu1 %v4177_v39  ;;  %v3906_v3 = vmul.f32 1.442695, %v3814_v54 }
 0x519   : > { %v6295_v1 = vpop.eup %6294  ;;  %6312 = vrcp.f32 %v3998_v59  ;;  %v4000_v2 = vadd.f32 1.0, %v6293_v62  ;;  %v3817_v35 = vsub.f32 0.0, %v3704_v61  ;;  %4394 = vmatmul.mubr.bf16.gmra.mrb[140].mxu1 %v4176_v52  ;;  %v3908_v5 = vmul.f32 1.442695, %v3815_v60 }
 0x51a   : > { %6314 = vrcp.f32 %v3999_v63  ;;  %v4001_v4 = vadd.f32 1.0, %v6295_v1  ;;  %v3910_v6 = vmul.f32 1.442695, %v3816_v0 }
 0x51b   : > { %v6297_v37 = vpop.eup %6296  ;;  %6316 = vrcp.f32 %v4000_v2  ;;  %v3707_v7 = vpop.f32.mrb[96].mxu1  ;;  %v3912_v9 = vmul.f32 1.442695, %v3817_v35 }
 0x51c   : > { %v6299_v8 = vpop.eup %6298  ;;  %6318 = vrcp.f32 %v4001_v4  ;;  %v3708_v10 = vadd.f32 %v3707_v7, %v7288_v38  ;;  %v3709_v11 = vpop.f32.mrb[97].mxu1 }
 0x51d   : > { %v6301_v12 = vpop.eup %6300  ;;  %6320 = vpow2.f32 %v3906_v3  ;;  %v3710_v13 = vadd.f32 %v3709_v11, %v7291_v57  ;;  %v3711_v14 = vpop.f32.mrb[98].mxu1 }
 0x51e   : > { %v6303_v15 = vpop.eup %6302  ;;  %6322 = vpow2.f32 %v3908_v5  ;;  %v3818_v16 = vsub.f32 0.0, %v3708_v10  ;;  %v3712_v17 = vadd.f32 %v3711_v14, %v7288_v38  ;;  %v3713_v18 = vpop.f32.mrb[99].mxu1  ;;  %v4178_v19 = vpack.c.bf16 %v6301_v12, %v6297_v37 }
 0x51f   : > { %v6305_v20 = vpop.eup %6304  ;;  %6324 = vpow2.f32 %v3910_v6  ;;  %v3819_v21 = vsub.f32 0.0, %v3710_v13  ;;  %v3714_v22 = vadd.f32 %v3713_v18, %v7291_v57  ;;  %v4179_v23 = vpack.c.bf16 %v6303_v15, %v6299_v8 }
 0x520   : > { %v6307_v24 = vpop.eup %6306  ;;  %v4002_v25 = vadd.f32 1.0, %v6305_v20  ;;  %6326 = vpow2.f32 %v3912_v9  ;;  %v3820_v26 = vsub.f32 0.0, %v3712_v17  ;;  %v3914_v32 = vmul.f32 1.442695, %v3818_v16 }
 0x521   : > { %v6309_v27 = vpop.eup %6308  ;;  %v4003_v28 = vadd.f32 1.0, %v6307_v24  ;;  %v3821_v29 = vsub.f32 0.0, %v3714_v22  ;;  %4401 = vmatprep.mubr.bf16.mxu1 %v4179_v23  ;;  %v3916_v36 = vmul.f32 1.442695, %v3819_v21 }
 0x522   : > { %v6311_v30 = vpop.eup %6310  ;;  %6328 = vrcp.f32 %v4002_v25  ;;  %v4004_v31 = vadd.f32 1.0, %v6309_v27  ;;  %4402 = vmatmul.mubr.bf16.gmra.mrb[144].mxu1 %v4178_v19  ;;  %v3918_v42 = vmul.f32 1.442695, %v3820_v26 }
 0x523   : > { %v6313_v33 = vpop.eup %6312  ;;  %6330 = vrcp.f32 %v4003_v28  ;;  %v4005_v34 = vadd.f32 1.0, %v6311_v30  ;;  %v3717_v40 = vpop.f32.mrb[100].mxu1  ;;  %v3920_v46 = vmul.f32 1.442695, %v3821_v29 }
 0x524   : > { %v6315_v41 = vpop.eup %6314  ;;  %6332 = vrcp.f32 %v4004_v31  ;;  %v3718_v43 = vadd.f32 %v3717_v40, %v7288_v38  ;;  %v3719_v44 = vpop.f32.mrb[101].mxu1 }
 0x525   : > { %v6317_v45 = vpop.eup %6316  ;;  %6334 = vrcp.f32 %v4005_v34  ;;  %v3720_v47 = vadd.f32 %v3719_v44, %v7291_v57  ;;  %v3721_v48 = vpop.f32.mrb[102].mxu1 }
 0x526   : > { %v6319_v49 = vpop.eup %6318  ;;  %6336 = vpow2.f32 %v3914_v32  ;;  %v3822_v50 = vsub.f32 0.0, %v3718_v43  ;;  %v3722_v51 = vadd.f32 %v3721_v48, %v7288_v38  ;;  %v3723_v52 = vpop.f32.mrb[103].mxu1  ;;  %v4180_v53 = vpack.c.bf16 %v6317_v45, %v6313_v33 }
 0x527   : > { %v6321_v54 = vpop.eup %6320  ;;  %6338 = vpow2.f32 %v3916_v36  ;;  %v3823_v55 = vsub.f32 0.0, %v3720_v47  ;;  %v3724_v56 = vadd.f32 %v3723_v52, %v7291_v57  ;;  %v4181_v39 = vpack.c.bf16 %v6319_v49, %v6315_v41 }
 0x528   : > { %v6323_v58 = vpop.eup %6322  ;;  %v4006_v59 = vadd.f32 1.0, %v6321_v54  ;;  %6340 = vpow2.f32 %v3918_v42  ;;  %v3824_v60 = vsub.f32 0.0, %v3722_v51  ;;  %v3922_v2 = vmul.f32 1.442695, %v3822_v50 }
 0x529   : > { %v6325_v61 = vpop.eup %6324  ;;  %v4007_v62 = vadd.f32 1.0, %v6323_v58  ;;  %6342 = vpow2.f32 %v3920_v46  ;;  %v3825_v63 = vsub.f32 0.0, %v3724_v56  ;;  %4409 = vmatprep.mubr.bf16.mxu1 %v4181_v39  ;;  %v3924_v35 = vmul.f32 1.442695, %v3823_v55 }
 0x52a   : > { %v6327_v0 = vpop.eup %6326  ;;  %6344 = vrcp.f32 %v4006_v59  ;;  %v4008_v1 = vadd.f32 1.0, %v6325_v61  ;;  %4410 = vmatmul.mubr.bf16.gmra.mrb[148].mxu1 %v4180_v53  ;;  %v3926_v37 = vmul.f32 1.442695, %v3824_v60 }
 0x52b   : > { %6346 = vrcp.f32 %v4007_v62  ;;  %v4009_v3 = vadd.f32 1.0, %v6327_v0  ;;  %v3727_v4 = vpop.f32.mrb[104].mxu1  ;;  %v3928_v9 = vmul.f32 1.442695, %v3825_v63 }
 0x52c   : > { %v6329_v5 = vpop.eup %6328  ;;  %6348 = vrcp.f32 %v4008_v1  ;;  %v3728_v6 = vadd.f32 %v3727_v4, %v7288_v38  ;;  %v3729_v7 = vpop.f32.mrb[105].mxu1 }
 0x52d   : > { %v6331_v8 = vpop.eup %6330  ;;  %6350 = vrcp.f32 %v4009_v3  ;;  %v3730_v10 = vadd.f32 %v3729_v7, %v7291_v57  ;;  %v3731_v11 = vpop.f32.mrb[106].mxu1 }
 0x52e   : > { %v6333_v12 = vpop.eup %6332  ;;  %6352 = vpow2.f32 %v3922_v2  ;;  %v3826_v13 = vsub.f32 0.0, %v3728_v6  ;;  %v3732_v14 = vadd.f32 %v3731_v11, %v7288_v38  ;;  %v3733_v15 = vpop.f32.mrb[107].mxu1 }
 0x52f   : > { %v6335_v16 = vpop.eup %6334  ;;  %6354 = vpow2.f32 %v3924_v35  ;;  %v3827_v17 = vsub.f32 0.0, %v3730_v10  ;;  %v3734_v18 = vadd.f32 %v3733_v15, %v7291_v57  ;;  %v4182_v19 = vpack.c.bf16 %v6333_v12, %v6329_v5 }
 0x530   : > { %v6337_v20 = vpop.eup %6336  ;;  %6356 = vpow2.f32 %v3926_v37  ;;  %v3930_v21 = vmul.f32 1.442695, %v3826_v13  ;;  %v3828_v22 = vsub.f32 0.0, %v3732_v14  ;;  %v4183_v23 = vpack.c.bf16 %v6335_v16, %v6331_v8 }
 0x531   : > { %v6339_v24 = vpop.eup %6338  ;;  %v4010_v25 = vadd.f32 1.0, %v6337_v20  ;;  %6358 = vpow2.f32 %v3928_v9  ;;  %v3829_v26 = vsub.f32 0.0, %v3734_v18  ;;  %v3932_v31 = vmul.f32 1.442695, %v3827_v17 }
 0x532   : > { %v6341_v27 = vpop.eup %6340  ;;  %v4011_v28 = vadd.f32 1.0, %v6339_v24  ;;  %6360 = vpow2.f32 %v3930_v21  ;;  %4417 = vmatprep.mubr.bf16.mxu1 %v4183_v23  ;;  %v3934_v36 = vmul.f32 1.442695, %v3828_v22 }
 0x533   : > { %v6343_v29 = vpop.eup %6342  ;;  %6362 = vrcp.f32 %v4010_v25  ;;  %v4012_v30 = vadd.f32 1.0, %v6341_v27  ;;  %4418 = vmatmul.mubr.bf16.gmra.mrb[152].mxu1 %v4182_v19  ;;  %v3737_v32 = vpop.f32.mrb[108].mxu1  ;;  %v3936_v43 = vmul.f32 1.442695, %v3829_v26 }
 0x534   : > { %v6345_v33 = vpop.eup %6344  ;;  %6364 = vrcp.f32 %v4011_v28  ;;  %v4013_v34 = vadd.f32 1.0, %v6343_v29  ;;  %v3738_v40 = vadd.f32 %v3737_v32, %v7288_v38  ;;  %v3739_v41 = vpop.f32.mrb[109].mxu1 }
 0x535   : > { %v6347_v42 = vpop.eup %6346  ;;  %6366 = vrcp.f32 %v4012_v30  ;;  %v3740_v44 = vadd.f32 %v3739_v41, %v7291_v57  ;;  %v3741_v45 = vpop.f32.mrb[110].mxu1 }
 0x536   : > { %v6349_v46 = vpop.eup %6348  ;;  %6368 = vrcp.f32 %v4013_v34  ;;  %v3830_v47 = vsub.f32 0.0, %v3738_v40  ;;  %v3742_v48 = vadd.f32 %v3741_v45, %v7288_v38  ;;  %v3743_v49 = vpop.f32.mrb[111].mxu1 }
 0x537   : > { %v6351_v50 = vpop.eup %6350  ;;  %6370 = vpow2.f32 %v3932_v31  ;;  %v3744_v51 = vadd.f32 %v3743_v49, %v7291_v57  ;;  %v4184_v52 = vpack.c.bf16 %v6349_v46, %v6345_v33  ;;  %v3831_v55 = vsub.f32 0.0, %v3740_v44 }
 0x538   : > { %v6353_v53 = vpop.eup %6352  ;;  %6372 = vpow2.f32 %v3934_v36  ;;  %v3938_v54 = vmul.f32 1.442695, %v3830_v47  ;;  %v4185_v56 = vpack.c.bf16 %v6351_v50, %v6347_v42  ;;  %v3832_v59 = vsub.f32 0.0, %v3742_v48 }
 0x539   : > { %v6355_v39 = vpop.eup %6354  ;;  %v4014_v58 = vadd.f32 1.0, %v6353_v53  ;;  %6374 = vpow2.f32 %v3936_v43  ;;  %v3833_v62 = vsub.f32 0.0, %v3744_v51  ;;  %v3940_v35 = vmul.f32 1.442695, %v3831_v55 }
 0x53a   : > { %v6357_v60 = vpop.eup %6356  ;;  %v4015_v61 = vadd.f32 1.0, %v6355_v39  ;;  %6376 = vpow2.f32 %v3938_v54  ;;  %4425 = vmatprep.mubr.bf16.mxu1 %v4185_v56  ;;  %v3942_v7 = vmul.f32 1.442695, %v3832_v59 }
 0x53b   : > { %v6359_v63 = vpop.eup %6358  ;;  %6378 = vrcp.f32 %v4014_v58  ;;  %v4016_v0 = vadd.f32 1.0, %v6357_v60  ;;  %4426 = vmatmul.mubr.bf16.gmra.mrb[156].mxu1 %v4184_v52  ;;  %v3747_v1 = vpop.f32.mrb[112].mxu1  ;;  %v3944_v11 = vmul.f32 1.442695, %v3833_v62 }
 0x53c   : > { %v6361_v2 = vpop.eup %6360  ;;  %6380 = vrcp.f32 %v4015_v61  ;;  %v4017_v3 = vadd.f32 1.0, %v6359_v63  ;;  %v3748_v4 = vadd.f32 %v3747_v1, %v7288_v38  ;;  %v3749_v5 = vpop.f32.mrb[113].mxu1 }
 0x53d   : > { %v6363_v37 = vpop.eup %6362  ;;  %6382 = vrcp.f32 %v4016_v0  ;;  %v4018_v6 = vadd.f32 1.0, %v6361_v2  ;;  %v3750_v8 = vadd.f32 %v3749_v5, %v7291_v57  ;;  %v3751_v9 = vpop.f32.mrb[114].mxu1 }
 0x53e   : > { %v6365_v10 = vpop.eup %6364  ;;  %6384 = vrcp.f32 %v4017_v3  ;;  %v3834_v12 = vsub.f32 0.0, %v3748_v4  ;;  %v3752_v13 = vadd.f32 %v3751_v9, %v7288_v38  ;;  %v3753_v14 = vpop.f32.mrb[115].mxu1 }
 0x53f   : > { %v6367_v15 = vpop.eup %6366  ;;  %6386 = vrcp.f32 %v4018_v6  ;;  %v3754_v16 = vadd.f32 %v3753_v14, %v7291_v57  ;;  %v3835_v19 = vsub.f32 0.0, %v3750_v8 }
 0x540   : > { %v6369_v17 = vpop.eup %6368  ;;  %6388 = vpow2.f32 %v3940_v35  ;;  %v3946_v18 = vmul.f32 1.442695, %v3834_v12  ;;  %v4186_v20 = vpack.c.bf16 %v6367_v15, %v6363_v37  ;;  %v3836_v22 = vsub.f32 0.0, %v3752_v13 }
 0x541   : > { %v6371_v21 = vpop.eup %6370  ;;  %6390 = vpow2.f32 %v3942_v7  ;;  %v4187_v23 = vpack.c.bf16 %v6369_v17, %v6365_v10  ;;  %v3837_v26 = vsub.f32 0.0, %v3754_v16  ;;  %v3948_v32 = vmul.f32 1.442695, %v3835_v19 }
 0x542   : > { %v6373_v24 = vpop.eup %6372  ;;  %v4019_v25 = vadd.f32 1.0, %v6371_v21  ;;  %6392 = vpow2.f32 %v3944_v11  ;;  %v3950_v41 = vmul.f32 1.442695, %v3836_v22 }
 0x543   : > { %v6375_v27 = vpop.eup %6374  ;;  %v4020_v28 = vadd.f32 1.0, %v6373_v24  ;;  %6394 = vpow2.f32 %v3946_v18  ;;  %4433 = vmatprep.mubr.bf16.mxu1 %v4187_v23  ;;  %v3757_v29 = vpop.f32.mrb[116].mxu1  ;;  %v3952_v45 = vmul.f32 1.442695, %v3837_v26 }
 0x544   : > { %v6377_v30 = vpop.eup %6376  ;;  %6396 = vrcp.f32 %v4019_v25  ;;  %v4021_v31 = vadd.f32 1.0, %v6375_v27  ;;  %4434 = vmatmul.mubr.bf16.gmra.mrb[160].mxu1 %v4186_v20  ;;  %v3758_v33 = vadd.f32 %v3757_v29, %v7288_v38  ;;  %v3759_v34 = vpop.f32.mrb[117].mxu1 }
 0x545   : > { %v6379_v36 = vpop.eup %6378  ;;  %6398 = vrcp.f32 %v4020_v28  ;;  %v4022_v40 = vadd.f32 1.0, %v6377_v30  ;;  %v3760_v42 = vadd.f32 %v3759_v34, %v7291_v57  ;;  %v3761_v43 = vpop.f32.mrb[118].mxu1 }
 0x546   : > { %v6381_v44 = vpop.eup %6380  ;;  %6400 = vrcp.f32 %v4021_v31  ;;  %v3838_v46 = vsub.f32 0.0, %v3758_v33  ;;  %v3762_v47 = vadd.f32 %v3761_v43, %v7288_v38  ;;  %v3763_v48 = vpop.f32.mrb[119].mxu1 }
 0x547   : > { %v6383_v49 = vpop.eup %6382  ;;  %6402 = vrcp.f32 %v4022_v40  ;;  %v3839_v50 = vsub.f32 0.0, %v3760_v42  ;;  %v3764_v51 = vadd.f32 %v3763_v48, %v7291_v57 }
 0x548   : > { %v6385_v52 = vpop.eup %6384  ;;  %6404 = vpow2.f32 %v3948_v32  ;;  %v3954_v53 = vmul.f32 1.442695, %v3838_v46  ;;  %v3840_v54 = vsub.f32 0.0, %v3762_v47  ;;  %v4188_v55 = vpack.c.bf16 %v6383_v49, %v6379_v36 }
 0x549   : > { %v6387_v56 = vpop.eup %6386  ;;  %6406 = vpow2.f32 %v3950_v41  ;;  %v3956_v39 = vmul.f32 1.442695, %v3839_v50  ;;  %v3841_v58 = vsub.f32 0.0, %v3764_v51  ;;  %v4189_v59 = vpack.c.bf16 %v6385_v52, %v6381_v44 }
 0x54a   : > { %v6389_v60 = vpop.eup %6388  ;;  %6408 = vpow2.f32 %v3952_v45  ;;  %v3958_v2 = vmul.f32 1.442695, %v3840_v54 }
 0x54b   : > { %v6391_v61 = vpop.eup %6390  ;;  %v4023_v62 = vadd.f32 1.0, %v6389_v60  ;;  %6410 = vpow2.f32 %v3954_v53  ;;  %4441 = vmatprep.mubr.bf16.mxu1 %v4189_v59  ;;  %v3767_v63 = vpop.f32.mrb[120].mxu1  ;;  %v3960_v37 = vmul.f32 1.442695, %v3841_v58 }
 0x54c   : > { %v6393_v0 = vpop.eup %6392  ;;  %v4024_v1 = vadd.f32 1.0, %v6391_v61  ;;  %6412 = vpow2.f32 %v3956_v39  ;;  %4442 = vmatmul.mubr.bf16.gmra.mrb[164].mxu1 %v4188_v55  ;;  %v3768_v3 = vadd.f32 %v3767_v63, %v7288_v38  ;;  %v3769_v35 = vpop.f32.mrb[121].mxu1 }
 0x54d   : > { %v6395_v4 = vpop.eup %6394  ;;  %6414 = vrcp.f32 %v4023_v62  ;;  %v4025_v5 = vadd.f32 1.0, %v6393_v0  ;;  %v3770_v6 = vadd.f32 %v3769_v35, %v7291_v57  ;;  %v3771_v7 = vpop.f32.mrb[122].mxu1 }
 0x54e   : > { %v6397_v8 = vpop.eup %6396  ;;  %6416 = vrcp.f32 %v4024_v1  ;;  %v4026_v9 = vadd.f32 1.0, %v6395_v4  ;;  %v3842_v10 = vsub.f32 0.0, %v3768_v3  ;;  %v3772_v11 = vadd.f32 %v3771_v7, %v7288_v38  ;;  %v3773_v12 = vpop.f32.mrb[123].mxu1 }
 0x54f   : > { %v6399_v13 = vpop.eup %6398  ;;  %6418 = vrcp.f32 %v4025_v5  ;;  %v3843_v14 = vsub.f32 0.0, %v3770_v6  ;;  %v3774_v15 = vadd.f32 %v3773_v12, %v7291_v57 }
 0x550   : > { %v6401_v16 = vpop.eup %6400  ;;  %6420 = vrcp.f32 %v4026_v9  ;;  %v3962_v17 = vmul.f32 1.442695, %v3842_v10  ;;  %v3844_v18 = vsub.f32 0.0, %v3772_v11  ;;  %v4190_v19 = vpack.c.bf16 %v6399_v13, %v6387_v56  ;;  %v6214_v9 = vld [vmem:[%s7591_s9 + $0x10] sm:$0xff]   ;;  %v6215_v13 = vld [vmem:[%s7591_s9 + $0x18] sm:$0xff]  }
 0x551   : > { %v6403_v20 = vpop.eup %6402  ;;  %6422 = vpow2.f32 %v3958_v2  ;;  %v3964_v21 = vmul.f32 1.442695, %v3843_v14  ;;  %v3845_v22 = vsub.f32 0.0, %v3774_v15  ;;  %v4191_v23 = vpack.c.bf16 %v6401_v16, %v6397_v8  ;;  %5533 = vmatprep.subr.bf16.mxu1 %v6214_v9 }
 0x552   : > { %v6405_v24 = vpop.eup %6404  ;;  %6424 = vpow2.f32 %v3960_v37  ;;  %v3966_v30 = vmul.f32 1.442695, %v3844_v18  ;;  %5534 = vmatpush3.bf16.msra.mxu1 %v6214_v9 }
 0x553   : > { %v6407_v25 = vpop.eup %6406  ;;  %v4027_v26 = vadd.f32 1.0, %v6405_v24  ;;  %6426 = vpow2.f32 %v3962_v17  ;;  %4449 = vmatprep.mubr.bf16.mxu1 %v4191_v23  ;;  %v3777_v27 = vpop.f32.mrb[124].mxu1  ;;  %v3968_v36 = vmul.f32 1.442695, %v3845_v22  ;;  %5535 = vmatprep.subr.bf16.mxu1 %v6215_v13 }
 0x554   : > { %v6409_v28 = vpop.eup %6408  ;;  %v4028_v29 = vadd.f32 1.0, %v6407_v25  ;;  %6428 = vpow2.f32 %v3964_v21  ;;  %4450 = vmatmul.mubr.bf16.gmra.mrb[168].mxu1 %v4190_v19  ;;  %v3778_v31 = vadd.f32 %v3777_v27, %v7288_v38  ;;  %v3779_v32 = vpop.f32.mrb[125].mxu1 }
 0x555   : > { %v6411_v33 = vpop.eup %6410  ;;  %6430 = vrcp.f32 %v4027_v26  ;;  %v4029_v34 = vadd.f32 1.0, %v6409_v28  ;;  %v3780_v40 = vadd.f32 %v3779_v32, %v7291_v57  ;;  %v3781_v41 = vpop.f32.mrb[126].mxu1 }
 0x556   : > { %v6413_v42 = vpop.eup %6412  ;;  %6432 = vrcp.f32 %v4028_v29  ;;  %v4030_v43 = vadd.f32 1.0, %v6411_v33  ;;  %v3846_v44 = vsub.f32 0.0, %v3778_v31  ;;  %v3782_v45 = vadd.f32 %v3781_v41, %v7288_v38  ;;  %v3783_v46 = vpop.f32.mrb[127].mxu1  ;;  %5536 = vmatpush3.bf16.msra.mxu1 %v6215_v13 }
 0x557   : > { %v6415_v47 = vpop.eup %6414  ;;  %6434 = vrcp.f32 %v4029_v34  ;;  %v4031_v48 = vadd.f32 1.0, %v6413_v42  ;;  %v3847_v49 = vsub.f32 0.0, %v3780_v40  ;;  %v3784_v50 = vadd.f32 %v3783_v46, %v7291_v57 }
 0x558   : > { %v6417_v51 = vpop.eup %6416  ;;  %6436 = vrcp.f32 %v4030_v43  ;;  %v3970_v52 = vmul.f32 1.442695, %v3846_v44  ;;  %v3848_v39 = vsub.f32 0.0, %v3782_v45  ;;  %v7372_v44 = vld [vmem:[%s7621_s20] ss:$0 sm:$0xff]  ;;  %s7533_s20 = scalar_lea.hbm %s7624_s16, %s5396_s29 }
 0x559   : > { %v6419_v53 = vpop.eup %6418  ;;  %6438 = vrcp.f32 %v4031_v48  ;;  %v3972_v54 = vmul.f32 1.442695, %v3847_v49  ;;  %v4192_v55 = vpack.c.bf16 %v6417_v51, %v6403_v20  ;;  %v3849_v38 = vsub.f32 0.0, %v3784_v50 }
 0x55a   : > { %v6421_v56 = vpop.eup %6420  ;;  %6440 = vpow2.f32 %v3966_v30  ;;  %v4193_v58 = vpack.c.bf16 %v6419_v53, %v6415_v47  ;;  %v3974_v0 = vmul.f32 1.442695, %v3848_v39 }
 0x55b   : > { %v6423_v59 = vpop.eup %6422  ;;  %6442 = vpow2.f32 %v3968_v36  ;;  %v3976_v2 = vmul.f32 1.442695, %v3849_v38 }
 0x55c   : > { %v6425_v60 = vpop.eup %6424  ;;  %v4032_v61 = vadd.f32 1.0, %v6423_v59  ;;  %6444 = vpow2.f32 %v3970_v52  ;;  %4457 = vmatprep.mubr.bf16.mxu1 %v4193_v58 }
 0x55d   : > { %v6427_v62 = vpop.eup %6426  ;;  %v4033_v57 = vadd.f32 1.0, %v6425_v60  ;;  %6446 = vpow2.f32 %v3972_v54  ;;  %4458 = vmatmul.mubr.bf16.gmra.mrb[172].mxu1 %v4192_v55 }
 0x55e   : > { %v6429_v63 = vpop.eup %6428  ;;  %6448 = vrcp.f32 %v4032_v61  ;;  %v4034_v4 = vadd.f32 1.0, %v6427_v62 }
 0x55f   : > { %v6431_v1 = vpop.eup %6430  ;;  %6450 = vrcp.f32 %v4033_v57  ;;  %v4035_v6 = vadd.f32 1.0, %v6429_v63 }
 0x560   : > { %v6433_v3 = vpop.eup %6432  ;;  %6452 = vpow2.f32 %v3974_v0 }
 0x561   : > { %v6435_v35 = vpop.eup %6434  ;;  %v4194_v5 = vpack.c.bf16 %v6433_v3, %v6421_v56  ;;  %6454 = vpow2.f32 %v3976_v2 }
 0x562   : > { %v6437_v37 = vpop.eup %6436  ;;  %v4195_v7 = vpack.c.bf16 %v6435_v35, %v6431_v1  ;;  %6456 = vrcp.f32 %v4034_v4 }
 0x563   : > { %v6439_v8 = vpop.eup %6438  ;;  %6458 = vrcp.f32 %v4035_v6 }
 0x564   : > { %v6441_v10 = vpop.eup %6440  ;;  %4465 = vmatprep.mubr.bf16.mxu1 %v4195_v7 }
 0x565   : > { %v6443_v11 = vpop.eup %6442  ;;  %v4036_v12 = vadd.f32 1.0, %v6441_v10  ;;  %4466 = vmatmul.mubr.bf16.gmra.mrb[176].mxu1 %v4194_v5 }
 0x566   : > { %v6445_v14 = vpop.eup %6444  ;;  %v4037_v15 = vadd.f32 1.0, %v6443_v11 }
 0x567   : > { %v6447_v16 = vpop.eup %6446  ;;  %6460 = vrcp.f32 %v4036_v12  ;;  %v4038_v19 = vadd.f32 1.0, %v6445_v14 }
 0x568   : > { %v6449_v17 = vpop.eup %6448  ;;  %6462 = vrcp.f32 %v4037_v15  ;;  %v4039_v21 = vadd.f32 1.0, %v6447_v16 }
 0x569   : > { %v6451_v18 = vpop.eup %6450  ;;  %v4196_v20 = vpack.c.bf16 %v6449_v17, %v6437_v37  ;;  %6464 = vrcp.f32 %v4038_v19 }
 0x56a   : > { %v4197_v22 = vpack.c.bf16 %v6451_v18, %v6439_v8  ;;  %v6453_v23 = vpop.eup %6452  ;;  %6466 = vrcp.f32 %v4039_v21 }
 0x56b   : > { %v6455_v24 = vpop.eup %6454  ;;  %v4040_v25 = vadd.f32 1.0, %v6453_v23 }
 0x56c   : > { %4473 = vmatprep.mubr.bf16.mxu1 %v4197_v22  ;;  %v4041_v26 = vadd.f32 1.0, %v6455_v24  ;;  %v6457_v27 = vpop.eup %6456 }
 0x56d   : > { %4474 = vmatmul.mubr.bf16.gmra.mrb[180].mxu1 %v4196_v20  ;;  %6468 = vrcp.f32 %v4040_v25  ;;  %v6459_v28 = vpop.eup %6458 }
 0x56e   : > { %6470 = vrcp.f32 %v4041_v26 }
 0x571   : > { %v6461_v29 = vpop.eup %6460 }
 0x572   : > { %v6463_v30 = vpop.eup %6462  ;;  %v4198_v31 = vpack.c.bf16 %v6461_v29, %v6457_v27 }
 0x573   : > { %v4199_v32 = vpack.c.bf16 %v6463_v30, %v6459_v28  ;;  %v6465_v33 = vpop.eup %6464 }
 0x574   : > { %v6467_v34 = vpop.eup %6466 }
 0x575   : > { %4481 = vmatprep.mubr.bf16.mxu1 %v4199_v32 }
 0x576   : > { %4482 = vmatmul.mubr.bf16.gmra.mrb[184].mxu1 %v4198_v31 }
 0x577   : > { %v6469_v36 = vpop.eup %6468 }
 0x578   : > { %v6471_v40 = vpop.eup %6470  ;;  %v4200_v41 = vpack.c.bf16 %v6469_v36, %v6465_v33 }
 0x579   : > { %v4201_v42 = vpack.c.bf16 %v6471_v40, %v6467_v34 }
 0x57b   : > { %4489 = vmatprep.mubr.bf16.mxu1 %v4201_v42 }
 0x57e   : > { %4490 = vmatmul.mubr.bf16.gmra.mrb[188].mxu1 %v4200_v41 }
 0x5d3   : > { %v5413_v43 = vpop.f32.mrb[128].mxu1 }
 0x5d4   : > { %v5414_v45 = vpop.f32.mrb[129].mxu1 }
 0x5d5   : > { %v5415_v46 = vadd.f32 %v5414_v45, %v5413_v43  ;;  %v5416_v47 = vpop.f32.mrb[130].mxu1 }
 0x5d6   : > { %v5417_v48 = vpop.f32.mrb[131].mxu1 }
 0x5d7   : > { %v4372_v49 = vadd.f32 %v5415_v46, %v7372_v44  ;;  %v5418_v50 = vadd.f32 %v5417_v48, %v5416_v47 }
 0x5d9   : > { %v4375_v51 = vadd.f32 %v5418_v50, %v7372_v44  ;;  %v4498_v52 = vmax.f32 %v4372_v49, 0.0 }
 0x5db   : > { %v4499_v53 = vmax.f32 %v4375_v51, 0.0  ;;  %v5419_v54 = vpop.f32.mrb[132].mxu1 }
 0x5dc   : > { %v5420_v55 = vpop.f32.mrb[133].mxu1 }
 0x5dd   : > { %v4530_v56 = vpack.c.bf16 %v4499_v53, %v4498_v52  ;;  %v5421_v39 = vadd.f32 %v5420_v55, %v5419_v54  ;;  %v5422_v58 = vpop.f32.mrb[134].mxu1 }
 0x5de   : > { %v5423_v59 = vpop.f32.mrb[135].mxu1 }
 0x5df   : > { %v4380_v38 = vadd.f32 %v5421_v39, %v7372_v44  ;;  %v5424_v60 = vadd.f32 %v5423_v59, %v5422_v58  ;;  %5537 = vmatprep.mubr.msk.bf16.mxu1 %vm4585_vm0, %v4530_v56 }
 0x5e1   : > { %v4383_v61 = vadd.f32 %v5424_v60, %v7372_v44  ;;  %v4500_v62 = vmax.f32 %v4380_v38, 0.0 }
 0x5e3   : > { %v4501_v57 = vmax.f32 %v4383_v61, 0.0 }
 0x5e4   : > { %v5425_v63 = vpop.f32.mrb[136].mxu1 }
 0x5e5   : > { %v4531_v0 = vpack.c.bf16 %v4501_v57, %v4500_v62  ;;  %v5426_v1 = vpop.f32.mrb[137].mxu1 }
 0x5e6   : > { %v5427_v2 = vadd.f32 %v5426_v1, %v5425_v63  ;;  %v5428_v3 = vpop.f32.mrb[138].mxu1 }
 0x5e7   : > { %v5429_v35 = vpop.f32.mrb[139].mxu1  ;;  %5538 = vmatmul.mubr.msk.bf16.vlgmr.msra.gmra.mrb[192].mxu1 %vm4585_vm0, %v4531_v0 }
 0x5e8   : > { %v4388_v4 = vadd.f32 %v5427_v2, %v7372_v44  ;;  %v5430_v5 = vadd.f32 %v5429_v35, %v5428_v3 }
 0x5ea   : > { %v4391_v37 = vadd.f32 %v5430_v5, %v7372_v44  ;;  %v4502_v6 = vmax.f32 %v4388_v4, 0.0 }
 0x5ec   : > { %v4503_v7 = vmax.f32 %v4391_v37, 0.0  ;;  %v5431_v8 = vpop.f32.mrb[140].mxu1 }
 0x5ed   : > { %v5432_v9 = vpop.f32.mrb[141].mxu1 }
 0x5ee   : > { %v4532_v10 = vpack.c.bf16 %v4503_v7, %v4502_v6  ;;  %v5433_v11 = vadd.f32 %v5432_v9, %v5431_v8  ;;  %v5434_v12 = vpop.f32.mrb[142].mxu1 }
 0x5ef   : > { %v5435_v13 = vpop.f32.mrb[143].mxu1 }
 0x5f0   : > { %v4396_v14 = vadd.f32 %v5433_v11, %v7372_v44  ;;  %v5436_v15 = vadd.f32 %v5435_v13, %v5434_v12  ;;  %5541 = vmatprep.mubr.msk.bf16.mxu1 %vm4585_vm0, %v4532_v10 }
 0x5f2   : > { %v4399_v16 = vadd.f32 %v5436_v15, %v7372_v44  ;;  %v4504_v17 = vmax.f32 %v4396_v14, 0.0 }
 0x5f4   : > { %v4505_v18 = vmax.f32 %v4399_v16, 0.0 }
 0x5f5   : > { %v5437_v19 = vpop.f32.mrb[144].mxu1 }
 0x5f6   : > { %v4533_v20 = vpack.c.bf16 %v4505_v18, %v4504_v17  ;;  %v5438_v21 = vpop.f32.mrb[145].mxu1 }
 0x5f7   : > { %v5439_v22 = vadd.f32 %v5438_v21, %v5437_v19  ;;  %v5440_v23 = vpop.f32.mrb[146].mxu1 }
 0x5f8   : > { %v5441_v24 = vpop.f32.mrb[147].mxu1  ;;  %5542 = vmatmul.mubr.msk.bf16.gmra.mrb[196].mxu1 %vm4585_vm0, %v4533_v20 }
 0x5f9   : > { %v4404_v25 = vadd.f32 %v5439_v22, %v7372_v44  ;;  %v5442_v26 = vadd.f32 %v5441_v24, %v5440_v23 }
 0x5fb   : > { %v4407_v27 = vadd.f32 %v5442_v26, %v7372_v44  ;;  %v4506_v28 = vmax.f32 %v4404_v25, 0.0 }
 0x5fd   : > { %v4507_v29 = vmax.f32 %v4407_v27, 0.0  ;;  %v5443_v30 = vpop.f32.mrb[148].mxu1 }
 0x5fe   : > { %v5444_v31 = vpop.f32.mrb[149].mxu1 }
 0x5ff   : > { %v4534_v32 = vpack.c.bf16 %v4507_v29, %v4506_v28  ;;  %v5445_v33 = vadd.f32 %v5444_v31, %v5443_v30  ;;  %v5446_v34 = vpop.f32.mrb[150].mxu1 }
 0x600   : > { %v5447_v36 = vpop.f32.mrb[151].mxu1 }
 0x601   : > { %v4412_v40 = vadd.f32 %v5445_v33, %v7372_v44  ;;  %v5448_v41 = vadd.f32 %v5447_v36, %v5446_v34  ;;  %5545 = vmatprep.mubr.msk.bf16.mxu1 %vm4585_vm0, %v4534_v32 }
 0x603   : > { %v4415_v42 = vadd.f32 %v5448_v41, %v7372_v44  ;;  %v4508_v43 = vmax.f32 %v4412_v40, 0.0 }
 0x605   : > { %v4509_v45 = vmax.f32 %v4415_v42, 0.0 }
 0x606   : > { %v5449_v46 = vpop.f32.mrb[152].mxu1 }
 0x607   : > { %v4535_v47 = vpack.c.bf16 %v4509_v45, %v4508_v43  ;;  %v5450_v48 = vpop.f32.mrb[153].mxu1 }
 0x608   : > { %v5451_v49 = vadd.f32 %v5450_v48, %v5449_v46  ;;  %v5452_v50 = vpop.f32.mrb[154].mxu1 }
 0x609   : > { %v5453_v51 = vpop.f32.mrb[155].mxu1  ;;  %5546 = vmatmul.mubr.msk.bf16.gmra.mrb[200].mxu1 %vm4585_vm0, %v4535_v47 }
 0x60a   : > { %v4420_v52 = vadd.f32 %v5451_v49, %v7372_v44  ;;  %v5454_v53 = vadd.f32 %v5453_v51, %v5452_v50 }
 0x60c   : > { %v4423_v54 = vadd.f32 %v5454_v53, %v7372_v44  ;;  %v4510_v55 = vmax.f32 %v4420_v52, 0.0 }
 0x60e   : > { %v4511_v56 = vmax.f32 %v4423_v54, 0.0  ;;  %v5455_v39 = vpop.f32.mrb[156].mxu1 }
 0x60f   : > { %v5456_v58 = vpop.f32.mrb[157].mxu1 }
 0x610   : > { %v4536_v59 = vpack.c.bf16 %v4511_v56, %v4510_v55  ;;  %v5457_v38 = vadd.f32 %v5456_v58, %v5455_v39  ;;  %v5458_v60 = vpop.f32.mrb[158].mxu1 }
 0x611   : > { %v5459_v61 = vpop.f32.mrb[159].mxu1 }
 0x612   : > { %v4428_v62 = vadd.f32 %v5457_v38, %v7372_v44  ;;  %v5460_v57 = vadd.f32 %v5459_v61, %v5458_v60  ;;  %5549 = vmatprep.mubr.msk.bf16.mxu1 %vm4585_vm0, %v4536_v59 }
 0x614   : > { %v4431_v63 = vadd.f32 %v5460_v57, %v7372_v44  ;;  %v4512_v0 = vmax.f32 %v4428_v62, 0.0 }
 0x616   : > { %v4513_v1 = vmax.f32 %v4431_v63, 0.0 }
 0x617   : > { %v5461_v2 = vpop.f32.mrb[160].mxu1 }
 0x618   : > { %v4537_v3 = vpack.c.bf16 %v4513_v1, %v4512_v0  ;;  %v5462_v35 = vpop.f32.mrb[161].mxu1 }
 0x619   : > { %v5463_v4 = vadd.f32 %v5462_v35, %v5461_v2  ;;  %v5464_v5 = vpop.f32.mrb[162].mxu1 }
 0x61a   : > { %v5465_v37 = vpop.f32.mrb[163].mxu1  ;;  %5550 = vmatmul.mubr.msk.bf16.gmra.mrb[204].mxu1 %vm4585_vm0, %v4537_v3 }
 0x61b   : > { %v4436_v6 = vadd.f32 %v5463_v4, %v7372_v44  ;;  %v5466_v7 = vadd.f32 %v5465_v37, %v5464_v5 }
 0x61d   : > { %v4439_v8 = vadd.f32 %v5466_v7, %v7372_v44  ;;  %v4514_v9 = vmax.f32 %v4436_v6, 0.0 }
 0x61f   : > { %v4515_v10 = vmax.f32 %v4439_v8, 0.0  ;;  %v5467_v11 = vpop.f32.mrb[164].mxu1 }
 0x620   : > { %v5468_v12 = vpop.f32.mrb[165].mxu1 }
 0x621   : > { %v4538_v13 = vpack.c.bf16 %v4515_v10, %v4514_v9  ;;  %v5469_v14 = vadd.f32 %v5468_v12, %v5467_v11  ;;  %v5470_v15 = vpop.f32.mrb[166].mxu1 }
 0x622   : > { %v5471_v16 = vpop.f32.mrb[167].mxu1 }
 0x623   : > { %v4444_v17 = vadd.f32 %v5469_v14, %v7372_v44  ;;  %v5472_v18 = vadd.f32 %v5471_v16, %v5470_v15  ;;  %5553 = vmatprep.mubr.msk.bf16.mxu1 %vm4585_vm0, %v4538_v13 }
 0x625   : > { %v4447_v19 = vadd.f32 %v5472_v18, %v7372_v44  ;;  %v4516_v20 = vmax.f32 %v4444_v17, 0.0 }
 0x627   : > { %v4517_v21 = vmax.f32 %v4447_v19, 0.0  ;;  %v5473_v22 = vpop.f32.mrb[168].mxu1 }
 0x628   : > { %v5474_v23 = vpop.f32.mrb[169].mxu1 }
 0x629   : > { %v4539_v24 = vpack.c.bf16 %v4517_v21, %v4516_v20  ;;  %v5475_v25 = vadd.f32 %v5474_v23, %v5473_v22  ;;  %v5476_v26 = vpop.f32.mrb[170].mxu1 }
 0x62a   : > { %v5477_v27 = vpop.f32.mrb[171].mxu1 }
 0x62b   : > { %v4452_v28 = vadd.f32 %v5475_v25, %v7372_v44  ;;  %v5478_v29 = vadd.f32 %v5477_v27, %v5476_v26  ;;  %5554 = vmatmul.mubr.msk.bf16.gmra.mrb[208].mxu1 %vm4585_vm0, %v4539_v24  ;;  %v7425_v26 = vld [vmem:[%s7622_s8] ss:$0 sm:$0xff]  ;;  %s6590_s8 = sshll.u32 %s6670_s14, 4  ;;  %s6591_s8 = int_to_ptr.vmem [resolvable:$false] %s6590_s8 }
 0x62c   : > { %s6592_s10 = scalar_lea.vmem %s6591_s8, 8192  ;;  %p6593_p12 = scmp.lt.s32.totalorder %s7535_s15, %s6591_s8 }
 0x62d   : > { %v4455_v30 = vadd.f32 %v5478_v29, %v7372_v44  ;;  %v4518_v31 = vmax.f32 %v4452_v28, 0.0  ;;  %v7430_v28 = vld [vmem:[%s7623_s19] ss:$0 sm:$0xff]  ;;  %p6594_p1 = scmp.lt.s32.totalorder %s6592_s10, %s6586_s17 }
 0x62f   : > { %v4519_v32 = vmax.f32 %v4455_v30, 0.0  ;;  %p6595_p2 = por %p6594_p1, %p6593_p12 }
 0x630   : > { %v5479_v33 = vpop.f32.mrb[172].mxu1 }
 0x631   : > { %v4540_v34 = vpack.c.bf16 %v4519_v32, %v4518_v31  ;;  %v5480_v36 = vpop.f32.mrb[173].mxu1  ;;  %p6596_p4 = pnand %p6595_p2, %p6589_p7 }
 0x632   : > { %v5481_v40 = vadd.f32 %v5480_v36, %v5479_v33  ;;  %v5482_v41 = vpop.f32.mrb[174].mxu1 }
 0x633   : > { %v5483_v42 = vpop.f32.mrb[175].mxu1  ;;  %5557 = vmatprep.mubr.msk.bf16.mxu1 %vm4585_vm0, %v4540_v34 }
 0x634   : > { %v4460_v43 = vadd.f32 %v5481_v40, %v7372_v44  ;;  %v5484_v45 = vadd.f32 %v5483_v42, %v5482_v41 }
 0x636   : > { %v4463_v46 = vadd.f32 %v5484_v45, %v7372_v44  ;;  %v4520_v47 = vmax.f32 %v4460_v43, 0.0 }
 0x638   : > { %v4521_v48 = vmax.f32 %v4463_v46, 0.0  ;;  %v5485_v49 = vpop.f32.mrb[176].mxu1 }
 0x639   : > { %v5486_v50 = vpop.f32.mrb[177].mxu1 }
 0x63a   : > { %v4541_v51 = vpack.c.bf16 %v4521_v48, %v4520_v47  ;;  %v5487_v52 = vadd.f32 %v5486_v50, %v5485_v49  ;;  %v5488_v53 = vpop.f32.mrb[178].mxu1 }
 0x63b   : > { %v5489_v54 = vpop.f32.mrb[179].mxu1 }
 0x63c   : > { %v4468_v55 = vadd.f32 %v5487_v52, %v7372_v44  ;;  %v5490_v56 = vadd.f32 %v5489_v54, %v5488_v53  ;;  %5558 = vmatmul.mubr.msk.bf16.gmra.mrb[212].mxu1 %vm4585_vm0, %v4541_v51 }
 0x63e   : > { %v4471_v39 = vadd.f32 %v5490_v56, %v7372_v44  ;;  %v4522_v58 = vmax.f32 %v4468_v55, 0.0 }
 0x640   : > { %v4523_v59 = vmax.f32 %v4471_v39, 0.0  ;;  %v5491_v38 = vpop.f32.mrb[180].mxu1 }
 0x641   : > { %v5492_v60 = vpop.f32.mrb[181].mxu1 }
 0x642   : > { %v4542_v61 = vpack.c.bf16 %v4523_v59, %v4522_v58  ;;  %v5493_v62 = vadd.f32 %v5492_v60, %v5491_v38  ;;  %v5494_v57 = vpop.f32.mrb[182].mxu1 }
 0x643   : > { %v5495_v63 = vpop.f32.mrb[183].mxu1 }
 0x644   : > { %v4476_v0 = vadd.f32 %v5493_v62, %v7372_v44  ;;  %v5496_v1 = vadd.f32 %v5495_v63, %v5494_v57  ;;  %5561 = vmatprep.mubr.msk.bf16.mxu1 %vm4585_vm0, %v4542_v61 }
 0x646   : > { %v4479_v2 = vadd.f32 %v5496_v1, %v7372_v44  ;;  %v4524_v3 = vmax.f32 %v4476_v0, 0.0 }
 0x648   : > { %v4525_v35 = vmax.f32 %v4479_v2, 0.0 }
 0x649   : > { %v5497_v4 = vpop.f32.mrb[184].mxu1 }
 0x64a   : > { %v4543_v5 = vpack.c.bf16 %v4525_v35, %v4524_v3  ;;  %v5498_v37 = vpop.f32.mrb[185].mxu1 }
 0x64b   : > { %v5499_v6 = vadd.f32 %v5498_v37, %v5497_v4  ;;  %v5500_v7 = vpop.f32.mrb[186].mxu1 }
 0x64c   : > { %v5501_v8 = vpop.f32.mrb[187].mxu1  ;;  %5562 = vmatmul.mubr.msk.bf16.gmra.mrb[216].mxu1 %vm4585_vm0, %v4543_v5 }
 0x64d   : > { %v4484_v9 = vadd.f32 %v5499_v6, %v7372_v44  ;;  %v5502_v10 = vadd.f32 %v5501_v8, %v5500_v7 }
 0x64f   : > { %v4487_v11 = vadd.f32 %v5502_v10, %v7372_v44  ;;  %v4526_v12 = vmax.f32 %v4484_v9, 0.0 }
 0x651   : > { %v4527_v13 = vmax.f32 %v4487_v11, 0.0  ;;  %v5503_v14 = vpop.f32.mrb[188].mxu1 }
 0x652   : > { %v5504_v15 = vpop.f32.mrb[189].mxu1 }
 0x653   : > { %v4544_v16 = vpack.c.bf16 %v4527_v13, %v4526_v12  ;;  %v5505_v17 = vadd.f32 %v5504_v15, %v5503_v14  ;;  %v5506_v18 = vpop.f32.mrb[190].mxu1 }
 0x654   : > { %v5507_v19 = vpop.f32.mrb[191].mxu1 }
 0x655   : > { %v4492_v20 = vadd.f32 %v5505_v17, %v7372_v44  ;;  %v5508_v21 = vadd.f32 %v5507_v19, %v5506_v18  ;;  %5565 = vmatprep.mubr.msk.bf16.mxu1 %vm4585_vm0, %v4544_v16 }
 0x657   : > { %v4495_v22 = vadd.f32 %v5508_v21, %v7372_v44  ;;  %v4528_v23 = vmax.f32 %v4492_v20, 0.0 }
 0x659   : > { %v4529_v24 = vmax.f32 %v4495_v22, 0.0 }
 0x65b   : > { %v4545_v25 = vpack.c.bf16 %v4529_v24, %v4528_v23 }
 0x65d   : > { %5566 = vmatmul.mubr.msk.bf16.gmra.mrb[220].mxu1 %vm4585_vm0, %v4545_v25 }
 0x6ba   : > { %v5539_v27 = vpop.f32.mrb[192].mxu1 }
 0x6bb   : > { %v4677_v29 = vadd.f32 %v5539_v27, %v7425_v26  ;;  %v4668_v44 = vpop.f32.mrb[193].mxu1 }
 0x6bc   : > { %v4669_v30 = vadd.f32 %v7425_v26, %v4668_v44  ;;  %v5540_v31 = vpop.f32.mrb[194].mxu1 }
 0x6bd   : > { %v4804_v32 = vmul.f32 %v7430_v28, %v4677_v29  ;;  %v4680_v33 = vadd.f32 %v5540_v31, %v7425_v26  ;;  %v4671_v34 = vpop.f32.mrb[195].mxu1 }
 0x6be   : > { %v4802_v36 = vmul.f32 %v7430_v28, %v4669_v30  ;;  %v4672_v40 = vadd.f32 %v7425_v26, %v4671_v34 }
 0x6bf   : > { %v4836_v41 = vand.u32 2147483647, %v4804_v32  ;;  %v4805_v42 = vmul.f32 %v7430_v28, %v4680_v33 }
 0x6c0   : > { %v4834_v43 = vand.u32 2147483647, %v4802_v36  ;;  %v4803_v45 = vmul.f32 %v7430_v28, %v4672_v40 }
 0x6c1   : > { %4868 = vst [vmem:[%s7441_s27 + $0x10] sm:$0xff] %v4836_v41  ;;  %v4837_v46 = vand.u32 2147483647, %v4805_v42 }
 0x6c2   : > { %4866 = vst [vmem:[%s7441_s27] sm:$0xff] %v4834_v43  ;;  %v4835_v47 = vand.u32 2147483647, %v4803_v45 }
 0x6c3   : > { %4869 = vst [vmem:[%s7441_s27 + $0x18] sm:$0xff] %v4837_v46 }
 0x6c4   : > { %4867 = vst [vmem:[%s7441_s27 + $0x8] sm:$0xff] %v4835_v47 }
 0x6cb   : > { %v5543_v48 = vpop.f32.mrb[196].mxu1 }
 0x6cc   : > { %v4693_v49 = vadd.f32 %v5543_v48, %v7425_v26  ;;  %v4684_v50 = vpop.f32.mrb[197].mxu1 }
 0x6cd   : > { %v4685_v51 = vadd.f32 %v7425_v26, %v4684_v50  ;;  %v5544_v52 = vpop.f32.mrb[198].mxu1 }
 0x6ce   : > { %v4808_v53 = vmul.f32 %v7430_v28, %v4693_v49  ;;  %v4696_v54 = vadd.f32 %v5544_v52, %v7425_v26  ;;  %v4687_v55 = vpop.f32.mrb[199].mxu1 }
 0x6cf   : > { %v4806_v56 = vmul.f32 %v7430_v28, %v4685_v51  ;;  %v4688_v39 = vadd.f32 %v7425_v26, %v4687_v55 }
 0x6d0   : > { %v4840_v58 = vand.u32 2147483647, %v4808_v53  ;;  %v4809_v59 = vmul.f32 %v7430_v28, %v4696_v54 }
 0x6d1   : > { %v4838_v38 = vand.u32 2147483647, %v4806_v56  ;;  %v4807_v60 = vmul.f32 %v7430_v28, %v4688_v39 }
 0x6d2   : > { %4872 = vst [vmem:[%s7441_s27 + $0x30] sm:$0xff] %v4840_v58  ;;  %v4841_v61 = vand.u32 2147483647, %v4809_v59 }
 0x6d3   : > { %4870 = vst [vmem:[%s7441_s27 + $0x20] sm:$0xff] %v4838_v38  ;;  %v4839_v62 = vand.u32 2147483647, %v4807_v60 }
 0x6d4   : > { %4873 = vst [vmem:[%s7441_s27 + $0x38] sm:$0xff] %v4841_v61 }
 0x6d5   : > { %4871 = vst [vmem:[%s7441_s27 + $0x28] sm:$0xff] %v4839_v62 }
 0x6dc   : > { %v5547_v57 = vpop.f32.mrb[200].mxu1 }
 0x6dd   : > { %v4709_v63 = vadd.f32 %v5547_v57, %v7425_v26  ;;  %v4700_v0 = vpop.f32.mrb[201].mxu1 }
 0x6de   : > { %v4701_v1 = vadd.f32 %v7425_v26, %v4700_v0  ;;  %v5548_v2 = vpop.f32.mrb[202].mxu1 }
 0x6df   : > { %v4812_v3 = vmul.f32 %v7430_v28, %v4709_v63  ;;  %v4712_v35 = vadd.f32 %v5548_v2, %v7425_v26  ;;  %v4703_v4 = vpop.f32.mrb[203].mxu1 }
 0x6e0   : > { %v4810_v5 = vmul.f32 %v7430_v28, %v4701_v1  ;;  %v4704_v37 = vadd.f32 %v7425_v26, %v4703_v4 }
 0x6e1   : > { %v4844_v6 = vand.u32 2147483647, %v4812_v3  ;;  %v4813_v7 = vmul.f32 %v7430_v28, %v4712_v35 }
 0x6e2   : > { %v4842_v8 = vand.u32 2147483647, %v4810_v5  ;;  %v4811_v9 = vmul.f32 %v7430_v28, %v4704_v37 }
 0x6e3   : > { %4876 = vst [vmem:[%s7441_s27 + $0x50] sm:$0xff] %v4844_v6  ;;  %v4845_v10 = vand.u32 2147483647, %v4813_v7 }
 0x6e4   : > { %4874 = vst [vmem:[%s7441_s27 + $0x40] sm:$0xff] %v4842_v8  ;;  %v4843_v11 = vand.u32 2147483647, %v4811_v9 }
 0x6e5   : > { %4877 = vst [vmem:[%s7441_s27 + $0x58] sm:$0xff] %v4845_v10 }
 0x6e6   : > { %4875 = vst [vmem:[%s7441_s27 + $0x48] sm:$0xff] %v4843_v11 }
 0x6ed   : > { %v5551_v12 = vpop.f32.mrb[204].mxu1 }
 0x6ee   : > { %v4725_v13 = vadd.f32 %v5551_v12, %v7425_v26  ;;  %v4716_v14 = vpop.f32.mrb[205].mxu1 }
 0x6ef   : > { %v4717_v15 = vadd.f32 %v7425_v26, %v4716_v14  ;;  %v5552_v16 = vpop.f32.mrb[206].mxu1 }
 0x6f0   : > { %v4816_v17 = vmul.f32 %v7430_v28, %v4725_v13  ;;  %v4728_v18 = vadd.f32 %v5552_v16, %v7425_v26  ;;  %v4719_v19 = vpop.f32.mrb[207].mxu1 }
 0x6f1   : > { %v4814_v20 = vmul.f32 %v7430_v28, %v4717_v15  ;;  %v4720_v21 = vadd.f32 %v7425_v26, %v4719_v19 }
 0x6f2   : > { %v4848_v22 = vand.u32 2147483647, %v4816_v17  ;;  %v4817_v23 = vmul.f32 %v7430_v28, %v4728_v18 }
 0x6f3   : > { %v4846_v24 = vand.u32 2147483647, %v4814_v20  ;;  %v4815_v25 = vmul.f32 %v7430_v28, %v4720_v21 }
 0x6f4   : > { %4880 = vst [vmem:[%s7441_s27 + $0x70] sm:$0xff] %v4848_v22  ;;  %v4849_v27 = vand.u32 2147483647, %v4817_v23 }
 0x6f5   : > { %4878 = vst [vmem:[%s7441_s27 + $0x60] sm:$0xff] %v4846_v24  ;;  %v4847_v29 = vand.u32 2147483647, %v4815_v25 }
 0x6f6   : > { %4881 = vst [vmem:[%s7441_s27 + $0x78] sm:$0xff] %v4849_v27 }
 0x6f7   : > { %4879 = vst [vmem:[%s7441_s27 + $0x68] sm:$0xff] %v4847_v29 }
 0x6fe   : > { %v5555_v44 = vpop.f32.mrb[208].mxu1 }
 0x6ff   : > { %v4741_v30 = vadd.f32 %v5555_v44, %v7425_v26  ;;  %v4732_v31 = vpop.f32.mrb[209].mxu1 }
 0x700   : > { %v4733_v32 = vadd.f32 %v7425_v26, %v4732_v31  ;;  %v5556_v33 = vpop.f32.mrb[210].mxu1 }
 0x701   : > { %v4820_v34 = vmul.f32 %v7430_v28, %v4741_v30  ;;  %v4744_v36 = vadd.f32 %v5556_v33, %v7425_v26  ;;  %v4735_v40 = vpop.f32.mrb[211].mxu1 }
 0x702   : > { %v4818_v41 = vmul.f32 %v7430_v28, %v4733_v32  ;;  %v4736_v42 = vadd.f32 %v7425_v26, %v4735_v40 }
 0x703   : > { %v4852_v43 = vand.u32 2147483647, %v4820_v34  ;;  %v4821_v45 = vmul.f32 %v7430_v28, %v4744_v36 }
 0x704   : > { %v4850_v46 = vand.u32 2147483647, %v4818_v41  ;;  %v4819_v47 = vmul.f32 %v7430_v28, %v4736_v42 }
 0x705   : > { %4884 = vst [vmem:[%s7441_s27 + $0x90] sm:$0xff] %v4852_v43  ;;  %v4853_v48 = vand.u32 2147483647, %v4821_v45 }
 0x706   : > { %4882 = vst [vmem:[%s7441_s27 + $0x80] sm:$0xff] %v4850_v46  ;;  %v4851_v49 = vand.u32 2147483647, %v4819_v47 }
 0x707   : > { %4885 = vst [vmem:[%s7441_s27 + $0x98] sm:$0xff] %v4853_v48 }
 0x708   : > { %4883 = vst [vmem:[%s7441_s27 + $0x88] sm:$0xff] %v4851_v49 }
 0x70f   : > { %v5559_v50 = vpop.f32.mrb[212].mxu1 }
 0x710   : > { %v4757_v51 = vadd.f32 %v5559_v50, %v7425_v26  ;;  %v4748_v52 = vpop.f32.mrb[213].mxu1 }
 0x711   : > { %v4749_v53 = vadd.f32 %v7425_v26, %v4748_v52  ;;  %v5560_v54 = vpop.f32.mrb[214].mxu1 }
 0x712   : > { %v4824_v55 = vmul.f32 %v7430_v28, %v4757_v51  ;;  %v4760_v56 = vadd.f32 %v5560_v54, %v7425_v26  ;;  %v4751_v39 = vpop.f32.mrb[215].mxu1 }
 0x713   : > { %v4822_v58 = vmul.f32 %v7430_v28, %v4749_v53  ;;  %v4752_v59 = vadd.f32 %v7425_v26, %v4751_v39 }
 0x714   : > { %v4856_v38 = vand.u32 2147483647, %v4824_v55  ;;  %v4825_v60 = vmul.f32 %v7430_v28, %v4760_v56 }
 0x715   : > { %v4854_v61 = vand.u32 2147483647, %v4822_v58  ;;  %v4823_v62 = vmul.f32 %v7430_v28, %v4752_v59 }
 0x716   : > { %4888 = vst [vmem:[%s7441_s27 + $0xb0] sm:$0xff] %v4856_v38  ;;  %v4857_v57 = vand.u32 2147483647, %v4825_v60 }
 0x717   : > { %4886 = vst [vmem:[%s7441_s27 + $0xa0] sm:$0xff] %v4854_v61  ;;  %v4855_v63 = vand.u32 2147483647, %v4823_v62 }
 0x718   : > { %4889 = vst [vmem:[%s7441_s27 + $0xb8] sm:$0xff] %v4857_v57 }
 0x719   : > { %4887 = vst [vmem:[%s7441_s27 + $0xa8] sm:$0xff] %v4855_v63 }
 0x71f   : > { %v5563_v0 = vpop.f32.mrb[216].mxu1 }
 0x720   : > { %v4773_v1 = vadd.f32 %v5563_v0, %v7425_v26  ;;  %v4764_v2 = vpop.f32.mrb[217].mxu1 }
 0x721   : > { %v4765_v3 = vadd.f32 %v7425_v26, %v4764_v2  ;;  %v5564_v35 = vpop.f32.mrb[218].mxu1 }
 0x722   : > { %v4828_v4 = vmul.f32 %v7430_v28, %v4773_v1  ;;  %v4776_v5 = vadd.f32 %v5564_v35, %v7425_v26  ;;  %v4767_v37 = vpop.f32.mrb[219].mxu1 }
 0x723   : > { %v4826_v6 = vmul.f32 %v7430_v28, %v4765_v3  ;;  %v4768_v7 = vadd.f32 %v7425_v26, %v4767_v37 }
 0x724   : > { %v4860_v8 = vand.u32 2147483647, %v4828_v4  ;;  %v4829_v9 = vmul.f32 %v7430_v28, %v4776_v5 }
 0x725   : > { %v4858_v10 = vand.u32 2147483647, %v4826_v6  ;;  %v4827_v11 = vmul.f32 %v7430_v28, %v4768_v7 }
 0x726   : > { %4892 = vst [vmem:[%s7441_s27 + $0xd0] sm:$0xff] %v4860_v8  ;;  %v4861_v12 = vand.u32 2147483647, %v4829_v9 }
 0x727   : > { %4890 = vst [vmem:[%s7441_s27 + $0xc0] sm:$0xff] %v4858_v10  ;;  %v4859_v13 = vand.u32 2147483647, %v4827_v11 }
 0x728   : > { %4893 = vst [vmem:[%s7441_s27 + $0xd8] sm:$0xff] %v4861_v12 }
 0x729   : > { %4891 = vst [vmem:[%s7441_s27 + $0xc8] sm:$0xff] %v4859_v13 }
 0x730   : > { %v5567_v14 = vpop.f32.mrb[220].mxu1 }
 0x731   : > { %v4789_v15 = vadd.f32 %v5567_v14, %v7425_v26  ;;  %v4780_v16 = vpop.f32.mrb[221].mxu1 }
 0x732   : > { %v4781_v17 = vadd.f32 %v7425_v26, %v4780_v16  ;;  %v5568_v18 = vpop.f32.mrb[222].mxu1 }
 0x733   : > { %v4832_v19 = vmul.f32 %v7430_v28, %v4789_v15  ;;  %v4792_v20 = vadd.f32 %v5568_v18, %v7425_v26  ;;  %v4783_v21 = vpop.f32.mrb[223].mxu1 }
 0x734   : > { %v4830_v22 = vmul.f32 %v7430_v28, %v4781_v17  ;;  %v4784_v23 = vadd.f32 %v7425_v26, %v4783_v21 }
 0x735   : > { %v4864_v24 = vand.u32 2147483647, %v4832_v19  ;;  %v4833_v25 = vmul.f32 %v7430_v28, %v4792_v20 }
 0x736   : > { %v4862_v27 = vand.u32 2147483647, %v4830_v22  ;;  %v4831_v29 = vmul.f32 %v7430_v28, %v4784_v23 }
 0x737   : > { %4896 = vst [vmem:[%s7441_s27 + $0xf0] sm:$0xff] %v4864_v24  ;;  %v4865_v44 = vand.u32 2147483647, %v4833_v25 }
 0x738   : > { %4894 = vst [vmem:[%s7441_s27 + $0xe0] sm:$0xff] %v4862_v27  ;;  %v4863_v26 = vand.u32 2147483647, %v4831_v29 }
 0x739   : > { %4897 = vst [vmem:[%s7441_s27 + $0xf8] sm:$0xff] %v4865_v44 }
 0x73a   : > { %4895 = vst [vmem:[%s7441_s27 + $0xe8] sm:$0xff] %v4863_v26 }
 0x73b   : > { %6599 = shalt.err (!%p6596_p4)
}
 0x73c   : > { %s6600_s18 = scalar_lea.hbm %s7533_s20, 4096  ;;  %s6604_s27 = scalar_lea.hbm %s7624_s16, 8192 }
 0x73d   : > { %p6601_p9 = scmp.ne.s32.totalorder %s7533_s20, %s6600_s18  ;;  %p6605_p8 = scmp.lt.u32.totalorder %s7533_s20, %s7624_s16 }
 0x73e   : > { %p6606_p13 = scmp.lt.u32.totalorder %s6604_s27, %s6600_s18  ;;  %p6608_p10 = scmp.lt.u32.totalorder %s6600_s18, %s7533_s20 }
 0x73f   : > { %p6602_p0 = pnand %p6601_p9, %p6892_p5 }
 0x740   : > { %p6607_p6 = por %p6606_p13, %p6605_p8 }
 0x741   : > { %p6603_p11 = pneg %p6602_p0 }
 0x742   : > { %p6609_p3 = por %p6608_p10, %p6607_p6 }
 0x744   : > { %p6610_p7 = pnand %p6609_p3, %p6603_p11 }
 0x746   : > { %6613 = shalt.err (!%p6610_p7)
}
 0x747   : > { %s6671_s13 = smov 128   ;;  %s6672_s17 = smov 8  }
 0x748   : > { %5839 = dma.vmem_to_hbm [thread:$0]  (%p6892_p5), %s7535_s15, 4096, %s7533_s20, %s4899_s25, %s6671_s13, %s6671_s13, %s6672_s17  }
 0x749 PF: > { %s7625_s14 = sld [smem:[#allocation15_spill]]  ;;  %s7626_s8 = sld [smem:[#allocation16_spill]] }
 0x74a   : > { %p7628_p1 = scmp.ge.s32.totalorder %s6660_s24, 2 }
 0x74f   : > { %s4927_s10 = sand.u32 1, %s7625_s14   ;;  %p7627_p12 = scmp.ne.s32.totalorder %s7626_s8, 0 }
 0x750   : > { %s4928_s18 = scalar_lea.sflag [#allocation4], %s4927_s10 }
 0x751   : > { %p5856_p2 = pnand %p7628_p1, %p7627_p12 }
 0x753   : > { %6643 = dma.done.wait (!%p5856_p2), %s4928_s18, 4096  }
 0x754   : > { %6645 = vsyncadd (!%p5856_p2), %s4928_s18, 4294963200  ;;  %s7629_s19 = smov %s6878_s21  ;;  %p27_p4 = scmp.ge.s32.totalorder %s6878_s21, 4  }
 0x755   : > { %s7630_s21 = smov %s6652_s22  ;;  %s7631_s22 = smov %s6656_s23 }
 0x756   : > { %s7632_s23 = smov %s6888_s11  ;;  %s7633_s24 = smov %s7629_s19 }
 0x757   :  { %29 = sbr.rel (!%p27_p4) target bundleno = 12 (0xc), region = 125 }
 0x75e   :  { %4933 = vsyncpa [#allocation3], 1 }
 0x75f   :  { %4935 = vsyncpa [#allocation3 + $0x1], 1 }
 0x760   :  { %4936 = vsyncpa [#allocation6], 1 }
 0x761   :  { %4937 = vsyncpa [#allocation9], 1 }
 0x762   :  { %4938 = vsyncpa [#allocation4], 1 }
 0x763   :  { %4940 = vsyncpa [#allocation4 + $0x1], 1 }

</bundles_post_ra>
